<compile_context>
chip_gen: v6e
topology: v6e:2x2x1
jax: 0.10.0
libtpu: 0.0.40
codegen_flags: <defaults>
</compile_context>

<pallas_src>
import functools

import jax
import jax.numpy as jnp
from jax.experimental import pallas as pl
from jax.experimental.pallas import tpu as pltpu


# TODO(synk): tiles_mlp_hidden != None (hidden MaskedLinear + sigmoid stack) is
# not implemented; this kernel reproduces the module's default (single Linear).
# TODO(synk): a further ~2x on the selection loop is possible by packing two
# batch elements per 8-sublane tile (OUT=4), at the cost of a risky relayout.


def _weldon_kernel(x_ref, wt_ref, b_ref, mask_ref, out_ref, *, n_extreme):
    """One batch block (Bb elements) per grid step.

    x_ref   : (Bb, N, F)    bf16   tile features
    wt_ref  : (Bb, OUT, F)  bf16   transposed weights, replicated over Bb
    b_ref   : (1, OUT, 1)   f32    bias
    mask_ref: (Bb, 1, N)    f32    1.0 == padded tile
    out_ref : (Bb, OUT, 1)  f32    mean of the 2*n_extreme extreme scores
    """
    # Batched MXU matmul with f32 accumulation; result lands directly in the
    # lane-dense (Bb, OUT, N) layout used by the selection loop.
    scores = jnp.einsum("bof,bnf->bon", wt_ref[...], x_ref[...],
                        preferred_element_type=jnp.float32)
    scores = scores + b_ref[...]                        # (Bb, OUT, N) f32

    padded = mask_ref[...] > 0.5                        # (Bb, 1, N) bool
    neg_inf = jnp.float32(-jnp.inf)
    pos_inf = jnp.float32(jnp.inf)

    bb, n_out, n_tiles = scores.shape
    col_ids = jax.lax.broadcasted_iota(jnp.int32, (bb, n_out, n_tiles), 2)

    s_top0 = jnp.where(padded, neg_inf, scores)
    s_bot0 = jnp.where(padded, pos_inf, scores)
    zero_acc = jnp.zeros((bb, n_out, 1), jnp.float32)

    def body(_, carry):
        st, sb, acc_t, acc_b = carry
        mt = jnp.max(st, axis=-1, keepdims=True)        # (Bb, OUT, 1), XLU
        mb = jnp.min(sb, axis=-1, keepdims=True)
        # Exhausted selections (over-padded bags) contribute 0, matching
        # ExtremeLayer (top_k returning +/-inf which are then zeroed).
        acc_t = acc_t + jnp.where(jnp.isfinite(mt), mt, 0.0)
        acc_b = acc_b + jnp.where(jnp.isfinite(mb), mb, 0.0)
        # Knock out the first occurrence of the current extreme value.
        first_t = jnp.min(jnp.where(st == mt, col_ids, n_tiles),
                          axis=-1, keepdims=True)
        first_b = jnp.min(jnp.where(sb == mb, col_ids, n_tiles),
                          axis=-1, keepdims=True)
        st = jnp.where(col_ids == first_t, neg_inf, st)
        sb = jnp.where(col_ids == first_b, pos_inf, sb)
        return st, sb, acc_t, acc_b

    _, _, acc_t, acc_b = jax.lax.fori_loop(
        0, n_extreme, body, (s_top0, s_bot0, zero_acc, zero_acc), unroll=True)

    out_ref[...] = (acc_t + acc_b) * jnp.float32(1.0 / (2 * n_extreme))


def weldon_forward(x, w, b, mask=None, *, n_extreme=10, block_b=None):
    """x: (B, N, F); w: (F, OUT); b: (OUT,); mask: optional (B, N, 1) bool
    (True == padded). Returns (B, OUT) f32 logits."""
    B, N, F = x.shape
    OUT = w.shape[1]

    # Pick a batch block that amortizes per-grid-step overhead but keeps the
    # per-step footprint well under the smallest default scoped VMEM (16 MiB
    # on v5e; 32 MiB on v6e/v7x), so no vmem_limit override is needed.
    if block_b is None:
        budget = 10 * 1024 * 1024
        bytes_per_b = (2 * N * F * 2        # double-buffered bf16 x block
                       + 2 * N * 4          # double-buffered f32 mask block
                       + 2 * OUT * F * 2    # replicated bf16 weight slice
                       + 6 * OUT * N * 4)   # live f32 selection arrays
        block_b = int(max(1, min(8, budget // max(bytes_per_b, 1))))
    block_b = int(max(1, min(block_b, B)))

    # Pad the batch so the grid divides evenly (padded rows are fully masked
    # and sliced off the output).
    Bp = ((B + block_b - 1) // block_b) * block_b

    x_bf = x.astype(jnp.bfloat16)
    if mask is None:
        m2 = jnp.zeros((B, N), jnp.float32)
    else:
        m2 = mask.reshape(B, N).astype(jnp.float32)
    if Bp > B:
        x_bf = jnp.concatenate(
            [x_bf, jnp.zeros((Bp - B, N, F), jnp.bfloat16)], axis=0)
        m2 = jnp.concatenate(
            [m2, jnp.ones((Bp - B, N), jnp.float32)], axis=0)
    mask_t = m2[:, None, :]                              # (Bp, 1, N)

    # Transposed weight replicated across the batch block: the kernel's batched
    # einsum then emits scores directly in (Bb, OUT, N) layout.  The index_map
    # is constant, so this block stays resident in VMEM across grid steps.
    wt_rep = jnp.broadcast_to(
        w.T.astype(jnp.bfloat16)[None], (block_b, OUT, F))
    b3 = b.astype(jnp.float32).reshape(1, OUT, 1)

    kernel = functools.partial(_weldon_kernel, n_extreme=n_extreme)

    out = pl.pallas_call(
        kernel,
        out_shape=jax.ShapeDtypeStruct((Bp, OUT, 1), jnp.float32),
        grid=(Bp // block_b,),
        in_specs=[
            pl.BlockSpec((block_b, N, F), lambda i: (i, 0, 0)),
            pl.BlockSpec((block_b, OUT, F), lambda i: (0, 0, 0)),
            pl.BlockSpec((1, OUT, 1), lambda i: (0, 0, 0)),
            pl.BlockSpec((block_b, 1, N), lambda i: (i, 0, 0)),
        ],
        out_specs=pl.BlockSpec((block_b, OUT, 1), lambda i: (i, 0, 0)),
        compiler_params=pltpu.CompilerParams(
            dimension_semantics=("parallel",)),
    )(x_bf, wt_rep, b3, mask_t)

    return out[:B, :, 0]


def weldon_reference(x, w, b, mask, n_extreme):
    """Pure-JAX reference mirroring the PyTorch semantics (bf16 matmul inputs,
    matching the kernel's dtype policy)."""
    scores = jnp.einsum("bnf,fo->bno", x.astype(jnp.bfloat16),
                        w.astype(jnp.bfloat16),
                        preferred_element_type=jnp.float32) + b
    padded = jnp.broadcast_to(mask, scores.shape)
    s_top = jnp.where(padded, -jnp.inf, scores)
    s_bot = jnp.where(padded, jnp.inf, scores)
    top = jax.lax.top_k(jnp.swapaxes(s_top, 1, 2), n_extreme)[0]   # (B, OUT, k)
    bot = -jax.lax.top_k(jnp.swapaxes(-s_bot, 1, 2), n_extreme)[0]
    top = jnp.where(jnp.isinf(top), 0.0, top)
    bot = jnp.where(jnp.isinf(bot), 0.0, bot)
    return (top.sum(-1) + bot.sum(-1)) / (2 * n_extreme)


if __name__ == "__main__":
    # Small synthetic shapes consistent with the module's forward signature.
    B, N_TILES, IN_FEATURES, OUT_FEATURES = 16, 64, 128, 4
    N_EXTREME = 4

    key = jax.random.PRNGKey(0)
    kx, kw = jax.random.split(key)

    x = jax.random.normal(kx, (B, N_TILES, IN_FEATURES), dtype=jnp.float32)

    # Xavier-uniform init for Linear(in_features, out_features), zero bias.
    bound = (6.0 / (IN_FEATURES + OUT_FEATURES)) ** 0.5
    w = jax.random.uniform(kw, (IN_FEATURES, OUT_FEATURES),
                           minval=-bound, maxval=bound, dtype=jnp.float32)
    b = jnp.zeros((OUT_FEATURES,), jnp.float32)

    # Mask: True for padded tiles.  Exercise tail padding, an over-padded bag
    # (fewer valid tiles than n_extreme) and a fully padded bag.
    mask = jnp.zeros((B, N_TILES, 1), dtype=bool)
    mask = mask.at[1, -16:, :].set(True)
    mask = mask.at[2, 2:, :].set(True)     # only 2 valid tiles (< n_extreme)
    mask = mask.at[3, :, :].set(True)      # fully padded bag

    logits = weldon_forward(x, w, b, mask, n_extreme=N_EXTREME)
    logits = jax.block_until_ready(logits)

    ref = weldon_reference(x, w, b, mask, N_EXTREME)
    assert logits.shape == (B, OUT_FEATURES), logits.shape
    assert jnp.allclose(logits, ref, atol=1e-4, rtol=1e-4), (logits, ref)

    print("KERNEL_OK")
</pallas_src>

<mosaic_0001>
module attributes {stable_mosaic.version = 11 : i64} {
  func.func @_weldon_kernel(%arg0: i32, %arg1: memref<8x64x128xbf16, #tpu.memory_space<vmem>>, %arg2: memref<8x4x128xbf16, #tpu.memory_space<vmem>>, %arg3: memref<1x4x1xf32, #tpu.memory_space<vmem>>, %arg4: memref<8x1x64xf32, #tpu.memory_space<vmem>>, %arg5: memref<8x4x1xf32, #tpu.memory_space<vmem>>) attributes {dimension_semantics = [#tpu.dimension_semantics<parallel>], iteration_bounds = array<i64: 2>, scalar_prefetch = 0 : i64, scratch_operands = 0 : i64, tpu.core_type = #tpu.core_type<tc>, window_params = [{transform_indices = @transform_0, window_bounds = array<i64: 8, 64, 128>}, {pipeline_mode = #tpu.pipeline_mode<synchronous>, transform_indices = @transform_1, window_bounds = array<i64: 8, 4, 128>}, {pipeline_mode = #tpu.pipeline_mode<synchronous>, transform_indices = @transform_2, window_bounds = array<i64: 1, 4, 1>}, {transform_indices = @transform_3, window_bounds = array<i64: 8, 1, 64>}, {transform_indices = @transform_4, window_bounds = array<i64: 8, 4, 1>}]} {
    %c0 = arith.constant 0 : index
    %c0_0 = arith.constant 0 : index
    %c0_1 = arith.constant 0 : index
    %0 = vector.load %arg2[%c0, %c0_0, %c0_1] : memref<8x4x128xbf16, #tpu.memory_space<vmem>>, vector<8x4x128xbf16>
    %c0_2 = arith.constant 0 : index
    %c0_3 = arith.constant 0 : index
    %c0_4 = arith.constant 0 : index
    %1 = vector.load %arg1[%c0_2, %c0_3, %c0_4] : memref<8x64x128xbf16, #tpu.memory_space<vmem>>, vector<8x64x128xbf16>
    "tpu.trace_start"() <{level = 10 : i32, message = "bof,bnf->bon"}> : () -> ()
    %cst = arith.constant dense<0.000000e+00> : vector<8x4x64xf32>
    %2 = tpu.matmul %0, %1, %cst {dimension_numbers = #tpu.dot_dimension_numbers<[2], [2], [1], [1], [0, 0, 0, 1, 1, 1], [0], [0]>} : vector<8x4x128xbf16>, vector<8x64x128xbf16>, vector<8x4x64xf32> -> vector<8x4x64xf32>
    "tpu.trace_stop"() : () -> ()
    %c0_5 = arith.constant 0 : index
    %c0_6 = arith.constant 0 : index
    %c0_7 = arith.constant 0 : index
    %3 = vector.load %arg3[%c0_5, %c0_6, %c0_7] : memref<1x4x1xf32, #tpu.memory_space<vmem>>, vector<1x4x1xf32>
    %4 = vector.broadcast %3 : vector<1x4x1xf32> to vector<8x4x64xf32>
    %5 = arith.addf %2, %4 : vector<8x4x64xf32>
    %c0_8 = arith.constant 0 : index
    %c0_9 = arith.constant 0 : index
    %c0_10 = arith.constant 0 : index
    %6 = vector.load %arg4[%c0_8, %c0_9, %c0_10] : memref<8x1x64xf32, #tpu.memory_space<vmem>>, vector<8x1x64xf32>
    %cst_11 = arith.constant 5.000000e-01 : f32
    %7 = vector.broadcast %cst_11 : f32 to vector<8x1x64xf32>
    %8 = arith.cmpf ogt, %6, %7 : vector<8x1x64xf32>
    %9 = tpu.iota {dimensions = array<i32: 2>} : vector<8x4x64xi32>
    %cst_12 = arith.constant 0xFF800000 : f32
    %10 = vector.shape_cast %8 : vector<8x1x64xi1> to vector<8x1x64xi1>
    %11 = vector.broadcast %10 : vector<8x1x64xi1> to vector<8x4x64xi1>
    %12 = vector.broadcast %cst_12 : f32 to vector<8x4x64xf32>
    %13 = arith.select %11, %12, %5 : vector<8x4x64xi1>, vector<8x4x64xf32>
    %cst_13 = arith.constant 0x7F800000 : f32
    %14 = vector.shape_cast %8 : vector<8x1x64xi1> to vector<8x1x64xi1>
    %15 = vector.broadcast %14 : vector<8x1x64xi1> to vector<8x4x64xi1>
    %16 = vector.broadcast %cst_13 : f32 to vector<8x4x64xf32>
    %17 = arith.select %15, %16, %5 : vector<8x4x64xi1>, vector<8x4x64xf32>
    %cst_14 = arith.constant 0.000000e+00 : f32
    %18 = vector.broadcast %cst_14 : f32 to vector<8x4x1xf32>
    %cst_15 = arith.constant 0xFF800000 : f32
    %cst_16 = arith.constant 0x7F800000 : f32
    %c0_i32 = arith.constant 0 : i32
    %cst_17 = arith.constant dense<0xFF800000> : vector<8x4xf32>
    %19 = vector.multi_reduction <maximumf>, %13, %cst_17 [2] : vector<8x4x64xf32> to vector<8x4xf32>
    %20 = vector.shape_cast %19 : vector<8x4xf32> to vector<8x4x1xf32>
    %cst_18 = arith.constant dense<0x7F800000> : vector<8x4xf32>
    %21 = vector.multi_reduction <minimumf>, %17, %cst_18 [2] : vector<8x4x64xf32> to vector<8x4xf32>
    %22 = vector.shape_cast %21 : vector<8x4xf32> to vector<8x4x1xf32>
    %23 = tpu.weird %20 : vector<8x4x1xf32> -> vector<8x4x1xi1>
    %cst_19 = arith.constant dense<true> : vector<8x4x1xi1>
    %24 = arith.xori %23, %cst_19 : vector<8x4x1xi1>
    %cst_20 = arith.constant 0.000000e+00 : f32
    %25 = vector.broadcast %cst_20 : f32 to vector<8x4x1xf32>
    %26 = arith.select %24, %20, %25 : vector<8x4x1xi1>, vector<8x4x1xf32>
    %27 = arith.addf %18, %26 : vector<8x4x1xf32>
    %28 = tpu.weird %22 : vector<8x4x1xf32> -> vector<8x4x1xi1>
    %cst_21 = arith.constant dense<true> : vector<8x4x1xi1>
    %29 = arith.xori %28, %cst_21 : vector<8x4x1xi1>
    %cst_22 = arith.constant 0.000000e+00 : f32
    %30 = vector.broadcast %cst_22 : f32 to vector<8x4x1xf32>
    %31 = arith.select %29, %22, %30 : vector<8x4x1xi1>, vector<8x4x1xf32>
    %32 = arith.addf %18, %31 : vector<8x4x1xf32>
    %33 = vector.broadcast %20 : vector<8x4x1xf32> to vector<8x4x64xf32>
    %34 = arith.cmpf oeq, %13, %33 : vector<8x4x64xf32>
    %c64_i32 = arith.constant 64 : i32
    %35 = vector.broadcast %c64_i32 : i32 to vector<8x4x64xi32>
    %36 = arith.select %34, %9, %35 : vector<8x4x64xi1>, vector<8x4x64xi32>
    %cst_23 = arith.constant dense<2147483647> : vector<8x4xi32>
    %37 = vector.multi_reduction <minsi>, %36, %cst_23 [2] : vector<8x4x64xi32> to vector<8x4xi32>
    %38 = vector.shape_cast %37 : vector<8x4xi32> to vector<8x4x1xi32>
    %39 = vector.broadcast %22 : vector<8x4x1xf32> to vector<8x4x64xf32>
    %40 = arith.cmpf oeq, %17, %39 : vector<8x4x64xf32>
    %c64_i32_24 = arith.constant 64 : i32
    %41 = vector.broadcast %c64_i32_24 : i32 to vector<8x4x64xi32>
    %42 = arith.select %40, %9, %41 : vector<8x4x64xi1>, vector<8x4x64xi32>
    %cst_25 = arith.constant dense<2147483647> : vector<8x4xi32>
    %43 = vector.multi_reduction <minsi>, %42, %cst_25 [2] : vector<8x4x64xi32> to vector<8x4xi32>
    %44 = vector.shape_cast %43 : vector<8x4xi32> to vector<8x4x1xi32>
    %45 = vector.broadcast %38 : vector<8x4x1xi32> to vector<8x4x64xi32>
    %46 = arith.cmpi eq, %9, %45 : vector<8x4x64xi32>
    %47 = vector.broadcast %cst_15 : f32 to vector<8x4x64xf32>
    %48 = arith.select %46, %47, %13 : vector<8x4x64xi1>, vector<8x4x64xf32>
    %49 = vector.broadcast %44 : vector<8x4x1xi32> to vector<8x4x64xi32>
    %50 = arith.cmpi eq, %9, %49 : vector<8x4x64xi32>
    %51 = vector.broadcast %cst_16 : f32 to vector<8x4x64xf32>
    %52 = arith.select %50, %51, %17 : vector<8x4x64xi1>, vector<8x4x64xf32>
    %c1_i32 = arith.constant 1 : i32
    %cst_26 = arith.constant dense<0xFF800000> : vector<8x4xf32>
    %53 = vector.multi_reduction <maximumf>, %48, %cst_26 [2] : vector<8x4x64xf32> to vector<8x4xf32>
    %54 = vector.shape_cast %53 : vector<8x4xf32> to vector<8x4x1xf32>
    %cst_27 = arith.constant dense<0x7F800000> : vector<8x4xf32>
    %55 = vector.multi_reduction <minimumf>, %52, %cst_27 [2] : vector<8x4x64xf32> to vector<8x4xf32>
    %56 = vector.shape_cast %55 : vector<8x4xf32> to vector<8x4x1xf32>
    %57 = tpu.weird %54 : vector<8x4x1xf32> -> vector<8x4x1xi1>
    %cst_28 = arith.constant dense<true> : vector<8x4x1xi1>
    %58 = arith.xori %57, %cst_28 : vector<8x4x1xi1>
    %cst_29 = arith.constant 0.000000e+00 : f32
    %59 = vector.broadcast %cst_29 : f32 to vector<8x4x1xf32>
    %60 = arith.select %58, %54, %59 : vector<8x4x1xi1>, vector<8x4x1xf32>
    %61 = arith.addf %27, %60 : vector<8x4x1xf32>
    %62 = tpu.weird %56 : vector<8x4x1xf32> -> vector<8x4x1xi1>
    %cst_30 = arith.constant dense<true> : vector<8x4x1xi1>
    %63 = arith.xori %62, %cst_30 : vector<8x4x1xi1>
    %cst_31 = arith.constant 0.000000e+00 : f32
    %64 = vector.broadcast %cst_31 : f32 to vector<8x4x1xf32>
    %65 = arith.select %63, %56, %64 : vector<8x4x1xi1>, vector<8x4x1xf32>
    %66 = arith.addf %32, %65 : vector<8x4x1xf32>
    %67 = vector.broadcast %54 : vector<8x4x1xf32> to vector<8x4x64xf32>
    %68 = arith.cmpf oeq, %48, %67 : vector<8x4x64xf32>
    %c64_i32_32 = arith.constant 64 : i32
    %69 = vector.broadcast %c64_i32_32 : i32 to vector<8x4x64xi32>
    %70 = arith.select %68, %9, %69 : vector<8x4x64xi1>, vector<8x4x64xi32>
    %cst_33 = arith.constant dense<2147483647> : vector<8x4xi32>
    %71 = vector.multi_reduction <minsi>, %70, %cst_33 [2] : vector<8x4x64xi32> to vector<8x4xi32>
    %72 = vector.shape_cast %71 : vector<8x4xi32> to vector<8x4x1xi32>
    %73 = vector.broadcast %56 : vector<8x4x1xf32> to vector<8x4x64xf32>
    %74 = arith.cmpf oeq, %52, %73 : vector<8x4x64xf32>
    %c64_i32_34 = arith.constant 64 : i32
    %75 = vector.broadcast %c64_i32_34 : i32 to vector<8x4x64xi32>
    %76 = arith.select %74, %9, %75 : vector<8x4x64xi1>, vector<8x4x64xi32>
    %cst_35 = arith.constant dense<2147483647> : vector<8x4xi32>
    %77 = vector.multi_reduction <minsi>, %76, %cst_35 [2] : vector<8x4x64xi32> to vector<8x4xi32>
    %78 = vector.shape_cast %77 : vector<8x4xi32> to vector<8x4x1xi32>
    %79 = vector.broadcast %72 : vector<8x4x1xi32> to vector<8x4x64xi32>
    %80 = arith.cmpi eq, %9, %79 : vector<8x4x64xi32>
    %81 = vector.broadcast %cst_15 : f32 to vector<8x4x64xf32>
    %82 = arith.select %80, %81, %48 : vector<8x4x64xi1>, vector<8x4x64xf32>
    %83 = vector.broadcast %78 : vector<8x4x1xi32> to vector<8x4x64xi32>
    %84 = arith.cmpi eq, %9, %83 : vector<8x4x64xi32>
    %85 = vector.broadcast %cst_16 : f32 to vector<8x4x64xf32>
    %86 = arith.select %84, %85, %52 : vector<8x4x64xi1>, vector<8x4x64xf32>
    %c2_i32 = arith.constant 2 : i32
    %cst_36 = arith.constant dense<0xFF800000> : vector<8x4xf32>
    %87 = vector.multi_reduction <maximumf>, %82, %cst_36 [2] : vector<8x4x64xf32> to vector<8x4xf32>
    %88 = vector.shape_cast %87 : vector<8x4xf32> to vector<8x4x1xf32>
    %cst_37 = arith.constant dense<0x7F800000> : vector<8x4xf32>
    %89 = vector.multi_reduction <minimumf>, %86, %cst_37 [2] : vector<8x4x64xf32> to vector<8x4xf32>
    %90 = vector.shape_cast %89 : vector<8x4xf32> to vector<8x4x1xf32>
    %91 = tpu.weird %88 : vector<8x4x1xf32> -> vector<8x4x1xi1>
    %cst_38 = arith.constant dense<true> : vector<8x4x1xi1>
    %92 = arith.xori %91, %cst_38 : vector<8x4x1xi1>
    %cst_39 = arith.constant 0.000000e+00 : f32
    %93 = vector.broadcast %cst_39 : f32 to vector<8x4x1xf32>
    %94 = arith.select %92, %88, %93 : vector<8x4x1xi1>, vector<8x4x1xf32>
    %95 = arith.addf %61, %94 : vector<8x4x1xf32>
    %96 = tpu.weird %90 : vector<8x4x1xf32> -> vector<8x4x1xi1>
    %cst_40 = arith.constant dense<true> : vector<8x4x1xi1>
    %97 = arith.xori %96, %cst_40 : vector<8x4x1xi1>
    %cst_41 = arith.constant 0.000000e+00 : f32
    %98 = vector.broadcast %cst_41 : f32 to vector<8x4x1xf32>
    %99 = arith.select %97, %90, %98 : vector<8x4x1xi1>, vector<8x4x1xf32>
    %100 = arith.addf %66, %99 : vector<8x4x1xf32>
    %101 = vector.broadcast %88 : vector<8x4x1xf32> to vector<8x4x64xf32>
    %102 = arith.cmpf oeq, %82, %101 : vector<8x4x64xf32>
    %c64_i32_42 = arith.constant 64 : i32
    %103 = vector.broadcast %c64_i32_42 : i32 to vector<8x4x64xi32>
    %104 = arith.select %102, %9, %103 : vector<8x4x64xi1>, vector<8x4x64xi32>
    %cst_43 = arith.constant dense<2147483647> : vector<8x4xi32>
    %105 = vector.multi_reduction <minsi>, %104, %cst_43 [2] : vector<8x4x64xi32> to vector<8x4xi32>
    %106 = vector.shape_cast %105 : vector<8x4xi32> to vector<8x4x1xi32>
    %107 = vector.broadcast %90 : vector<8x4x1xf32> to vector<8x4x64xf32>
    %108 = arith.cmpf oeq, %86, %107 : vector<8x4x64xf32>
    %c64_i32_44 = arith.constant 64 : i32
    %109 = vector.broadcast %c64_i32_44 : i32 to vector<8x4x64xi32>
    %110 = arith.select %108, %9, %109 : vector<8x4x64xi1>, vector<8x4x64xi32>
    %cst_45 = arith.constant dense<2147483647> : vector<8x4xi32>
    %111 = vector.multi_reduction <minsi>, %110, %cst_45 [2] : vector<8x4x64xi32> to vector<8x4xi32>
    %112 = vector.shape_cast %111 : vector<8x4xi32> to vector<8x4x1xi32>
    %113 = vector.broadcast %106 : vector<8x4x1xi32> to vector<8x4x64xi32>
    %114 = arith.cmpi eq, %9, %113 : vector<8x4x64xi32>
    %115 = vector.broadcast %cst_15 : f32 to vector<8x4x64xf32>
    %116 = arith.select %114, %115, %82 : vector<8x4x64xi1>, vector<8x4x64xf32>
    %117 = vector.broadcast %112 : vector<8x4x1xi32> to vector<8x4x64xi32>
    %118 = arith.cmpi eq, %9, %117 : vector<8x4x64xi32>
    %119 = vector.broadcast %cst_16 : f32 to vector<8x4x64xf32>
    %120 = arith.select %118, %119, %86 : vector<8x4x64xi1>, vector<8x4x64xf32>
    %c3_i32 = arith.constant 3 : i32
    %cst_46 = arith.constant dense<0xFF800000> : vector<8x4xf32>
    %121 = vector.multi_reduction <maximumf>, %116, %cst_46 [2] : vector<8x4x64xf32> to vector<8x4xf32>
    %122 = vector.shape_cast %121 : vector<8x4xf32> to vector<8x4x1xf32>
    %cst_47 = arith.constant dense<0x7F800000> : vector<8x4xf32>
    %123 = vector.multi_reduction <minimumf>, %120, %cst_47 [2] : vector<8x4x64xf32> to vector<8x4xf32>
    %124 = vector.shape_cast %123 : vector<8x4xf32> to vector<8x4x1xf32>
    %125 = tpu.weird %122 : vector<8x4x1xf32> -> vector<8x4x1xi1>
    %cst_48 = arith.constant dense<true> : vector<8x4x1xi1>
    %126 = arith.xori %125, %cst_48 : vector<8x4x1xi1>
    %cst_49 = arith.constant 0.000000e+00 : f32
    %127 = vector.broadcast %cst_49 : f32 to vector<8x4x1xf32>
    %128 = arith.select %126, %122, %127 : vector<8x4x1xi1>, vector<8x4x1xf32>
    %129 = arith.addf %95, %128 : vector<8x4x1xf32>
    %130 = tpu.weird %124 : vector<8x4x1xf32> -> vector<8x4x1xi1>
    %cst_50 = arith.constant dense<true> : vector<8x4x1xi1>
    %131 = arith.xori %130, %cst_50 : vector<8x4x1xi1>
    %cst_51 = arith.constant 0.000000e+00 : f32
    %132 = vector.broadcast %cst_51 : f32 to vector<8x4x1xf32>
    %133 = arith.select %131, %124, %132 : vector<8x4x1xi1>, vector<8x4x1xf32>
    %134 = arith.addf %100, %133 : vector<8x4x1xf32>
    %135 = vector.broadcast %122 : vector<8x4x1xf32> to vector<8x4x64xf32>
    %136 = arith.cmpf oeq, %116, %135 : vector<8x4x64xf32>
    %c64_i32_52 = arith.constant 64 : i32
    %137 = vector.broadcast %c64_i32_52 : i32 to vector<8x4x64xi32>
    %138 = arith.select %136, %9, %137 : vector<8x4x64xi1>, vector<8x4x64xi32>
    %cst_53 = arith.constant dense<2147483647> : vector<8x4xi32>
    %139 = vector.multi_reduction <minsi>, %138, %cst_53 [2] : vector<8x4x64xi32> to vector<8x4xi32>
    %140 = vector.shape_cast %139 : vector<8x4xi32> to vector<8x4x1xi32>
    %141 = vector.broadcast %124 : vector<8x4x1xf32> to vector<8x4x64xf32>
    %142 = arith.cmpf oeq, %120, %141 : vector<8x4x64xf32>
    %c64_i32_54 = arith.constant 64 : i32
    %143 = vector.broadcast %c64_i32_54 : i32 to vector<8x4x64xi32>
    %144 = arith.select %142, %9, %143 : vector<8x4x64xi1>, vector<8x4x64xi32>
    %cst_55 = arith.constant dense<2147483647> : vector<8x4xi32>
    %145 = vector.multi_reduction <minsi>, %144, %cst_55 [2] : vector<8x4x64xi32> to vector<8x4xi32>
    %146 = vector.shape_cast %145 : vector<8x4xi32> to vector<8x4x1xi32>
    %147 = vector.broadcast %140 : vector<8x4x1xi32> to vector<8x4x64xi32>
    %148 = arith.cmpi eq, %9, %147 : vector<8x4x64xi32>
    %149 = vector.broadcast %cst_15 : f32 to vector<8x4x64xf32>
    %150 = arith.select %148, %149, %116 : vector<8x4x64xi1>, vector<8x4x64xf32>
    %151 = vector.broadcast %146 : vector<8x4x1xi32> to vector<8x4x64xi32>
    %152 = arith.cmpi eq, %9, %151 : vector<8x4x64xi32>
    %153 = vector.broadcast %cst_16 : f32 to vector<8x4x64xf32>
    %154 = arith.select %152, %153, %120 : vector<8x4x64xi1>, vector<8x4x64xf32>
    %155 = arith.addf %129, %134 : vector<8x4x1xf32>
    %cst_56 = arith.constant 1.250000e-01 : f32
    %156 = vector.broadcast %cst_56 : f32 to vector<8x4x1xf32>
    %157 = arith.mulf %155, %156 : vector<8x4x1xf32>
    %c0_57 = arith.constant 0 : index
    %c0_58 = arith.constant 0 : index
    %c0_59 = arith.constant 0 : index
    %158 = vector.load %arg5[%c0_57, %c0_58, %c0_59] : memref<8x4x1xf32, #tpu.memory_space<vmem>>, vector<8x4x1xf32>
    tpu.vector_store %arg5[%c0_57, %c0_58, %c0_59], %157 {strides = array<i32>} : memref<8x4x1xf32, #tpu.memory_space<vmem>>, vector<8x4x1xf32>,
    return
  }
  func.func @transform_0(%arg0: i32) -> (i32, i32, i32) {
    %c0_i32 = arith.constant 0 : i32
    %c0_i32_0 = arith.constant 0 : i32
    %c0_i32_1 = arith.constant 0 : i32
    return %arg0, %c0_i32, %c0_i32_0 : i32, i32, i32
  }
  func.func @transform_1(%arg0: i32) -> (i32, i32, i32) {
    %c0_i32 = arith.constant 0 : i32
    %c0_i32_0 = arith.constant 0 : i32
    %c0_i32_1 = arith.constant 0 : i32
    %c0_i32_2 = arith.constant 0 : i32
    return %c0_i32, %c0_i32_0, %c0_i32_1 : i32, i32, i32
  }
  func.func @transform_2(%arg0: i32) -> (i32, i32, i32) {
    %c0_i32 = arith.constant 0 : i32
    %c0_i32_0 = arith.constant 0 : i32
    %c0_i32_1 = arith.constant 0 : i32
    %c0_i32_2 = arith.constant 0 : i32
    return %c0_i32, %c0_i32_0, %c0_i32_1 : i32, i32, i32
  }
  func.func @transform_3(%arg0: i32) -> (i32, i32, i32) {
    %c0_i32 = arith.constant 0 : i32
    %c0_i32_0 = arith.constant 0 : i32
    %c0_i32_1 = arith.constant 0 : i32
    return %arg0, %c0_i32, %c0_i32_0 : i32, i32, i32
  }
  func.func @transform_4(%arg0: i32) -> (i32, i32, i32) {
    %c0_i32 = arith.constant 0 : i32
    %c0_i32_0 = arith.constant 0 : i32
    %c0_i32_1 = arith.constant 0 : i32
    return %arg0, %c0_i32, %c0_i32_0 : i32, i32, i32
  }
}

</mosaic_0001>

<bundles_post_ra>
// kernel: tpu_custom_call.1
= control target key start
LH: loop header
LB: loop body
LE: loop exit
PB: predicated region body
PF: predicated region fallthrough
CT: control target
= control target key end

     0   :  { %9 = vsyncpa [#allocation3], 0  ;;  %s4850_s0 = inlined_call_operand.hbm [shape: bf16[16,64,128], index: 0, kind: input, shape index: {}]   ;;  %s4851_s1 = inlined_call_operand.hbm [shape: bf16[8,4,128], index: 1, kind: input, shape index: {}]   ;;  %s4852_s2 = inlined_call_operand.vmem [shape: f32[1,4,1], index: 2, kind: input, shape index: {}]   ;;  %s4853_s3 = inlined_call_operand.hbm [shape: f32[16,1,64], index: 3, kind: input, shape index: {}]   ;;  %s4854_s4 = inlined_call_operand.vmem [shape: f32[16,4,1], index: 4, kind: output, shape index: {}]  }
   0x1   :  { %11 = vsyncpa [#allocation3 + $0x1], 0 }
   0x2   :  { %12 = vsyncpa [#allocation5], 0  ;;  %s2883_s15 = smov 0   ;;  %s2885_s16 = smov 0  }
   0x3   :  { %s2887_s17 = smov 0   ;;  %s2889_s18 = smov 0  }
   0x4 LB: > { %s2904_s19 = sadd.s32 1, %s2843_s18   ;;  %s25_s20 = sadd.s32 1, %s2839_s17  ;;  %s2843_s18 = sphi %s2889_s18, %s5140_s18   ;;  %s2839_s17 = sphi %s2887_s17, %s5139_s17   ;;  %s2835_s16 = sphi %s2885_s16, %s5138_s16   ;;  %s2831_s15 = sphi %s2883_s15, %s5137_s15  }
   0x5   : > { %s22_s21 = ssub.s32 %s2843_s18, %s2904_s19  ;;  %p32_p0 = scmp.ne.s32.totalorder %s2839_s17, %s2835_s16 }
   0x6   : > { %p23_p1 = scmp.eq.s32.totalorder %s22_s21, 0  ;;  %p33_p2 = scmp.eq.s32.totalorder %s2843_s18, 0 }
   0x7   : > { %p2641_p3 = scmp.lt.s32.totalorder %s2843_s18, 2  ;;  %s172_s23 = sand.u32 1, %s2843_s18  }
   0x8   : > { %s2914_s22 = scalar_select %p23_p1, %s2839_s17, %s25_s20  }
   0x9   : > { %p34_p4 = por %p33_p2, %p32_p0  ;;  %s174_s24 = sand.u32 1, %s2839_s17  }
   0xa   : > { %s2435_s25 = sshll.u32 %s174_s24, 8  ;;  %s2483_s26 = sshll.u32 %s2843_s18, 12 }
   0xb   : > { %s2924_s29 = scalar_lea.hbm %s4850_s0, %s2483_s26  ;;  %s176_s30 = scalar_lea.vmem [#allocation2], %s2435_s25 }
   0xc   : > { %s184_s5 = sshll.u32 %s176_s30, 4  ;;  %p2926_p5 = pnand %p2641_p3, %p34_p4  ;;  %s2930_s5 = int_to_ptr.vmem [resolvable:$true] %s184_s5 }
   0xd   : > { %s2932_s7 = scalar_lea.sflag [#allocation3], %s172_s23  ;;  %s2719_s8 = scalar_lea.hbm %s2924_s29, 4096 }
   0xe   : > { %p2720_p6 = scmp.ne.s32.totalorder %s2924_s29, %s2719_s8  ;;  %p2721_p7 = pneg %p2926_p5 }
   0xf   : > { %s2724_s11 = scalar_lea.hbm %s4850_s0, 8192  ;;  %p2725_p10 = scmp.lt.s32.totalorder %s2924_s29, %s4850_s0 }
  0x10   : > { %p2722_p8 = pnand %p2721_p7, %p2720_p6  ;;  %p2726_p11 = scmp.lt.s32.totalorder %s2724_s11, %s2719_s8 }
  0x12   : > { %p2723_p9 = pneg %p2722_p8  ;;  %p2727_p12 = por %p2726_p11, %p2725_p10 }
  0x14   : > { %p2728_p13 = pnand %p2727_p12, %p2723_p9 }
  0x16   : > { %2731 = shalt.err (!%p2728_p13)
}
  0x17   : > { %s2732_s14 = scalar_lea.vmem %s2930_s5, 4096  ;;  %s2845_s20 = smov [#allocation2]  }
  0x18   : > { %p2733_p0 = scmp.ne.s32.totalorder %s2930_s5, %s2732_s14  ;;  %s2737_s21 = sshll.u32 %s2845_s20, 4  ;;  %s2738_s21 = int_to_ptr.vmem [resolvable:$false] %s2737_s21 }
  0x19   : > { %s2739_s23 = scalar_lea.vmem %s2738_s21, 8192  ;;  %p2740_p3 = scmp.lt.s32.totalorder %s2930_s5, %s2738_s21 }
  0x1a   : > { %p2735_p1 = pnand %p2733_p0, %p2721_p7  ;;  %p2741_p4 = scmp.lt.s32.totalorder %s2739_s23, %s2732_s14 }
  0x1c   : > { %p2736_p2 = pneg %p2735_p1  ;;  %p2742_p6 = por %p2741_p4, %p2740_p3 }
  0x1e   : > { %p2743_p8 = pnand %p2742_p6, %p2736_p2 }
  0x20   : > { %2746 = shalt.err (!%p2743_p8)
}
  0x21   : > { %s2846_s25 = smov 64   ;;  %s2847_s26 = smov 4  }
  0x22   : > { %2636 = dma.hbm_to_vmem [thread:$0]  (!%p2926_p5), %s2924_s29, 4096, %s2930_s5, %s2932_s7, %s2846_s25, %s2846_s25, %s2847_s26  }
  0x23   : > { %s2439_s27 = sshll.u32 %s174_s24, 3  ;;  %s2962_s8 = sadd.s32 4294967295, %s2843_s18  }
  0x24   : > { %s198_s28 = scalar_lea.vmem [#allocation6], %s2439_s27  ;;  %p38_p9 = scmp.ne.s32.totalorder %s2835_s16, %s2831_s15 }
  0x25   : > { %s205_s30 = sshll.u32 %s198_s28, 4  ;;  %p4855_p10 = scmp.eq.s32.totalorder %s2962_s8, 0  ;;  %s2993_s30 = int_to_ptr.vmem [resolvable:$true] %s205_s30 }
  0x26   : > { %p2432_p11 = scmp.ge.s32.totalorder %s2843_s18, 1  ;;  %p143_p12 = scmp.lt.s32.totalorder %s2843_s18, 3 }
  0x27   : > { %p2971_p13 = por %p4855_p10, %p38_p9  ;;  %s2848_s24 = smov [#allocation4]  }
  0x28   : > { %p2975_p0 = pnand %p2432_p11, %p143_p12  ;;  %s155_s5 = sshll.u32 %s2848_s24, 4  ;;  %s156_s5 = int_to_ptr.vmem [resolvable:$true] %s155_s5 }
  0x29   : > { %s4939_s9 = scalar_select %p2971_p13, 1, 0 }
  0x2a   : > { %p2629_p1 = pneg %p2975_p0  ;;  %s2484_s10 = sshll.u32 %s2843_s18, 7 }
  0x2b   : > { %s2991_s13 = scalar_lea.hbm %s4853_s3, %s2484_s10  ;;  %s2758_s14 = scalar_lea.vmem %s156_s5, 256 }
  0x2c   : > { %p2984_p2 = pnand %p2629_p1, %p4855_p10  ;;  %p2759_p4 = scmp.ne.s32.totalorder %s156_s5, %s2758_s14 }
  0x2d   : > { %p2766_p9 = scmp.lt.s32.totalorder %s156_s5, %s156_s5  ;;  %p2767_p11 = scmp.lt.s32.totalorder %s2758_s14, %s2758_s14 }
  0x2e   : > { %p2749_p3 = pneg %p2984_p2 }
  0x2f   : > { %p2768_p12 = por %p2767_p11, %p2766_p9 }
  0x30   : > { %p2761_p6 = pnand %p2759_p4, %p2749_p3 }
  0x32   : > { %p2762_p8 = pneg %p2761_p6 }
  0x34   : > { %p2769_p1 = pnand %p2768_p12, %p2762_p8 }
  0x36   : > { %2772 = shalt.err (!%p2769_p1)
}
  0x37   : > { %s2849_s18 = smov 32   ;;  %s2850_s20 = smov 2  }
  0x38   : > { %2632 = dma.hbm_to_vmem [thread:$0]  (!%p2984_p2), %s4851_s1, 256, %s156_s5, [#allocation5], %s2849_s18, %s2849_s18, %s2850_s20  }
  0x39   : > { %s2773_s25 = scalar_lea.hbm %s2991_s13, 128  ;;  %s2778_s28 = scalar_lea.hbm %s4853_s3, 256 }
  0x3a   : > { %p2774_p3 = scmp.ne.s32.totalorder %s2991_s13, %s2773_s25  ;;  %p2779_p8 = scmp.lt.s32.totalorder %s2991_s13, %s4853_s3 }
  0x3b   : > { %p2780_p9 = scmp.lt.s32.totalorder %s2778_s28, %s2773_s25 }
  0x3c   : > { %p2776_p4 = pnand %p2774_p3, %p2721_p7 }
  0x3d   : > { %p2781_p11 = por %p2780_p9, %p2779_p8 }
  0x3e   : > { %p2777_p6 = pneg %p2776_p4 }
  0x40   : > { %p2782_p12 = pnand %p2781_p11, %p2777_p6 }
  0x42   : > { %2785 = shalt.err (!%p2782_p12)
}
  0x43   : > { %s2786_s5 = scalar_lea.vmem %s2993_s30, 128  ;;  %s2851_s15 = smov [#allocation6]  }
  0x44   : > { %p2787_p2 = scmp.ne.s32.totalorder %s2993_s30, %s2786_s5  ;;  %s2791_s11 = sshll.u32 %s2851_s15, 4  ;;  %s2792_s11 = int_to_ptr.vmem [resolvable:$false] %s2791_s11 }
  0x45   : > { %s2793_s12 = scalar_lea.vmem %s2792_s11, 256  ;;  %p2794_p4 = scmp.lt.s32.totalorder %s2993_s30, %s2792_s11 }
  0x46   : > { %p2789_p1 = pnand %p2787_p2, %p2721_p7  ;;  %p2795_p10 = scmp.lt.s32.totalorder %s2793_s12, %s2786_s5 }
  0x48   : > { %p2790_p3 = pneg %p2789_p1  ;;  %p2796_p13 = por %p2795_p10, %p2794_p4 }
  0x4a   : > { %p2797_p8 = pnand %p2796_p13, %p2790_p3 }
  0x4c   : > { %2800 = shalt.err (!%p2797_p8)
}
  0x4d   : > { %s2852_s14 = smov 16   ;;  %s2853_s18 = smov 1  }
  0x4e   : > { %2639 = dma.hbm_to_vmem [thread:$0]  (!%p2926_p5), %s2991_s13, 128, %s2993_s30, %s2932_s7, %s2852_s14, %s2852_s14, %s2853_s18  }
  0x4f   : > { %217 = sbr.rel (%p2975_p0) target bundleno = 1868 (0x74c), region = 36 }
  0x54   : > { %s219_s20 = sand.u32 1, %s2962_s8   ;;  %s221_s21 = sand.u32 1, %s2835_s16  }
  0x55   : > { %s2443_s23 = sshll.u32 %s221_s21, 8  ;;  %s220_s25 = scalar_lea.sflag [#allocation3], %s219_s20 }
  0x56   : > { %s3029_s26 = scalar_lea.vmem [#allocation2], %s2443_s23  ;;  %p4942_p7 = scmp.ne.s32.totalorder %s4939_s9, 0 }
  0x58   : > { %2818 = dma.done.wait (%p4942_p7), %s220_s25, 4096  }
  0x59   : > { %2820 = vsyncadd (%p4942_p7), %s220_s25, 4294963200  ;;  %p4943_p10 = scmp.eq.s32.totalorder %s2962_s8, 0 }
  0x5b   : > { %2822 = dma.done.wait (%p4943_p10), [#allocation5], 256   ;;  %p4944_p5 = pmov %p4943_p10 }
  0x5c   : > { %s2445_s6 = sshll.u32 %s221_s21, 3 }
  0x5d   : > { %2824 = vsyncadd (%p4944_p5), [#allocation5], 4294967040  ;;  %s3039_s7 = scalar_lea.vmem [#allocation6], %s2445_s6 }
  0x5e   : > { %2826 = dma.done.wait (%p4942_p7), %s220_s25, 128  }
  0x5f   : > { %2828 = vsyncadd (%p4942_p7), %s220_s25, 4294967168  ;;  %v2854_v0 = vmov 0.0   ;;  %vm2855_vm0 = vmmov 0   ;;  %v2856_v1 = vmov 0   ;;  %v2687_v2 = vld [vmem:[%s3029_s26 + $0x18] sm:$0xff]   ;;  %v2689_v4 = vld [vmem:[%s3029_s26 + $0x10] sm:$0xff]   ;;  %v881_v43 = vlaneseq }
  0x60   : > { %2525 = vmatprep.subr.bf16.mxu0 %v2854_v0  ;;  %2537 = vmatprep.subr.bf16.mxu1 %v2854_v0  ;;  %v2688_v3 = vld [vmem:[%s3029_s26 + $0x38] sm:$0xff]   ;;  %v2690_v5 = vld [vmem:[%s3029_s26 + $0x30] sm:$0xff]   ;;  %v2691_v6 = vld [vmem:[%s3029_s26 + $0x8] sm:$0xff]   ;;  %vm947_vm5 = vcmask 519168   ;;  %s2446_s29 = sshll.u32 %s2962_s8, 3 }
  0x61   : > { %2533 = vmatprep.mubr.msk.bf16.mxu0 %vm2855_vm0, %v2854_v0  ;;  %2545 = vmatprep.mubr.msk.bf16.mxu1 %vm2855_vm0, %v2854_v0  ;;  %v2692_v7 = vld [vmem:[%s3029_s26 + $0x28] sm:$0xff]   ;;  %v2693_v8 = vld [vmem:[%s3029_s26] sm:$0xff]   ;;  %v2695_v13 = vld [vmem:[%s3029_s26 + $0x58] sm:$0xff]   ;;  %v892_v45 = vshrl.u32 %v881_v43, 7  ;;  %p4452_p13 = scmp.lt.s32.totalorder %s2446_s29, 15 }
  0x62   : > { %2686 = vset.pattern.permute.xlu0 %v2856_v1  ;;  %2526 = vmatpush3.bf16.xpose.msra.mxu0 %v2687_v2  ;;  %v2694_v9 = vld [vmem:[%s3029_s26 + $0x20] sm:$0xff]   ;;  %v2696_v14 = vld [vmem:[%s3029_s26 + $0x78] sm:$0xff]   ;;  %v2697_v15 = vld [vmem:[%s3029_s26 + $0x50] sm:$0xff]  }
  0x63   : > { %2538 = vmatpush3.bf16.xpose.msra.mxu1 %v2688_v3  ;;  %2527 = vmatprep.subr.bf16.mxu0 %v2854_v0  ;;  %v275_v10 = vld [vmem:[#allocation4] sm:$0x3]  ;;  %v276_v12 = vld [vmem:[#allocation4 + $0x2] sm:$0x3]  ;;  %v2698_v16 = vld [vmem:[%s3029_s26 + $0x70] sm:$0xff]   ;;  %v3132_v47 = vsub.s32 0, %v892_v45 }
  0x64   : > { %2539 = vmatprep.subr.bf16.mxu1 %v2854_v0  ;;  %v347_v11 = vld [vmem:[%s4852_s2] sm:$0xf]  ;;  %v2699_v17 = vld [vmem:[%s3029_s26 + $0x48] sm:$0xff]   ;;  %v277_v21 = vld [vmem:[#allocation4 + $0x4] sm:$0x3]  ;;  %s5142_s29 = smov (!%p4452_p13, %s2446_s29), 15 }
  0x65   : > { %350 = vperm.xlu0 %2686, %v347_v11   ;;  %v2700_v18 = vld [vmem:[%s3029_s26 + $0x68] sm:$0xff]   ;;  %v2701_v19 = vld [vmem:[%s3029_s26 + $0x40] sm:$0xff]   ;;  %v2703_v22 = vld [vmem:[%s3029_s26 + $0x98] sm:$0xff]   ;;  %s2447_s13 = sshll.u32 %s5142_s29, 2 }
  0x66   : > { %v2702_v20 = vld [vmem:[%s3029_s26 + $0x60] sm:$0xff]   ;;  %v2704_v24 = vld [vmem:[%s3029_s26 + $0xb8] sm:$0xff]   ;;  %v2705_v25 = vld [vmem:[%s3029_s26 + $0x90] sm:$0xff]   ;;  %s4529_s24 = scalar_lea.vmem %s4854_s4, %s2447_s13 }
  0x67   : > { %v278_v23 = vld [vmem:[#allocation4 + $0x6] sm:$0x3]  ;;  %v2706_v26 = vld [vmem:[%s3029_s26 + $0xb0] sm:$0xff]   ;;  %v2707_v27 = vld [vmem:[%s3029_s26 + $0x88] sm:$0xff]  }
  0x68   : > { %v2708_v28 = vld [vmem:[%s3029_s26 + $0xa8] sm:$0xff]   ;;  %v2709_v29 = vld [vmem:[%s3029_s26 + $0x80] sm:$0xff]   ;;  %v2711_v32 = vld [vmem:[%s3029_s26 + $0xd8] sm:$0xff]  }
  0x69   : > { %v2710_v30 = vld [vmem:[%s3029_s26 + $0xa0] sm:$0xff]   ;;  %v279_v31 = vld [vmem:[#allocation4 + $0x8] sm:$0x3]  ;;  %v280_v33 = vld [vmem:[#allocation4 + $0xa] sm:$0x3] }
  0x6a   : > { %2528 = vmatpush3.bf16.xpose.msra.mxu0 %v2689_v4  ;;  %v2712_v34 = vld [vmem:[%s3029_s26 + $0xf8] sm:$0xff]   ;;  %v2713_v35 = vld [vmem:[%s3029_s26 + $0xd0] sm:$0xff]   ;;  %v2715_v37 = vld [vmem:[%s3029_s26 + $0xc8] sm:$0xff]  }
  0x6b   : > { %2540 = vmatpush3.bf16.xpose.msra.mxu1 %v2690_v5  ;;  %2529 = vmatprep.subr.bf16.mxu0 %v2854_v0  ;;  %v2714_v36 = vld [vmem:[%s3029_s26 + $0xf0] sm:$0xff]   ;;  %v2716_v38 = vld [vmem:[%s3029_s26 + $0xe8] sm:$0xff]   ;;  %v2717_v39 = vld [vmem:[%s3029_s26 + $0xc0] sm:$0xff]  }
  0x6c   : > { %2541 = vmatprep.subr.bf16.mxu1 %v2854_v0  ;;  %v2718_v40 = vld [vmem:[%s3029_s26 + $0xe0] sm:$0xff]   ;;  %v281_v41 = vld [vmem:[#allocation4 + $0xc] sm:$0x3]  ;;  %v282_v42 = vld [vmem:[#allocation4 + $0xe] sm:$0x3] }
  0x6d   : > { %v865_v44 = vld [vmem:[%s3039_s7] sm:$0x1]  ;;  %v866_v46 = vld [vmem:[%s3039_s7 + $0x1] sm:$0x1] }
  0x6e   : > { %vm873_vm1 = vcmp.gt.f32.partialorder %v865_v44, 0.5  ;;  %vm874_vm2 = vcmp.gt.f32.partialorder %v866_v46, 0.5 }
  0x6f   : > { %v883_v48 = vsel %vm873_vm1, 1, %v2856_v1  ;;  %v884_v49 = vsel %vm874_vm2, 1, %v2856_v1 }
  0x70   : > { %v894_v50 = vrot.slane %v883_v48, %v3132_v47  ;;  %v898_v51 = vrot.slane %v884_v49, %v3132_v47 }
  0x72   : > { %2530 = vmatpush3.bf16.xpose.msra.mxu0 %v2691_v6  ;;  %vm923_vm3 = vcmp.eq.s32.totalorder %v894_v50, 1  ;;  %vm3141_vm4 = vcmp.eq.s32.totalorder %v898_v51, 1 }
  0x73   : > { %2542 = vmatpush3.bf16.xpose.msra.mxu1 %v2692_v7  ;;  %2531 = vmatprep.subr.bf16.mxu0 %v2854_v0 }
  0x74   : > { %2543 = vmatprep.subr.bf16.mxu1 %v2854_v0 }
  0x7a   : > { %2532 = vmatpush3.bf16.xpose.msra.mxu0 %v2693_v8 }
  0x7b   : > { %2544 = vmatpush3.bf16.xpose.msra.mxu1 %v2694_v9  ;;  %2549 = vmatprep.subr.bf16.mxu0 %v2854_v0  ;;  %v867_v9 = vld [vmem:[%s3039_s7 + $0x2] sm:$0x1] }
  0x7c   : > { %2561 = vmatprep.subr.bf16.mxu1 %v2854_v0  ;;  %vm875_vm6 = vcmp.gt.f32.partialorder %v867_v9, 0.5 }
  0x7d   : > { %v885_v11 = vsel %vm875_vm6, 1, %v2856_v1 }
  0x81   : > { %2534 = vmatmul.mubr.bf16.vlgmr.msra.gmra.mxu0 %v275_v10  ;;  %v868_v10 = vld [vmem:[%s3039_s7 + $0x3] sm:$0x1] }
  0x82   : > { %2546 = vmatmul.mubr.bf16.vlgmr.msra.gmra.mxu1 %v276_v12  ;;  %2550 = vmatpush3.bf16.xpose.msra.mxu0 %v2695_v13  ;;  %vm876_vm7 = vcmp.gt.f32.partialorder %v868_v10, 0.5  ;;  %v902_v13 = vrot.slane %v885_v11, %v3132_v47 }
  0x83   : > { %2562 = vmatpush3.bf16.xpose.msra.mxu1 %v2696_v14  ;;  %2551 = vmatprep.subr.bf16.mxu0 %v2854_v0  ;;  %v886_v12 = vsel %vm876_vm7, 1, %v2856_v1 }
  0x84   : > { %2563 = vmatprep.subr.bf16.mxu1 %v2854_v0  ;;  %2557 = vmatprep.mubr.msk.bf16.mxu0 %vm2855_vm0, %v2854_v0  ;;  %v906_v14 = vrot.slane %v886_v12, %v3132_v47  ;;  %vm925_vm8 = vcmp.eq.s32.totalorder %v902_v13, 1 }
  0x85   : > { %2569 = vmatprep.mubr.msk.bf16.mxu1 %vm2855_vm0, %v2854_v0 }
  0x86   : > { %vm3173_vm9 = vcmp.eq.s32.totalorder %v906_v14, 1 }
  0x8a   : > { %2552 = vmatpush3.bf16.xpose.msra.mxu0 %v2697_v15 }
  0x8b   : > { %2564 = vmatpush3.bf16.xpose.msra.mxu1 %v2698_v16  ;;  %2553 = vmatprep.subr.bf16.mxu0 %v2854_v0 }
  0x8c   : > { %2565 = vmatprep.subr.bf16.mxu1 %v2854_v0 }
  0x92   : > { %2554 = vmatpush3.bf16.xpose.msra.mxu0 %v2699_v17 }
  0x93   : > { %2566 = vmatpush3.bf16.xpose.msra.mxu1 %v2700_v18  ;;  %2555 = vmatprep.subr.bf16.mxu0 %v2854_v0 }
  0x94   : > { %2567 = vmatprep.subr.bf16.mxu1 %v2854_v0 }
  0x9a   : > { %2556 = vmatpush3.bf16.xpose.msra.mxu0 %v2701_v19 }
  0x9b   : > { %2568 = vmatpush3.bf16.xpose.msra.mxu1 %v2702_v20  ;;  %2573 = vmatprep.subr.bf16.mxu0 %v2854_v0 }
  0x9c   : > { %2585 = vmatprep.subr.bf16.mxu1 %v2854_v0 }
  0xa1   : > { %2558 = vmatmul.mubr.bf16.vlgmr.msra.gmra.mxu0 %v277_v21 }
  0xa2   : > { %2570 = vmatmul.mubr.bf16.vlgmr.msra.gmra.mxu1 %v278_v23  ;;  %2574 = vmatpush3.bf16.xpose.msra.mxu0 %v2703_v22 }
  0xa3   : > { %2586 = vmatpush3.bf16.xpose.msra.mxu1 %v2704_v24  ;;  %2575 = vmatprep.subr.bf16.mxu0 %v2854_v0 }
  0xa4   : > { %2587 = vmatprep.subr.bf16.mxu1 %v2854_v0  ;;  %2581 = vmatprep.mubr.msk.bf16.mxu0 %vm2855_vm0, %v2854_v0 }
  0xa5   : > { %2593 = vmatprep.mubr.msk.bf16.mxu1 %vm2855_vm0, %v2854_v0 }
  0xaa   : > { %2576 = vmatpush3.bf16.xpose.msra.mxu0 %v2705_v25 }
  0xab   : > { %2588 = vmatpush3.bf16.xpose.msra.mxu1 %v2706_v26  ;;  %2577 = vmatprep.subr.bf16.mxu0 %v2854_v0 }
  0xac   : > { %2589 = vmatprep.subr.bf16.mxu1 %v2854_v0 }
  0xb2   : > { %2578 = vmatpush3.bf16.xpose.msra.mxu0 %v2707_v27 }
  0xb3   : > { %2590 = vmatpush3.bf16.xpose.msra.mxu1 %v2708_v28  ;;  %2579 = vmatprep.subr.bf16.mxu0 %v2854_v0 }
  0xb4   : > { %2591 = vmatprep.subr.bf16.mxu1 %v2854_v0 }
  0xba   : > { %2580 = vmatpush3.bf16.xpose.msra.mxu0 %v2709_v29 }
  0xbb   : > { %2592 = vmatpush3.bf16.xpose.msra.mxu1 %v2710_v30  ;;  %2597 = vmatprep.subr.bf16.mxu0 %v2854_v0 }
  0xbc   : > { %2609 = vmatprep.subr.bf16.mxu1 %v2854_v0 }
  0xc1   : > { %2582 = vmatmul.mubr.bf16.vlgmr.msra.gmra.mxu0 %v279_v31 }
  0xc2   : > { %2594 = vmatmul.mubr.bf16.vlgmr.msra.gmra.mxu1 %v280_v33  ;;  %2598 = vmatpush3.bf16.xpose.msra.mxu0 %v2711_v32 }
  0xc3   : > { %2610 = vmatpush3.bf16.xpose.msra.mxu1 %v2712_v34  ;;  %2599 = vmatprep.subr.bf16.mxu0 %v2854_v0  ;;  %v869_v34 = vld [vmem:[%s3039_s7 + $0x4] sm:$0x1] }
  0xc4   : > { %2611 = vmatprep.subr.bf16.mxu1 %v2854_v0  ;;  %2605 = vmatprep.mubr.msk.bf16.mxu0 %vm2855_vm0, %v2854_v0  ;;  %vm877_vm10 = vcmp.gt.f32.partialorder %v869_v34, 0.5 }
  0xc5   : > { %2617 = vmatprep.mubr.msk.bf16.mxu1 %vm2855_vm0, %v2854_v0 }
  0xca   : > { %2600 = vmatpush3.bf16.xpose.msra.mxu0 %v2713_v35  ;;  %v870_v35 = vld [vmem:[%s3039_s7 + $0x5] sm:$0x1] }
  0xcb   : > { %2612 = vmatpush3.bf16.xpose.msra.mxu1 %v2714_v36  ;;  %2601 = vmatprep.subr.bf16.mxu0 %v2854_v0  ;;  %vm878_vm11 = vcmp.gt.f32.partialorder %v870_v35, 0.5  ;;  %v887_v36 = vsel %vm877_vm10, 1, %v2856_v1 }
  0xcc   : > { %2613 = vmatprep.subr.bf16.mxu1 %v2854_v0 }
  0xd2   : > { %2602 = vmatpush3.bf16.xpose.msra.mxu0 %v2715_v37  ;;  %v888_v37 = vsel %vm878_vm11, 1, %v2856_v1 }
  0xd3   : > { %2614 = vmatpush3.bf16.xpose.msra.mxu1 %v2716_v38  ;;  %2603 = vmatprep.subr.bf16.mxu0 %v2854_v0  ;;  %v910_v38 = vrot.slane %v887_v36, %v3132_v47 }
  0xd4   : > { %2615 = vmatprep.subr.bf16.mxu1 %v2854_v0 }
  0xd5   : > { %vm927_vm12 = vcmp.eq.s32.totalorder %v910_v38, 1 }
  0xda   : > { %2604 = vmatpush3.bf16.xpose.msra.mxu0 %v2717_v39  ;;  %v914_v39 = vrot.slane %v888_v37, %v3132_v47 }
  0xdb   : > { %2616 = vmatpush3.bf16.xpose.msra.mxu1 %v2718_v40 }
  0xdc   : > { %vm928_vm13 = vcmp.eq.s32.totalorder %v914_v39, 1 }
  0xe0   : > { %v3138_v52 = vpop.permute.xlu0 %350 }
  0xe1   : > { %2606 = vmatmul.mubr.bf16.vlgmr.msra.gmra.mxu0 %v281_v41 }
  0xe2   : > { %2618 = vmatmul.mubr.bf16.vlgmr.msra.gmra.mxu1 %v282_v42 }
 0x141   : > { %v411_v53 = vpop.f32.mrf.mxu0 }
 0x142   : > { %v412_v54 = vadd.f32 %v411_v53, %v3138_v52  ;;  %v475_v55 = vpop.f32.mrf.mxu1 }
 0x143   : > { %v476_v57 = vadd.f32 %v475_v55, %v3138_v52  ;;  %v2535_v58 = vpop.f32.mrf.mxu0 }
 0x144   : > { %v3146_v59 = vsel %vm923_vm3, -inf, %v412_v54  ;;  %v2547_v60 = vpop.f32.mrf.mxu1  ;;  %v3156_v3 = vsel %vm923_vm3, inf, %v412_v54 }
 0x145   : > { %v414_v61 = vpop.f32.mrf.mxu0  ;;  %v3150_v62 = vsel %vm3141_vm4, -inf, %v476_v57  ;;  %v948_v63 = vsel %vm947_vm5, %v3146_v59, -inf  ;;  %v972_v6 = vsel %vm947_vm5, %v3156_v3, inf  ;;  %v3162_v7 = vsel %vm3141_vm4, inf, %v476_v57 }
 0x146   : > { %v478_v0 = vpop.f32.mrf.mxu1  ;;  %v951_v2 = vsel %vm947_vm5, %v3150_v62, -inf  ;;  %949 = vmax.xlane.f32.xlu0 %v948_v63  ;;  %v975_v8 = vsel %vm947_vm5, %v3162_v7, inf  ;;  %v871_v63 = vld [vmem:[%s3039_s7 + $0x6] sm:$0x1] }
 0x147   : > { %952 = vmax.xlane.f32.xlu1 %v951_v2  ;;  %v2536_v4 = vpop.f32.mrf.mxu0  ;;  %v872_v0 = vld [vmem:[%s3039_s7 + $0x7] sm:$0x1]  ;;  %vm879_vm14 = vcmp.gt.f32.partialorder %v871_v63, 0.5 }
 0x148   : > { %v2548_v5 = vpop.f32.mrf.mxu1  ;;  %vm880_vm15 = vcmp.gt.f32.partialorder %v872_v0, 0.5  ;;  %v889_v2 = vsel %vm879_vm14, 1, %v2856_v1 }
 0x149   : > { %v890_v4 = vsel %vm880_vm15, 1, %v2856_v1  ;;  %v918_v5 = vrot.slane %v889_v2, %v3132_v47 }
 0x14b   : > { %973 = vmin.xlane.f32.xlu1 %v972_v6  ;;  %v922_v6 = vrot.slane %v890_v4, %v3132_v47  ;;  %vm929_vm0 = vcmp.eq.s32.totalorder %v918_v5, 1 }
 0x14d   : > { %vm930_vm1 = vcmp.eq.s32.totalorder %v922_v6, 1 }
 0x14f   : > { %976 = vmin.xlane.f32.xlu1 %v975_v8 }
 0x161   : > { %v539_v15 = vpop.f32.mrf.mxu0 }
 0x162   : > { %v540_v16 = vadd.f32 %v539_v15, %v3138_v52  ;;  %v603_v17 = vpop.f32.mrf.mxu1 }
 0x163   : > { %v604_v19 = vadd.f32 %v603_v17, %v3138_v52  ;;  %v2559_v20 = vpop.f32.mrf.mxu0 }
 0x164   : > { %v3178_v21 = vsel %vm925_vm8, -inf, %v540_v16  ;;  %v3180_v22 = vsel %vm925_vm8, inf, %v540_v16  ;;  %v2571_v23 = vpop.f32.mrf.mxu1 }
 0x165   : > { %v3184_v24 = vsel %vm3173_vm9, -inf, %v604_v19  ;;  %v542_v25 = vpop.f32.mrf.mxu0  ;;  %v978_v26 = vsel %vm947_vm5, %v3180_v22, inf  ;;  %v954_v27 = vsel %vm947_vm5, %v3178_v21, -inf  ;;  %v3194_v32 = vsel %vm3173_vm9, inf, %v604_v19 }
 0x166   : > { %v606_v28 = vpop.f32.mrf.mxu1  ;;  %979 = vmin.xlane.f32.xlu0 %v978_v26  ;;  %955 = vmax.xlane.f32.xlu1 %v954_v27  ;;  %v957_v30 = vsel %vm947_vm5, %v3184_v24, -inf  ;;  %v981_v33 = vsel %vm947_vm5, %v3194_v32, inf  ;;  %v3247_v26 = vand.u32 127, %v881_v43 }
 0x167   : > { %v2560_v29 = vpop.f32.mrf.mxu0 }
 0x168   : > { %v2572_v31 = vpop.f32.mrf.mxu1 }
 0x16a   : > { %958 = vmax.xlane.f32.xlu1 %v957_v30 }
 0x16e   : > { %982 = vmin.xlane.f32.xlu1 %v981_v33 }
 0x181   : > { %v667_v40 = vpop.f32.mrf.mxu0 }
 0x182   : > { %v668_v41 = vadd.f32 %v667_v40, %v3138_v52  ;;  %v731_v42 = vpop.f32.mrf.mxu1 }
 0x183   : > { %v732_v44 = vadd.f32 %v731_v42, %v3138_v52  ;;  %v2583_v45 = vpop.f32.mrf.mxu0 }
 0x184   : > { %v3206_v46 = vsel %vm927_vm12, -inf, %v668_v41  ;;  %v3208_v48 = vsel %vm927_vm12, inf, %v668_v41  ;;  %v2595_v49 = vpop.f32.mrf.mxu1 }
 0x185   : > { %v670_v50 = vpop.f32.mrf.mxu0  ;;  %v984_v51 = vsel %vm947_vm5, %v3208_v48, inf  ;;  %v960_v53 = vsel %vm947_vm5, %v3206_v46, -inf  ;;  %v3214_v54 = vsel %vm928_vm13, -inf, %v732_v44  ;;  %v3218_v60 = vsel %vm928_vm13, inf, %v732_v44 }
 0x186   : > { %v734_v55 = vpop.f32.mrf.mxu1  ;;  %985 = vmin.xlane.f32.xlu0 %v984_v51  ;;  %961 = vmax.xlane.f32.xlu1 %v960_v53  ;;  %v963_v58 = vsel %vm947_vm5, %v3214_v54, -inf  ;;  %v987_v61 = vsel %vm947_vm5, %v3218_v60, inf }
 0x187   : > { %v2584_v56 = vpop.f32.mrf.mxu0 }
 0x188   : > { %v2596_v57 = vpop.f32.mrf.mxu1 }
 0x18a   : > { %964 = vmax.xlane.f32.xlu1 %v963_v58 }
 0x18e   : > { %988 = vmin.xlane.f32.xlu1 %v987_v61 }
 0x1a1   : > { %v795_v8 = vpop.f32.mrf.mxu0 }
 0x1a2   : > { %v796_v9 = vadd.f32 %v795_v8, %v3138_v52  ;;  %v859_v10 = vpop.f32.mrf.mxu1 }
 0x1a3   : > { %v860_v11 = vadd.f32 %v859_v10, %v3138_v52  ;;  %v2607_v12 = vpop.f32.mrf.mxu0 }
 0x1a4   : > { %v3230_v13 = vsel %vm929_vm0, -inf, %v796_v9  ;;  %v3232_v14 = vsel %vm929_vm0, inf, %v796_v9  ;;  %v2619_v15 = vpop.f32.mrf.mxu1 }
 0x1a5   : > { %v798_v16 = vpop.f32.mrf.mxu0  ;;  %v990_v1 = vsel %vm947_vm5, %v3232_v14, inf  ;;  %v966_v47 = vsel %vm947_vm5, %v3230_v13, -inf  ;;  %v3238_v17 = vsel %vm930_vm1, -inf, %v860_v11  ;;  %v3242_v23 = vsel %vm930_vm1, inf, %v860_v11 }
 0x1a6   : > { %v862_v18 = vpop.f32.mrf.mxu1  ;;  %991 = vmin.xlane.f32.xlu0 %v990_v1  ;;  %967 = vmax.xlane.f32.xlu1 %v966_v47  ;;  %v969_v20 = vsel %vm947_vm5, %v3238_v17, -inf  ;;  %v993_v25 = vsel %vm947_vm5, %v3242_v23, inf }
 0x1a7   : > { %v2608_v52 = vpop.f32.mrf.mxu0 }
 0x1a8   : > { %v2620_v19 = vpop.f32.mrf.mxu1 }
 0x1aa   : > { %970 = vmax.xlane.f32.xlu1 %v969_v20 }
 0x1ae   : > { %994 = vmin.xlane.f32.xlu1 %v993_v25 }
 0x1cf   : > { %v3249_v27 = vpop.xlane.xlu0 %949 }
 0x1d0   : > { %v3251_v28 = vpop.xlane.xlu1 %952  ;;  %vm1060_vm2 = vcmp.eq.f32.partialorder %v3146_v59, %v3249_v27 }
 0x1d1   : > { %4949 = vst [vmem:[#allocation10_spill] sm:$0xff] %v3251_v28  ;;  %v1068_v29 = vsel %vm1060_vm2, %v3247_v26, 64  ;;  %vm1061_vm3 = vcmp.eq.f32.partialorder %v3150_v62, %v3251_v28 }
 0x1d2   : > { %v3259_v30 = vsel %vm947_vm5, %v1068_v29, 2147483647  ;;  %v1069_v31 = vsel %vm1061_vm3, %v3247_v26, 64 }
 0x1d3   : > { %v1078_v43 = vshra.s32 %v3259_v30, 16  ;;  %v3264_v33 = vsel %vm947_vm5, %v1069_v31, 2147483647 }
 0x1d4   : > { %v3266_v34 = vpop.xlane.xlu1 %973  ;;  %v1093_v35 = vshra.s32 %v3264_v33, 16 }
 0x1d5   : > { %4950 = vst [vmem:[#allocation11_spill] sm:$0xff] %v3266_v34  ;;  %v3269_v36 = vcvt.s32.f32 %v1078_v43  ;;  %vm1196_vm4 = vcmp.eq.f32.partialorder %v3156_v3, %v3266_v34 }
 0x1d6   : > { %v3273_v37 = vcvt.s32.f32 %v1093_v35  ;;  %v1204_v38 = vsel %vm1196_vm4, %v3247_v26, 64 }
 0x1d7   : > { %1081 = vmin.xlane.f32.xlu0 %v3269_v36  ;;  %v3278_v39 = vsel %vm947_vm5, %v1204_v38, 2147483647 }
 0x1d8   : > { %v3280_v40 = vpop.xlane.xlu1 %976  ;;  %1096 = vmin.xlane.f32.xlu1 %v3273_v37  ;;  %v1214_v41 = vshra.s32 %v3278_v39, 16 }
 0x1d9   : > { %4951 = vst [vmem:[#allocation12_spill] sm:$0xff] %v3280_v40  ;;  %vm1197_vm6 = vcmp.eq.f32.partialorder %v3162_v7, %v3280_v40 }
 0x1da   : > { %v3286_v42 = vcvt.s32.f32 %v1214_v41  ;;  %v1205_v44 = vsel %vm1197_vm6, %v3247_v26, 64 }
 0x1db   : > { %v3290_v45 = vsel %vm947_vm5, %v1205_v44, 2147483647 }
 0x1dc   : > { %1217 = vmin.xlane.f32.xlu0 %v3286_v42  ;;  %v1229_v49 = vshra.s32 %v3290_v45, 16 }
 0x1de   : > { %v3294_v50 = vcvt.s32.f32 %v1229_v49 }
 0x1e0   : > { %1232 = vmin.xlane.f32.xlu1 %v3294_v50 }
 0x1ef   : > { %v3297_v51 = vpop.xlane.xlu0 %979  ;;  %v3299_v53 = vpop.xlane.xlu1 %955 }
 0x1f0   : > { %4952 = vst [vmem:[#allocation13_spill] sm:$0xff] %v3297_v51  ;;  %4953 = vst [vmem:[#allocation14_spill] sm:$0xff] %v3299_v53  ;;  %vm1062_vm7 = vcmp.eq.f32.partialorder %v3178_v21, %v3299_v53  ;;  %vm1198_vm8 = vcmp.eq.f32.partialorder %v3180_v22, %v3297_v51  ;;  %v1213_v53 = vand.u32 65535, %v3278_v39 }
 0x1f1   : > { %v1070_v55 = vsel %vm1062_vm7, %v3247_v26, 64  ;;  %v1206_v56 = vsel %vm1198_vm8, %v3247_v26, 64 }
 0x1f2   : > { %v3308_v57 = vsel %vm947_vm5, %v1070_v55, 2147483647  ;;  %v3311_v58 = vsel %vm947_vm5, %v1206_v56, 2147483647 }
 0x1f3   : > { %v3313_v61 = vpop.xlane.xlu1 %958  ;;  %v1108_v63 = vshra.s32 %v3308_v57, 16  ;;  %v1244_v2 = vshra.s32 %v3311_v58, 16 }
 0x1f4   : > { %4954 = vst [vmem:[#allocation15_spill] sm:$0xff] %v3313_v61  ;;  %vm1063_vm9 = vcmp.eq.f32.partialorder %v3184_v24, %v3313_v61 }
 0x1f5   : > { %v3318_v0 = vcvt.s32.f32 %v1108_v63  ;;  %v1071_v4 = vsel %vm1063_vm9, %v3247_v26, 64  ;;  %v3331_v9 = vcvt.s32.f32 %v1244_v2 }
 0x1f6   : > { %v3323_v5 = vsel %vm947_vm5, %v1071_v4, 2147483647 }
 0x1f7   : > { %v3325_v6 = vpop.xlane.xlu1 %982  ;;  %1111 = vmin.xlane.f32.xlu0 %v3318_v0  ;;  %v1123_v8 = vshra.s32 %v3323_v5, 16 }
 0x1f8   : > { %4955 = vst [vmem:[#allocation16_spill] sm:$0xff] %v3325_v6  ;;  %vm1199_vm10 = vcmp.eq.f32.partialorder %v3194_v32, %v3325_v6 }
 0x1f9   : > { %v3333_v10 = vcvt.s32.f32 %v1123_v8  ;;  %v1207_v11 = vsel %vm1199_vm10, %v3247_v26, 64 }
 0x1fa   : > { %v3337_v12 = vsel %vm947_vm5, %v1207_v11, 2147483647 }
 0x1fb   : > { %1247 = vmin.xlane.f32.xlu0 %v3331_v9  ;;  %1126 = vmin.xlane.f32.xlu1 %v3333_v10  ;;  %v1259_v15 = vshra.s32 %v3337_v12, 16 }
 0x1fd   : > { %v3342_v16 = vcvt.s32.f32 %v1259_v15 }
 0x1ff   : > { %1262 = vmin.xlane.f32.xlu1 %v3342_v16 }
 0x20f   : > { %v3345_v1 = vpop.xlane.xlu0 %985  ;;  %v3347_v47 = vpop.xlane.xlu1 %961 }
 0x210   : > { %4956 = vst [vmem:[#allocation17_spill] sm:$0xff] %v3345_v1  ;;  %4957 = vst [vmem:[#allocation18_spill] sm:$0xff] %v3347_v47  ;;  %vm1064_vm11 = vcmp.eq.f32.partialorder %v3206_v46, %v3347_v47  ;;  %vm1200_vm12 = vcmp.eq.f32.partialorder %v3208_v48, %v3345_v1 }
 0x211   : > { %v1072_v18 = vsel %vm1064_vm11, %v3247_v26, 64  ;;  %v1208_v52 = vsel %vm1200_vm12, %v3247_v26, 64 }
 0x212   : > { %v3356_v19 = vsel %vm947_vm5, %v1072_v18, 2147483647  ;;  %v3359_v20 = vsel %vm947_vm5, %v1208_v52, 2147483647 }
 0x213   : > { %v3361_v25 = vpop.xlane.xlu1 %964  ;;  %v1138_v29 = vshra.s32 %v3356_v19, 16  ;;  %v1274_v43 = vshra.s32 %v3359_v20, 16 }
 0x214   : > { %4958 = vst [vmem:[#allocation19_spill] sm:$0xff] %v3361_v25  ;;  %vm1065_vm13 = vcmp.eq.f32.partialorder %v3214_v54, %v3361_v25 }
 0x215   : > { %v3366_v31 = vcvt.s32.f32 %v1138_v29  ;;  %v1073_v35 = vsel %vm1065_vm13, %v3247_v26, 64  ;;  %v3379_v49 = vcvt.s32.f32 %v1274_v43 }
 0x216   : > { %v3371_v38 = vsel %vm947_vm5, %v1073_v35, 2147483647 }
 0x217   : > { %v3373_v41 = vpop.xlane.xlu1 %988  ;;  %1141 = vmin.xlane.f32.xlu0 %v3366_v31  ;;  %v1153_v44 = vshra.s32 %v3371_v38, 16 }
 0x218   : > { %4959 = vst [vmem:[#allocation20_spill] sm:$0xff] %v3373_v41  ;;  %vm1201_vm14 = vcmp.eq.f32.partialorder %v3218_v60, %v3373_v41 }
 0x219   : > { %v3381_v55 = vcvt.s32.f32 %v1153_v44  ;;  %v1209_v56 = vsel %vm1201_vm14, %v3247_v26, 64 }
 0x21a   : > { %v3385_v63 = vsel %vm947_vm5, %v1209_v56, 2147483647 }
 0x21b   : > { %1277 = vmin.xlane.f32.xlu0 %v3379_v49  ;;  %1156 = vmin.xlane.f32.xlu1 %v3381_v55  ;;  %v1289_v2 = vshra.s32 %v3385_v63, 16 }
 0x21d   : > { %v3390_v4 = vcvt.s32.f32 %v1289_v2 }
 0x21f   : > { %1292 = vmin.xlane.f32.xlu1 %v3390_v4 }
 0x22f   : > { %v3393_v8 = vpop.xlane.xlu0 %991  ;;  %v3395_v11 = vpop.xlane.xlu1 %967 }
 0x230   : > { %4960 = vst [vmem:[#allocation21_spill] sm:$0xff] %v3395_v11  ;;  %vm1066_vm15 = vcmp.eq.f32.partialorder %v3230_v13, %v3395_v11  ;;  %vm1202_vm0 = vcmp.eq.f32.partialorder %v3232_v14, %v3393_v8 }
 0x231   : > { %v1074_v15 = vsel %vm1066_vm15, %v3247_v26, 64  ;;  %v1210_v18 = vsel %vm1202_vm0, %v3247_v26, 64 }
 0x232   : > { %v3404_v52 = vsel %vm947_vm5, %v1074_v15, 2147483647  ;;  %v3407_v29 = vsel %vm947_vm5, %v1210_v18, 2147483647 }
 0x233   : > { %v3409_v43 = vpop.xlane.xlu1 %970  ;;  %v1168_v35 = vshra.s32 %v3404_v52, 16  ;;  %v1304_v56 = vshra.s32 %v3407_v29, 16 }
 0x234   : > { %4961 = vst [vmem:[#allocation22_spill] sm:$0xff] %v3409_v43  ;;  %vm1067_vm1 = vcmp.eq.f32.partialorder %v3238_v17, %v3409_v43 }
 0x235   : > { %v3414_v44 = vcvt.s32.f32 %v1168_v35  ;;  %v1075_v2 = vsel %vm1067_vm1, %v3247_v26, 64  ;;  %v3427_v41 = vcvt.s32.f32 %v1304_v56  ;;  %v1077_v56 = vand.u32 65535, %v3259_v30 }
 0x236   : > { %v3419_v11 = vsel %vm947_vm5, %v1075_v2, 2147483647 }
 0x237   : > { %1171 = vmin.xlane.f32.xlu0 %v3414_v44  ;;  %v3422_v15 = vpop.xlane.xlu1 %994  ;;  %v1183_v18 = vshra.s32 %v3419_v11, 16  ;;  %v1079_v6 = vcvt.s32.f32 %v1077_v56  ;;  %v1228_v56 = vand.u32 65535, %v3290_v45  ;;  %v1243_v45 = vand.u32 65535, %v3311_v58 }
 0x238   : > { %vm1203_vm2 = vcmp.eq.f32.partialorder %v3242_v23, %v3422_v15 }
 0x239   : > { %v3429_v35 = vcvt.s32.f32 %v1183_v18  ;;  %v1211_v43 = vsel %vm1203_vm2, %v3247_v26, 64  ;;  %v1092_v18 = vand.u32 65535, %v3264_v33  ;;  %v1215_v33 = vcvt.s32.f32 %v1213_v53 }
 0x23a   : > { %v3433_v25 = vsel %vm947_vm5, %v1211_v43, 2147483647  ;;  %v1230_v39 = vcvt.s32.f32 %v1228_v56 }
 0x23b   : > { %1307 = vmin.xlane.f32.xlu0 %v3427_v41  ;;  %1186 = vmin.xlane.f32.xlu1 %v3429_v35  ;;  %v1319_v2 = vshra.s32 %v3433_v25, 16  ;;  %v1094_v43 = vcvt.s32.f32 %v1092_v18  ;;  %v1122_v18 = vand.u32 65535, %v3323_v5 }
 0x23d   : > { %v3438_v47 = vcvt.s32.f32 %v1319_v2 }
 0x23f   : > { %1322 = vmin.xlane.f32.xlu1 %v3438_v47 }
 0x260   : > { %v3443_v1 = vpop.xlane.xlu0 %1081 }
 0x261   : > { %v3445_v61 = vpop.xlane.xlu1 %1096  ;;  %vm1083_vm3 = vcmp.eq.f32.partialorder %v3269_v36, %v3443_v1 }
 0x262   : > { %v1084_v51 = vsel %vm1083_vm3, %v1079_v6, inf  ;;  %vm1098_vm4 = vcmp.eq.f32.partialorder %v3273_v37, %v3445_v61 }
 0x263   : > { %1085 = vmin.xlane.f32.xlu0 %v1084_v51  ;;  %v1099_v2 = vsel %vm1098_vm4, %v1094_v43, inf  ;;  %v1107_v51 = vand.u32 65535, %v3308_v57  ;;  %v1258_v57 = vand.u32 65535, %v3337_v12  ;;  %v1137_v12 = vand.u32 65535, %v3356_v19 }
 0x264   : > { %1100 = vmin.xlane.f32.xlu1 %v1099_v2  ;;  %v1124_v2 = vcvt.s32.f32 %v1122_v18  ;;  %v1288_v19 = vand.u32 65535, %v3385_v63  ;;  %v1167_v63 = vand.u32 65535, %v3404_v52  ;;  %v1318_v52 = vand.u32 65535, %v3433_v25 }
 0x265   : > { %v3452_v30 = vpop.xlane.xlu0 %1217  ;;  %v1109_v53 = vcvt.s32.f32 %v1107_v51  ;;  %v1088_v25 = vcvt.f32.s32 %v3443_v1 }
 0x266   : > { %vm1219_vm6 = vcmp.eq.f32.partialorder %v3286_v42, %v3452_v30 }
 0x267   : > { %v1220_v40 = vsel %vm1219_vm6, %v1215_v33, inf  ;;  %v1260_v33 = vcvt.s32.f32 %v1258_v57  ;;  %v1303_v57 = vand.u32 65535, %v3407_v29 }
 0x268   : > { %1221 = vmin.xlane.f32.xlu0 %v1220_v40 }
 0x269   : > { %v3457_v36 = vpop.xlane.xlu1 %1232 }
 0x26a   : > { %vm1234_vm7 = vcmp.eq.f32.partialorder %v3294_v50, %v3457_v36  ;;  %v1245_v50 = vcvt.s32.f32 %v1243_v45 }
 0x26b   : > { %v1235_v37 = vsel %vm1234_vm7, %v1230_v39, inf }
 0x26c   : > { %1236 = vmin.xlane.f32.xlu1 %v1235_v37  ;;  %v1273_v37 = vand.u32 65535, %v3359_v20 }
 0x280   : > { %v3462_v6 = vpop.xlane.xlu0 %1111 }
 0x281   : > { %vm1113_vm8 = vcmp.eq.f32.partialorder %v3318_v0, %v3462_v6 }
 0x282   : > { %v1114_v40 = vsel %vm1113_vm8, %v1109_v53, inf }
 0x283   : > { %1115 = vmin.xlane.f32.xlu0 %v1114_v40  ;;  %v1290_v40 = vcvt.s32.f32 %v1288_v19 }
 0x284   : > { %v3468_v42 = vpop.xlane.xlu0 %1247  ;;  %v3470_v43 = vpop.xlane.xlu1 %1126 }
 0x285   : > { %vm1249_vm9 = vcmp.eq.f32.partialorder %v3331_v9, %v3468_v42  ;;  %vm1128_vm10 = vcmp.eq.f32.partialorder %v3333_v10, %v3470_v43  ;;  %v1139_v9 = vcvt.s32.f32 %v1137_v12  ;;  %v1152_v10 = vand.u32 65535, %v3371_v38 }
 0x286   : > { %v1250_v58 = vsel %vm1249_vm9, %v1245_v50, inf  ;;  %v1129_v5 = vsel %vm1128_vm10, %v1124_v2, inf  ;;  %v1320_v12 = vcvt.s32.f32 %v1318_v52 }
 0x287   : > { %1251 = vmin.xlane.f32.xlu0 %v1250_v58  ;;  %1130 = vmin.xlane.f32.xlu1 %v1129_v5  ;;  %v1154_v18 = vcvt.s32.f32 %v1152_v10  ;;  %v1089_v10 = vshll.u32 %v1088_v25, 16 }
 0x288   : > { %v3477_v0 = vpop.xlane.xlu1 %1262 }
 0x289   : > { %vm1264_vm11 = vcmp.eq.f32.partialorder %v3342_v16, %v3477_v0  ;;  %v1275_v16 = vcvt.s32.f32 %v1273_v37  ;;  %v1103_v37 = vcvt.f32.s32 %v3445_v61 }
 0x28a   : > { %v1265_v56 = vsel %vm1264_vm11, %v1260_v33, inf }
 0x28b   : > { %1266 = vmin.xlane.f32.xlu1 %v1265_v56 }
 0x2a0   : > { %v3482_v39 = vpop.xlane.xlu0 %1141 }
 0x2a1   : > { %vm1143_vm12 = vcmp.eq.f32.partialorder %v3366_v31, %v3482_v39 }
 0x2a2   : > { %v1144_v51 = vsel %vm1143_vm12, %v1139_v9, inf }
 0x2a3   : > { %1145 = vmin.xlane.f32.xlu0 %v1144_v51 }
 0x2a4   : > { %v3488_v53 = vpop.xlane.xlu0 %1277  ;;  %v3490_v45 = vpop.xlane.xlu1 %1156 }
 0x2a5   : > { %vm1279_vm13 = vcmp.eq.f32.partialorder %v3379_v49, %v3488_v53  ;;  %vm1158_vm14 = vcmp.eq.f32.partialorder %v3381_v55, %v3490_v45  ;;  %v1169_v49 = vcvt.s32.f32 %v1167_v63  ;;  %v1182_v55 = vand.u32 65535, %v3419_v11 }
 0x2a6   : > { %v1280_v20 = vsel %vm1279_vm13, %v1275_v16, inf  ;;  %v1159_v38 = vsel %vm1158_vm14, %v1154_v18, inf  ;;  %v1104_v18 = vshll.u32 %v1103_v37, 16 }
 0x2a7   : > { %1281 = vmin.xlane.f32.xlu0 %v1280_v20  ;;  %1160 = vmin.xlane.f32.xlu1 %v1159_v38  ;;  %v1184_v56 = vcvt.s32.f32 %v1182_v55 }
 0x2a8   : > { %v3497_v31 = vpop.xlane.xlu1 %1292 }
 0x2a9   : > { %vm1294_vm15 = vcmp.eq.f32.partialorder %v3390_v4, %v3497_v31  ;;  %v1305_v4 = vcvt.s32.f32 %v1303_v57 }
 0x2aa   : > { %v1295_v50 = vsel %vm1294_vm15, %v1290_v40, inf }
 0x2ab   : > { %1296 = vmin.xlane.f32.xlu1 %v1295_v50 }
 0x2c0   : > { %v3502_v2 = vpop.xlane.xlu0 %1171 }
 0x2c1   : > { %vm1173_vm0 = vcmp.eq.f32.partialorder %v3414_v44, %v3502_v2 }
 0x2c2   : > { %v1174_v58 = vsel %vm1173_vm0, %v1169_v49, inf }
 0x2c3   : > { %1175 = vmin.xlane.f32.xlu0 %v1174_v58 }
 0x2c4   : > { %v3508_v5 = vpop.xlane.xlu0 %1307  ;;  %v3510_v33 = vpop.xlane.xlu1 %1186 }
 0x2c5   : > { %vm1309_vm1 = vcmp.eq.f32.partialorder %v3427_v41, %v3508_v5  ;;  %vm1188_vm2 = vcmp.eq.f32.partialorder %v3429_v35, %v3510_v33  ;;  %v1224_v35 = vcvt.f32.s32 %v3452_v30 }
 0x2c6   : > { %v1310_v11 = vsel %vm1309_vm1, %v1305_v4, inf  ;;  %v1189_v29 = vsel %vm1188_vm2, %v1184_v56, inf }
 0x2c7   : > { %1311 = vmin.xlane.f32.xlu0 %v1310_v11  ;;  %1190 = vmin.xlane.f32.xlu1 %v1189_v29  ;;  %v1225_v40 = vshll.u32 %v1224_v35, 16  ;;  %v1118_v11 = vcvt.f32.s32 %v3462_v6  ;;  %v1254_v29 = vcvt.f32.s32 %v3468_v42 }
 0x2c8   : > { %v3517_v44 = vpop.xlane.xlu1 %1322 }
 0x2c9   : > { %vm1324_vm3 = vcmp.eq.f32.partialorder %v3438_v47, %v3517_v44  ;;  %v1239_v47 = vcvt.f32.s32 %v3457_v36 }
 0x2ca   : > { %v1325_v9 = vsel %vm1324_vm3, %v1320_v12, inf }
 0x2cb   : > { %1326 = vmin.xlane.f32.xlu1 %v1325_v9  ;;  %v1240_v36 = vshll.u32 %v1239_v47, 16  ;;  %v1119_v9 = vshll.u32 %v1118_v11, 16 }
 0x2ec   : > { %v1086_v41 = vpop.xlane.xlu0 %1085 }
 0x2ed   : > { %v1087_v51 = vcvt.f32.s32 %v1086_v41  ;;  %v1101_v16 = vpop.xlane.xlu1 %1100  ;;  %v1255_v41 = vshll.u32 %v1254_v29, 16 }
 0x2ee   : > { %v1102_v19 = vcvt.f32.s32 %v1101_v16 }
 0x2ef   : > { %v1090_v20 = vadd.s32 %v1089_v10, %v1087_v51 }
 0x2f0   : > { %v1105_v38 = vadd.s32 %v1104_v18, %v1102_v19 }
 0x2f1   : > { %v1222_v50 = vpop.xlane.xlu0 %1221  ;;  %vm1332_vm4 = vcmp.eq.s32.totalorder %v3247_v26, %v1090_v20 }
 0x2f2   : > { %v1223_v63 = vcvt.f32.s32 %v1222_v50  ;;  %v3527_v1 = vsel %vm1332_vm4, -inf, %v3146_v59  ;;  %vm1333_vm6 = vcmp.eq.s32.totalorder %v3247_v26, %v1105_v38 }
 0x2f3   : > { %v1364_v61 = vsel %vm947_vm5, %v3527_v1, -inf  ;;  %v3533_v30 = vsel %vm1333_vm6, -inf, %v3150_v62 }
 0x2f4   : > { %v1226_v49 = vadd.s32 %v1225_v40, %v1223_v63  ;;  %1365 = vmax.xlane.f32.xlu0 %v1364_v61  ;;  %v1367_v57 = vsel %vm947_vm5, %v3533_v30, -inf }
 0x2f5   : > { %1368 = vmax.xlane.f32.xlu1 %v1367_v57  ;;  %v1237_v55 = vpop.xlane.xlu1 %1236  ;;  %v1163_v57 = vcvt.f32.s32 %v3490_v45 }
 0x2f6   : > { %v1238_v58 = vcvt.f32.s32 %v1237_v55  ;;  %vm1348_vm7 = vcmp.eq.s32.totalorder %v3247_v26, %v1226_v49  ;;  %v1284_v49 = vcvt.f32.s32 %v3488_v53 }
 0x2f7   : > { %v3539_v59 = vsel %vm1348_vm7, inf, %v3156_v3  ;;  %v1133_v3 = vcvt.f32.s32 %v3470_v43 }
 0x2f8   : > { %v1241_v4 = vadd.s32 %v1240_v36, %v1238_v58  ;;  %v1388_v56 = vsel %vm947_vm5, %v3539_v59, inf }
 0x2f9   : > { %1389 = vmin.xlane.f32.xlu0 %v1388_v56  ;;  %v1134_v10 = vshll.u32 %v1133_v3, 16  ;;  %v1285_v56 = vshll.u32 %v1284_v49, 16 }
 0x2fa   : > { %vm1349_vm8 = vcmp.eq.s32.totalorder %v3247_v26, %v1241_v4 }
 0x2fb   : > { %v3545_v62 = vsel %vm1349_vm8, inf, %v3162_v7  ;;  %v1269_v7 = vcvt.f32.s32 %v3477_v0 }
 0x2fc   : > { %v1391_v52 = vsel %vm947_vm5, %v3545_v62, inf }
 0x2fd   : > { %1392 = vmin.xlane.f32.xlu1 %v1391_v52  ;;  %v1270_v38 = vshll.u32 %v1269_v7, 16  ;;  %v1164_v52 = vshll.u32 %v1163_v57, 16 }
 0x30c   : > { %v1116_v12 = vpop.xlane.xlu0 %1115 }
 0x30d   : > { %v1117_v25 = vcvt.f32.s32 %v1116_v12 }
 0x30f   : > { %v1120_v37 = vadd.s32 %v1119_v9, %v1117_v25 }
 0x310   : > { %v1252_v35 = vpop.xlane.xlu0 %1251  ;;  %v1131_v51 = vpop.xlane.xlu1 %1130 }
 0x311   : > { %v1253_v16 = vcvt.f32.s32 %v1252_v35  ;;  %v1132_v18 = vcvt.f32.s32 %v1131_v51  ;;  %vm1334_vm9 = vcmp.eq.s32.totalorder %v3247_v26, %v1120_v37 }
 0x312   : > { %v3555_v6 = vsel %vm1334_vm9, -inf, %v3178_v21 }
 0x313   : > { %v1256_v42 = vadd.s32 %v1255_v41, %v1253_v16  ;;  %v1135_v19 = vadd.s32 %v1134_v10, %v1132_v18  ;;  %v1370_v43 = vsel %vm947_vm5, %v3555_v6, -inf  ;;  %v1314_v16 = vcvt.f32.s32 %v3508_v5 }
 0x314   : > { %1371 = vmax.xlane.f32.xlu0 %v1370_v43  ;;  %v1267_v20 = vpop.xlane.xlu1 %1266  ;;  %v1193_v18 = vcvt.f32.s32 %v3510_v33 }
 0x315   : > { %v1268_v40 = vcvt.f32.s32 %v1267_v20  ;;  %vm1350_vm10 = vcmp.eq.s32.totalorder %v3247_v26, %v1256_v42  ;;  %vm1335_vm11 = vcmp.eq.s32.totalorder %v3247_v26, %v1135_v19 }
 0x316   : > { %v3562_v0 = vsel %vm1350_vm10, inf, %v3180_v22  ;;  %v3565_v50 = vsel %vm1335_vm11, -inf, %v3184_v24  ;;  %v1148_v24 = vcvt.f32.s32 %v3482_v39 }
 0x317   : > { %v1271_v21 = vadd.s32 %v1270_v38, %v1268_v40  ;;  %v1394_v47 = vsel %vm947_vm5, %v3562_v0, inf  ;;  %v1373_v63 = vsel %vm947_vm5, %v3565_v50, -inf  ;;  %v1315_v38 = vshll.u32 %v1314_v16, 16 }
 0x318   : > { %1395 = vmin.xlane.f32.xlu0 %v1394_v47  ;;  %1374 = vmax.xlane.f32.xlu1 %v1373_v63  ;;  %v1149_v36 = vshll.u32 %v1148_v24, 16  ;;  %v1194_v40 = vshll.u32 %v1193_v18, 16 }
 0x319   : > { %vm1351_vm12 = vcmp.eq.s32.totalorder %v3247_v26, %v1271_v21 }
 0x31a   : > { %v3573_v61 = vsel %vm1351_vm12, inf, %v3194_v32  ;;  %v1299_v32 = vcvt.f32.s32 %v3497_v31 }
 0x31b   : > { %v1397_v22 = vsel %vm947_vm5, %v3573_v61, inf }
 0x31c   : > { %1398 = vmin.xlane.f32.xlu1 %v1397_v22  ;;  %v1300_v37 = vshll.u32 %v1299_v32, 16 }
 0x32c   : > { %v1146_v55 = vpop.xlane.xlu0 %1145 }
 0x32d   : > { %v1147_v58 = vcvt.f32.s32 %v1146_v55 }
 0x32f   : > { %v1150_v4 = vadd.s32 %v1149_v36, %v1147_v58 }
 0x330   : > { %v1282_v11 = vpop.xlane.xlu0 %1281  ;;  %v1161_v29 = vpop.xlane.xlu1 %1160 }
 0x331   : > { %v1283_v3 = vcvt.f32.s32 %v1282_v11  ;;  %v1162_v12 = vcvt.f32.s32 %v1161_v29  ;;  %vm1336_vm13 = vcmp.eq.s32.totalorder %v3247_v26, %v1150_v4 }
 0x332   : > { %v3583_v39 = vsel %vm1336_vm13, -inf, %v3206_v46 }
 0x333   : > { %v1286_v53 = vadd.s32 %v1285_v56, %v1283_v3  ;;  %v1165_v9 = vadd.s32 %v1164_v52, %v1162_v12  ;;  %v1376_v45 = vsel %vm947_vm5, %v3583_v39, -inf }
 0x334   : > { %1377 = vmax.xlane.f32.xlu0 %v1376_v45  ;;  %v1297_v25 = vpop.xlane.xlu1 %1296 }
 0x335   : > { %v1298_v41 = vcvt.f32.s32 %v1297_v25  ;;  %vm1352_vm14 = vcmp.eq.s32.totalorder %v3247_v26, %v1286_v53  ;;  %vm1337_vm15 = vcmp.eq.s32.totalorder %v3247_v26, %v1165_v9 }
 0x336   : > { %v3590_v31 = vsel %vm1352_vm14, inf, %v3208_v48  ;;  %v3593_v10 = vsel %vm1337_vm15, -inf, %v3214_v54  ;;  %v1178_v54 = vcvt.f32.s32 %v3502_v2 }
 0x337   : > { %v1301_v46 = vadd.s32 %v1300_v37, %v1298_v41  ;;  %v1400_v35 = vsel %vm947_vm5, %v3590_v31, inf  ;;  %v1379_v51 = vsel %vm947_vm5, %v3593_v10, -inf }
 0x338   : > { %1401 = vmin.xlane.f32.xlu0 %v1400_v35  ;;  %1380 = vmax.xlane.f32.xlu1 %v1379_v51  ;;  %v1179_v19 = vshll.u32 %v1178_v54, 16 }
 0x339   : > { %vm1353_vm0 = vcmp.eq.s32.totalorder %v3247_v26, %v1301_v46 }
 0x33a   : > { %v3601_v7 = vsel %vm1353_vm0, inf, %v3218_v60  ;;  %v1329_v60 = vcvt.f32.s32 %v3517_v44 }
 0x33b   : > { %v1403_v48 = vsel %vm947_vm5, %v3601_v7, inf }
 0x33c   : > { %1404 = vmin.xlane.f32.xlu1 %v1403_v48  ;;  %v1330_v57 = vshll.u32 %v1329_v60, 16 }
 0x34c   : > { %v1176_v42 = vpop.xlane.xlu0 %1175 }
 0x34d   : > { %v1177_v43 = vcvt.f32.s32 %v1176_v42 }
 0x34f   : > { %v1180_v20 = vadd.s32 %v1179_v19, %v1177_v43 }
 0x350   : > { %v1312_v21 = vpop.xlane.xlu0 %1311  ;;  %v1191_v47 = vpop.xlane.xlu1 %1190 }
 0x351   : > { %v1313_v63 = vcvt.f32.s32 %v1312_v21  ;;  %v1192_v22 = vcvt.f32.s32 %v1191_v47  ;;  %vm1338_vm1 = vcmp.eq.s32.totalorder %v3247_v26, %v1180_v20 }
 0x352   : > { %v3611_v2 = vsel %vm1338_vm1, -inf, %v3230_v13 }
 0x353   : > { %v1316_v5 = vadd.s32 %v1315_v38, %v1313_v63  ;;  %v1195_v24 = vadd.s32 %v1194_v40, %v1192_v22  ;;  %v1382_v33 = vsel %vm947_vm5, %v3611_v2, -inf }
 0x354   : > { %1383 = vmax.xlane.f32.xlu0 %v1382_v33  ;;  %v1327_v49 = vpop.xlane.xlu1 %1326 }
 0x355   : > { %v1328_v55 = vcvt.f32.s32 %v1327_v49  ;;  %vm1354_vm2 = vcmp.eq.s32.totalorder %v3247_v26, %v1316_v5  ;;  %vm1339_vm3 = vcmp.eq.s32.totalorder %v3247_v26, %v1195_v24 }
 0x356   : > { %v3618_v44 = vsel %vm1354_vm2, inf, %v3232_v14  ;;  %v3621_v36 = vsel %vm1339_vm3, -inf, %v3238_v17 }
 0x357   : > { %v1331_v13 = vadd.s32 %v1330_v57, %v1328_v55  ;;  %v1406_v58 = vsel %vm947_vm5, %v3618_v44, inf  ;;  %v1385_v4 = vsel %vm947_vm5, %v3621_v36, -inf }
 0x358   : > { %1407 = vmin.xlane.f32.xlu0 %v1406_v58  ;;  %1386 = vmax.xlane.f32.xlu1 %v1385_v4 }
 0x359   : > { %vm1355_vm4 = vcmp.eq.s32.totalorder %v3247_v26, %v1331_v13 }
 0x35a   : > { %v3629_v56 = vsel %vm1355_vm4, inf, %v3242_v23 }
 0x35b   : > { %v1409_v14 = vsel %vm947_vm5, %v3629_v56, inf }
 0x35c   : > { %1410 = vmin.xlane.f32.xlu1 %v1409_v14 }
 0x37d   : > { %v3633_v17 = vpop.xlane.xlu0 %1365 }
 0x37e   : > { %4962 = vst [vmem:[#allocation23_spill] sm:$0xff] %v3633_v17  ;;  %v3635_v52 = vpop.xlane.xlu1 %1368  ;;  %vm1476_vm6 = vcmp.eq.f32.partialorder %v3527_v1, %v3633_v17 }
 0x37f   : > { %4963 = vst [vmem:[#allocation24_spill] sm:$0xff] %v3635_v52  ;;  %v1484_v11 = vsel %vm1476_vm6, %v3247_v26, 64  ;;  %vm1477_vm7 = vcmp.eq.f32.partialorder %v3533_v30, %v3635_v52 }
 0x380   : > { %v3643_v29 = vsel %vm947_vm5, %v1484_v11, 2147483647  ;;  %v1485_v23 = vsel %vm1477_vm7, %v3247_v26, 64 }
 0x381   : > { %v1494_v32 = vshra.s32 %v3643_v29, 16  ;;  %v3648_v3 = vsel %vm947_vm5, %v1485_v23, 2147483647 }
 0x382   : > { %v3650_v12 = vpop.xlane.xlu0 %1389  ;;  %v1509_v53 = vshra.s32 %v3648_v3, 16 }
 0x383   : > { %4964 = vst [vmem:[#allocation25_spill] sm:$0xff] %v3650_v12  ;;  %v3653_v9 = vcvt.s32.f32 %v1494_v32  ;;  %vm1612_vm8 = vcmp.eq.f32.partialorder %v3539_v59, %v3650_v12 }
 0x384   : > { %v3657_v45 = vcvt.s32.f32 %v1509_v53  ;;  %v1620_v25 = vsel %vm1612_vm8, %v3247_v26, 64 }
 0x385   : > { %1497 = vmin.xlane.f32.xlu0 %v3653_v9  ;;  %v3662_v37 = vsel %vm947_vm5, %v1620_v25, 2147483647 }
 0x386   : > { %1512 = vmin.xlane.f32.xlu1 %v3657_v45  ;;  %v3665_v41 = vpop.xlane.xlu1 %1392  ;;  %v1630_v46 = vshra.s32 %v3662_v37, 16  ;;  %v1629_v17 = vand.u32 65535, %v3662_v37 }
 0x387   : > { %4965 = vst [vmem:[#allocation26_spill] sm:$0xff] %v3665_v41  ;;  %vm1613_vm9 = vcmp.eq.f32.partialorder %v3545_v62, %v3665_v41 }
 0x388   : > { %v3670_v35 = vcvt.s32.f32 %v1630_v46  ;;  %v1621_v51 = vsel %vm1613_vm9, %v3247_v26, 64 }
 0x389   : > { %v3674_v48 = vsel %vm947_vm5, %v1621_v51, 2147483647 }
 0x38a   : > { %1633 = vmin.xlane.f32.xlu0 %v3670_v35  ;;  %v1645_v54 = vshra.s32 %v3674_v48, 16 }
 0x38c   : > { %v3678_v16 = vcvt.s32.f32 %v1645_v54 }
 0x38e   : > { %1648 = vmin.xlane.f32.xlu1 %v3678_v16 }
 0x39d   : > { %v3681_v18 = vpop.xlane.xlu0 %1371 }
 0x39e   : > { %4966 = vst [vmem:[#allocation27_spill] sm:$0xff] %v3681_v18  ;;  %vm1478_vm10 = vcmp.eq.f32.partialorder %v3555_v6, %v3681_v18 }
 0x39f   : > { %v1486_v42 = vsel %vm1478_vm10, %v3247_v26, 64 }
 0x3a0   : > { %v3687_v19 = vsel %vm947_vm5, %v1486_v42, 2147483647 }
 0x3a1   : > { %v3689_v43 = vpop.xlane.xlu0 %1395  ;;  %v3691_v20 = vpop.xlane.xlu1 %1374  ;;  %v1524_v38 = vshra.s32 %v3687_v19, 16 }
 0x3a2   : > { %4967 = vst [vmem:[#allocation28_spill] sm:$0xff] %v3689_v43  ;;  %4968 = vst [vmem:[#allocation29_spill] sm:$0xff] %v3691_v20  ;;  %vm1614_vm11 = vcmp.eq.f32.partialorder %v3562_v0, %v3689_v43  ;;  %vm1479_vm12 = vcmp.eq.f32.partialorder %v3565_v50, %v3691_v20 }
 0x3a3   : > { %v3698_v40 = vcvt.s32.f32 %v1524_v38  ;;  %v1622_v21 = vsel %vm1614_vm11, %v3247_v26, 64  ;;  %v1487_v47 = vsel %vm1479_vm12, %v3247_v26, 64 }
 0x3a4   : > { %v3703_v60 = vsel %vm947_vm5, %v1622_v21, 2147483647  ;;  %v3706_v63 = vsel %vm947_vm5, %v1487_v47, 2147483647 }
 0x3a5   : > { %1527 = vmin.xlane.f32.xlu0 %v3698_v40  ;;  %v3709_v22 = vpop.xlane.xlu1 %1398  ;;  %v1660_v5 = vshra.s32 %v3703_v60, 16  ;;  %v1539_v24 = vshra.s32 %v3706_v63, 16 }
 0x3a6   : > { %4969 = vst [vmem:[#allocation30_spill] sm:$0xff] %v3709_v22  ;;  %vm1615_vm13 = vcmp.eq.f32.partialorder %v3573_v61, %v3709_v22 }
 0x3a7   : > { %v3715_v33 = vcvt.s32.f32 %v1660_v5  ;;  %v3717_v49 = vcvt.s32.f32 %v1539_v24  ;;  %v1623_v57 = vsel %vm1615_vm13, %v3247_v26, 64 }
 0x3a8   : > { %v3721_v55 = vsel %vm947_vm5, %v1623_v57, 2147483647 }
 0x3a9   : > { %1663 = vmin.xlane.f32.xlu0 %v3715_v33  ;;  %1542 = vmin.xlane.f32.xlu1 %v3717_v49  ;;  %v1675_v13 = vshra.s32 %v3721_v55, 16 }
 0x3ab   : > { %v3726_v58 = vcvt.s32.f32 %v1675_v13 }
 0x3ad   : > { %1678 = vmin.xlane.f32.xlu1 %v3726_v58 }
 0x3bd   : > { %v3729_v4 = vpop.xlane.xlu0 %1377 }
 0x3be   : > { %4970 = vst [vmem:[#allocation31_spill] sm:$0xff] %v3729_v4  ;;  %vm1480_vm14 = vcmp.eq.f32.partialorder %v3583_v39, %v3729_v4 }
 0x3bf   : > { %v1488_v14 = vsel %vm1480_vm14, %v3247_v26, 64 }
 0x3c0   : > { %v3735_v11 = vsel %vm947_vm5, %v1488_v14, 2147483647 }
 0x3c1   : > { %v3737_v23 = vpop.xlane.xlu0 %1401  ;;  %v3739_v32 = vpop.xlane.xlu1 %1380  ;;  %v1554_v53 = vshra.s32 %v3735_v11, 16 }
 0x3c2   : > { %4971 = vst [vmem:[#allocation32_spill] sm:$0xff] %v3737_v23  ;;  %4972 = vst [vmem:[#allocation33_spill] sm:$0xff] %v3739_v32  ;;  %vm1616_vm15 = vcmp.eq.f32.partialorder %v3590_v31, %v3737_v23  ;;  %vm1481_vm0 = vcmp.eq.f32.partialorder %v3593_v10, %v3739_v32 }
 0x3c3   : > { %v3746_v25 = vcvt.s32.f32 %v1554_v53  ;;  %v1624_v46 = vsel %vm1616_vm15, %v3247_v26, 64  ;;  %v1489_v51 = vsel %vm1481_vm0, %v3247_v26, 64 }
 0x3c4   : > { %v3751_v54 = vsel %vm947_vm5, %v1624_v46, 2147483647  ;;  %v3754_v42 = vsel %vm947_vm5, %v1489_v51, 2147483647 }
 0x3c5   : > { %1557 = vmin.xlane.f32.xlu0 %v3746_v25  ;;  %v3757_v38 = vpop.xlane.xlu1 %1404  ;;  %v1690_v21 = vshra.s32 %v3751_v54, 16  ;;  %v1569_v47 = vshra.s32 %v3754_v42, 16 }
 0x3c6   : > { %4973 = vst [vmem:[#allocation34_spill] sm:$0xff] %v3757_v38  ;;  %vm1617_vm1 = vcmp.eq.f32.partialorder %v3601_v7, %v3757_v38 }
 0x3c7   : > { %v3763_v5 = vcvt.s32.f32 %v1690_v21  ;;  %v3765_v24 = vcvt.s32.f32 %v1569_v47  ;;  %v1625_v57 = vsel %vm1617_vm1, %v3247_v26, 64 }
 0x3c8   : > { %v3769_v13 = vsel %vm947_vm5, %v1625_v57, 2147483647 }
 0x3c9   : > { %1693 = vmin.xlane.f32.xlu0 %v3763_v5  ;;  %1572 = vmin.xlane.f32.xlu1 %v3765_v24  ;;  %v1705_v14 = vshra.s32 %v3769_v13, 16 }
 0x3cb   : > { %v3774_v53 = vcvt.s32.f32 %v1705_v14 }
 0x3cd   : > { %1708 = vmin.xlane.f32.xlu1 %v3774_v53 }
 0x3dd   : > { %v3777_v46 = vpop.xlane.xlu0 %1383 }
 0x3de   : > { %4974 = vst [vmem:[#allocation35_spill] sm:$0xff] %v3777_v46  ;;  %vm1482_vm2 = vcmp.eq.f32.partialorder %v3611_v2, %v3777_v46 }
 0x3df   : > { %v1490_v51 = vsel %vm1482_vm2, %v3247_v26, 64 }
 0x3e0   : > { %v3783_v21 = vsel %vm947_vm5, %v1490_v51, 2147483647 }
 0x3e1   : > { %v3785_v47 = vpop.xlane.xlu0 %1407  ;;  %v3787_v57 = vpop.xlane.xlu1 %1386  ;;  %v1584_v38 = vshra.s32 %v3783_v21, 16 }
 0x3e2   : > { %4975 = vst [vmem:[#allocation36_spill] sm:$0xff] %v3787_v57  ;;  %vm1618_vm3 = vcmp.eq.f32.partialorder %v3618_v44, %v3785_v47  ;;  %vm1483_vm4 = vcmp.eq.f32.partialorder %v3621_v36, %v3787_v57 }
 0x3e3   : > { %v3794_v14 = vcvt.s32.f32 %v1584_v38  ;;  %v1626_v46 = vsel %vm1618_vm3, %v3247_v26, 64  ;;  %v1491_v32 = vsel %vm1483_vm4, %v3247_v26, 64 }
 0x3e4   : > { %v3799_v51 = vsel %vm947_vm5, %v1626_v46, 2147483647  ;;  %v3802_v23 = vsel %vm947_vm5, %v1491_v32, 2147483647 }
 0x3e5   : > { %1587 = vmin.xlane.f32.xlu0 %v3794_v14  ;;  %v3805_v4 = vpop.xlane.xlu1 %1410  ;;  %v1720_v22 = vshra.s32 %v3799_v51, 16  ;;  %v1599_v57 = vshra.s32 %v3802_v23, 16 }
 0x3e6   : > { %vm1619_vm6 = vcmp.eq.f32.partialorder %v3629_v56, %v3805_v4 }
 0x3e7   : > { %v3811_v38 = vcvt.s32.f32 %v1720_v22  ;;  %v3813_v20 = vcvt.s32.f32 %v1599_v57  ;;  %v1627_v46 = vsel %vm1619_vm6, %v3247_v26, 64  ;;  %v1493_v22 = vand.u32 65535, %v3643_v29 }
 0x3e8   : > { %v3817_v32 = vsel %vm947_vm5, %v1627_v46, 2147483647  ;;  %v1508_v57 = vand.u32 65535, %v3648_v3  ;;  %v1631_v3 = vcvt.s32.f32 %v1629_v17 }
 0x3e9   : > { %1723 = vmin.xlane.f32.xlu0 %v3811_v38  ;;  %1602 = vmin.xlane.f32.xlu1 %v3813_v20  ;;  %v1735_v43 = vshra.s32 %v3817_v32, 16  ;;  %v1495_v12 = vcvt.s32.f32 %v1493_v22  ;;  %v1644_v22 = vand.u32 65535, %v3674_v48  ;;  %v1659_v48 = vand.u32 65535, %v3703_v60 }
 0x3ea   : > { %v1510_v46 = vcvt.s32.f32 %v1508_v57  ;;  %v1538_v57 = vand.u32 65535, %v3706_v63 }
 0x3eb   : > { %v3822_v18 = vcvt.s32.f32 %v1735_v43  ;;  %v1646_v37 = vcvt.s32.f32 %v1644_v22 }
 0x3ed   : > { %1738 = vmin.xlane.f32.xlu1 %v3822_v18 }
 0x40e   : > { %v3827_v41 = vpop.xlane.xlu0 %1497 }
 0x40f   : > { %v3829_v52 = vpop.xlane.xlu1 %1512  ;;  %vm1499_vm7 = vcmp.eq.f32.partialorder %v3653_v9, %v3827_v41 }
 0x410   : > { %v1500_v34 = vsel %vm1499_vm7, %v1495_v12, inf  ;;  %vm1514_vm8 = vcmp.eq.f32.partialorder %v3657_v45, %v3829_v52 }
 0x411   : > { %1501 = vmin.xlane.f32.xlu0 %v1500_v34  ;;  %v1515_v43 = vsel %vm1514_vm8, %v1510_v46, inf  ;;  %v1523_v34 = vand.u32 65535, %v3687_v19  ;;  %v1674_v19 = vand.u32 65535, %v3721_v55  ;;  %v1553_v55 = vand.u32 65535, %v3735_v11 }
 0x412   : > { %1516 = vmin.xlane.f32.xlu1 %v1515_v43  ;;  %v1540_v43 = vcvt.s32.f32 %v1538_v57 }
 0x413   : > { %v3836_v29 = vpop.xlane.xlu0 %1633  ;;  %v1525_v17 = vcvt.s32.f32 %v1523_v34 }
 0x414   : > { %vm1635_vm9 = vcmp.eq.f32.partialorder %v3670_v35, %v3836_v29 }
 0x415   : > { %v1636_v28 = vsel %vm1635_vm9, %v1631_v3, inf  ;;  %v1676_v3 = vcvt.s32.f32 %v1674_v19 }
 0x416   : > { %1637 = vmin.xlane.f32.xlu0 %v1636_v28 }
 0x417   : > { %v3841_v9 = vpop.xlane.xlu1 %1648 }
 0x418   : > { %vm1650_vm10 = vcmp.eq.f32.partialorder %v3678_v16, %v3841_v9  ;;  %v1661_v16 = vcvt.s32.f32 %v1659_v48 }
 0x419   : > { %v1651_v12 = vsel %vm1650_vm10, %v1646_v37, inf }
 0x41a   : > { %1652 = vmin.xlane.f32.xlu1 %v1651_v12  ;;  %v1689_v12 = vand.u32 65535, %v3751_v54 }
 0x41c   : > { %v1691_v57 = vcvt.s32.f32 %v1689_v12  ;;  %v1519_v12 = vcvt.f32.s32 %v3829_v52 }
 0x42e   : > { %v3846_v45 = vpop.xlane.xlu0 %1527 }
 0x42f   : > { %vm1529_vm11 = vcmp.eq.f32.partialorder %v3698_v40, %v3846_v45 }
 0x430   : > { %v1530_v28 = vsel %vm1529_vm11, %v1525_v17, inf  ;;  %v1704_v17 = vand.u32 65535, %v3769_v13 }
 0x431   : > { %1531 = vmin.xlane.f32.xlu0 %v1530_v28 }
 0x432   : > { %v3852_v35 = vpop.xlane.xlu0 %1663  ;;  %v3854_v46 = vpop.xlane.xlu1 %1542  ;;  %v1706_v28 = vcvt.s32.f32 %v1704_v17 }
 0x433   : > { %vm1665_vm12 = vcmp.eq.f32.partialorder %v3715_v33, %v3852_v35  ;;  %vm1544_vm13 = vcmp.eq.f32.partialorder %v3717_v49, %v3854_v46  ;;  %v1555_v33 = vcvt.s32.f32 %v1553_v55  ;;  %v1568_v49 = vand.u32 65535, %v3754_v42 }
 0x434   : > { %v1666_v60 = vsel %vm1665_vm12, %v1661_v16, inf  ;;  %v1545_v63 = vsel %vm1544_vm13, %v1540_v43, inf  ;;  %v1583_v16 = vand.u32 65535, %v3783_v21  ;;  %v1598_v43 = vand.u32 65535, %v3802_v23 }
 0x435   : > { %1667 = vmin.xlane.f32.xlu0 %v1666_v60  ;;  %1546 = vmin.xlane.f32.xlu1 %v1545_v63  ;;  %v1570_v11 = vcvt.s32.f32 %v1568_v49  ;;  %v1734_v63 = vand.u32 65535, %v3817_v32 }
 0x436   : > { %v3861_v40 = vpop.xlane.xlu1 %1678  ;;  %v1585_v19 = vcvt.s32.f32 %v1583_v16  ;;  %v1600_v21 = vcvt.s32.f32 %v1598_v43 }
 0x437   : > { %vm1680_vm14 = vcmp.eq.f32.partialorder %v3726_v58, %v3861_v40  ;;  %v1736_v55 = vcvt.s32.f32 %v1734_v63 }
 0x438   : > { %v1681_v22 = vsel %vm1680_vm14, %v1676_v3, inf }
 0x439   : > { %1682 = vmin.xlane.f32.xlu1 %v1681_v22 }
 0x44e   : > { %v3866_v37 = vpop.xlane.xlu0 %1557 }
 0x44f   : > { %vm1559_vm15 = vcmp.eq.f32.partialorder %v3746_v25, %v3866_v37 }
 0x450   : > { %v1560_v34 = vsel %vm1559_vm15, %v1555_v33, inf  ;;  %v1504_v33 = vcvt.f32.s32 %v3827_v41 }
 0x451   : > { %1561 = vmin.xlane.f32.xlu0 %v1560_v34 }
 0x452   : > { %v3873_v48 = vpop.xlane.xlu0 %1693  ;;  %v3875_v58 = vpop.xlane.xlu1 %1572  ;;  %v1505_v49 = vshll.u32 %v1504_v33, 16 }
 0x453   : > { %vm1695_vm0 = vcmp.eq.f32.partialorder %v3763_v5, %v3873_v48  ;;  %vm1574_vm1 = vcmp.eq.f32.partialorder %v3765_v24, %v3875_v58  ;;  %v1719_v24 = vand.u32 65535, %v3799_v51 }
 0x454   : > { %v1696_v54 = vsel %vm1695_vm0, %v1691_v57, inf  ;;  %v1575_v42 = vsel %vm1574_vm1, %v1570_v11, inf  ;;  %v1520_v57 = vshll.u32 %v1519_v12, 16 }
 0x455   : > { %1697 = vmin.xlane.f32.xlu0 %v1696_v54  ;;  %1576 = vmin.xlane.f32.xlu1 %v1575_v42  ;;  %v1721_v22 = vcvt.s32.f32 %v1719_v24 }
 0x456   : > { %v3881_v25 = vpop.xlane.xlu1 %1708 }
 0x457   : > { %vm1710_vm2 = vcmp.eq.f32.partialorder %v3774_v53, %v3881_v25 }
 0x458   : > { %v1711_v13 = vsel %vm1710_vm2, %v1706_v28, inf }
 0x459   : > { %1712 = vmin.xlane.f32.xlu1 %v1711_v13 }
 0x46e   : > { %v3887_v5 = vpop.xlane.xlu0 %1587 }
 0x46f   : > { %vm1589_vm3 = vcmp.eq.f32.partialorder %v3794_v14, %v3887_v5 }
 0x470   : > { %v1590_v60 = vsel %vm1589_vm3, %v1585_v19, inf }
 0x471   : > { %1591 = vmin.xlane.f32.xlu0 %v1590_v60 }
 0x472   : > { %v3893_v3 = vpop.xlane.xlu0 %1723  ;;  %v3895_v53 = vpop.xlane.xlu1 %1602 }
 0x473   : > { %vm1604_vm4 = vcmp.eq.f32.partialorder %v3813_v20, %v3895_v53  ;;  %vm1725_vm6 = vcmp.eq.f32.partialorder %v3811_v38, %v3893_v3  ;;  %v1640_v38 = vcvt.f32.s32 %v3836_v29 }
 0x474   : > { %v1726_v23 = vsel %vm1725_vm6, %v1721_v22, inf  ;;  %v1605_v51 = vsel %vm1604_vm4, %v1600_v21, inf }
 0x475   : > { %1727 = vmin.xlane.f32.xlu0 %v1726_v23  ;;  %1606 = vmin.xlane.f32.xlu1 %v1605_v51  ;;  %v1641_v28 = vshll.u32 %v1640_v38, 16  ;;  %v1534_v23 = vcvt.f32.s32 %v3846_v45  ;;  %v1670_v51 = vcvt.f32.s32 %v3852_v35 }
 0x476   : > { %v3901_v14 = vpop.xlane.xlu1 %1738 }
 0x477   : > { %vm1740_vm7 = vcmp.eq.f32.partialorder %v3822_v18, %v3901_v14  ;;  %v1655_v18 = vcvt.f32.s32 %v3841_v9 }
 0x478   : > { %v1741_v32 = vsel %vm1740_vm7, %v1736_v55, inf }
 0x479   : > { %1742 = vmin.xlane.f32.xlu1 %v1741_v32  ;;  %v1656_v9 = vshll.u32 %v1655_v18, 16  ;;  %v1535_v32 = vshll.u32 %v1534_v23, 16 }
 0x49a   : > { %v1502_v20 = vpop.xlane.xlu0 %1501 }
 0x49b   : > { %v1503_v34 = vcvt.f32.s32 %v1502_v20  ;;  %v1517_v17 = vpop.xlane.xlu1 %1516  ;;  %v1671_v20 = vshll.u32 %v1670_v51, 16 }
 0x49c   : > { %v1518_v11 = vcvt.f32.s32 %v1517_v17 }
 0x49d   : > { %v1506_v54 = vadd.s32 %v1505_v49, %v1503_v34 }
 0x49e   : > { %v1521_v42 = vadd.s32 %v1520_v57, %v1518_v11 }
 0x49f   : > { %v1638_v13 = vpop.xlane.xlu0 %1637  ;;  %vm1748_vm8 = vcmp.eq.s32.totalorder %v3247_v26, %v1506_v54 }
 0x4a0   : > { %vm1749_vm9 = vcmp.eq.s32.totalorder %v3247_v26, %v1521_v42  ;;  %v1639_v41 = vcvt.f32.s32 %v1638_v13  ;;  %v3912_v52 = vsel %vm1748_vm8, -inf, %v3527_v1 }
 0x4a1   : > { %v1780_v29 = vsel %vm947_vm5, %v3912_v52, -inf  ;;  %v3917_v16 = vsel %vm1749_vm9, -inf, %v3533_v30 }
 0x4a2   : > { %v1642_v43 = vadd.s32 %v1641_v28, %v1639_v41  ;;  %1781 = vmax.xlane.f32.xlu0 %v1780_v29  ;;  %v1783_v19 = vsel %vm947_vm5, %v3917_v16, -inf }
 0x4a3   : > { %1784 = vmax.xlane.f32.xlu1 %v1783_v19  ;;  %v1653_v24 = vpop.xlane.xlu1 %1652  ;;  %v1579_v19 = vcvt.f32.s32 %v3875_v58 }
 0x4a4   : > { %v1654_v60 = vcvt.f32.s32 %v1653_v24  ;;  %vm1764_vm10 = vcmp.eq.s32.totalorder %v3247_v26, %v1642_v43  ;;  %v1700_v43 = vcvt.f32.s32 %v3873_v48 }
 0x4a5   : > { %v3923_v1 = vsel %vm1764_vm10, inf, %v3539_v59  ;;  %v1549_v59 = vcvt.f32.s32 %v3854_v46 }
 0x4a6   : > { %v1657_v63 = vadd.s32 %v1656_v9, %v1654_v60  ;;  %v1804_v22 = vsel %vm947_vm5, %v3923_v1, inf }
 0x4a7   : > { %1805 = vmin.xlane.f32.xlu0 %v1804_v22  ;;  %v1550_v49 = vshll.u32 %v1549_v59, 16  ;;  %v1701_v22 = vshll.u32 %v1700_v43, 16 }
 0x4a8   : > { %vm1765_vm11 = vcmp.eq.s32.totalorder %v3247_v26, %v1657_v63 }
 0x4a9   : > { %v3929_v30 = vsel %vm1765_vm11, inf, %v3545_v62  ;;  %v1685_v62 = vcvt.f32.s32 %v3861_v40 }
 0x4aa   : > { %v1807_v21 = vsel %vm947_vm5, %v3929_v30, inf }
 0x4ab   : > { %1808 = vmin.xlane.f32.xlu1 %v1807_v21  ;;  %v1686_v42 = vshll.u32 %v1685_v62, 16  ;;  %v1580_v21 = vshll.u32 %v1579_v19, 16 }
 0x4ba   : > { %v1532_v55 = vpop.xlane.xlu0 %1531 }
 0x4bb   : > { %v1533_v33 = vcvt.f32.s32 %v1532_v55 }
 0x4bd   : > { %v1536_v12 = vadd.s32 %v1535_v32, %v1533_v33 }
 0x4be   : > { %v1668_v38 = vpop.xlane.xlu0 %1667  ;;  %v1547_v34 = vpop.xlane.xlu1 %1546 }
 0x4bf   : > { %v1669_v17 = vcvt.f32.s32 %v1668_v38  ;;  %v1548_v57 = vcvt.f32.s32 %v1547_v34  ;;  %vm1750_vm12 = vcmp.eq.s32.totalorder %v3247_v26, %v1536_v12 }
 0x4c0   : > { %v3939_v45 = vsel %vm1750_vm12, -inf, %v3555_v6 }
 0x4c1   : > { %v1672_v35 = vadd.s32 %v1671_v20, %v1669_v17  ;;  %v1551_v11 = vadd.s32 %v1550_v49, %v1548_v57  ;;  %v1786_v46 = vsel %vm947_vm5, %v3939_v45, -inf  ;;  %v1730_v17 = vcvt.f32.s32 %v3893_v3 }
 0x4c2   : > { %1787 = vmax.xlane.f32.xlu0 %v1786_v46  ;;  %v1683_v54 = vpop.xlane.xlu1 %1682  ;;  %v1609_v57 = vcvt.f32.s32 %v3895_v53 }
 0x4c3   : > { %vm1751_vm13 = vcmp.eq.s32.totalorder %v3247_v26, %v1551_v11  ;;  %v1684_v28 = vcvt.f32.s32 %v1683_v54  ;;  %vm1766_vm14 = vcmp.eq.s32.totalorder %v3247_v26, %v1672_v35 }
 0x4c4   : > { %v3946_v40 = vsel %vm1766_vm14, inf, %v3562_v0  ;;  %v3949_v13 = vsel %vm1751_vm13, -inf, %v3565_v50  ;;  %v1564_v50 = vcvt.f32.s32 %v3866_v37 }
 0x4c5   : > { %v1687_v6 = vadd.s32 %v1686_v42, %v1684_v28  ;;  %v1810_v18 = vsel %vm947_vm5, %v3946_v40, inf  ;;  %v1789_v41 = vsel %vm947_vm5, %v3949_v13, -inf  ;;  %v1731_v42 = vshll.u32 %v1730_v17, 16 }
 0x4c6   : > { %1811 = vmin.xlane.f32.xlu0 %v1810_v18  ;;  %1790 = vmax.xlane.f32.xlu1 %v1789_v41  ;;  %v1565_v9 = vshll.u32 %v1564_v50, 16  ;;  %v1610_v28 = vshll.u32 %v1609_v57, 16 }
 0x4c7   : > { %vm1767_vm15 = vcmp.eq.s32.totalorder %v3247_v26, %v1687_v6 }
 0x4c8   : > { %v3957_v29 = vsel %vm1767_vm15, inf, %v3573_v61  ;;  %v1715_v61 = vcvt.f32.s32 %v3881_v25 }
 0x4c9   : > { %v1813_v0 = vsel %vm947_vm5, %v3957_v29, inf }
 0x4ca   : > { %1814 = vmin.xlane.f32.xlu1 %v1813_v0  ;;  %v1716_v12 = vshll.u32 %v1715_v61, 16 }
 0x4da   : > { %v1562_v24 = vpop.xlane.xlu0 %1561 }
 0x4db   : > { %v1563_v60 = vcvt.f32.s32 %v1562_v24 }
 0x4dd   : > { %v1566_v63 = vadd.s32 %v1565_v9, %v1563_v60 }
 0x4de   : > { %v1698_v23 = vpop.xlane.xlu0 %1697  ;;  %v1577_v51 = vpop.xlane.xlu1 %1576 }
 0x4df   : > { %vm1752_vm0 = vcmp.eq.s32.totalorder %v3247_v26, %v1566_v63  ;;  %v1699_v59 = vcvt.f32.s32 %v1698_v23  ;;  %v1578_v55 = vcvt.f32.s32 %v1577_v51 }
 0x4e0   : > { %v3967_v37 = vsel %vm1752_vm0, -inf, %v3583_v39 }
 0x4e1   : > { %v1702_v48 = vadd.s32 %v1701_v22, %v1699_v59  ;;  %v1581_v32 = vadd.s32 %v1580_v21, %v1578_v55  ;;  %v1792_v58 = vsel %vm947_vm5, %v3967_v37, -inf }
 0x4e2   : > { %1793 = vmax.xlane.f32.xlu0 %v1792_v58  ;;  %v1713_v33 = vpop.xlane.xlu1 %1712 }
 0x4e3   : > { %vm1768_vm1 = vcmp.eq.s32.totalorder %v3247_v26, %v1702_v48  ;;  %vm1753_vm2 = vcmp.eq.s32.totalorder %v3247_v26, %v1581_v32  ;;  %v1714_v25 = vcvt.f32.s32 %v1713_v33 }
 0x4e4   : > { %v3974_v20 = vsel %vm1768_vm1, inf, %v3590_v31  ;;  %v3977_v49 = vsel %vm1753_vm2, -inf, %v3593_v10  ;;  %v1594_v10 = vcvt.f32.s32 %v3887_v5 }
 0x4e5   : > { %v1717_v39 = vadd.s32 %v1716_v12, %v1714_v25  ;;  %v1816_v38 = vsel %vm947_vm5, %v3974_v20, inf  ;;  %v1795_v34 = vsel %vm947_vm5, %v3977_v49, -inf }
 0x4e6   : > { %1817 = vmin.xlane.f32.xlu0 %v1816_v38  ;;  %1796 = vmax.xlane.f32.xlu1 %v1795_v34  ;;  %v1595_v11 = vshll.u32 %v1594_v10, 16 }
 0x4e7   : > { %vm1769_vm3 = vcmp.eq.s32.totalorder %v3247_v26, %v1717_v39 }
 0x4e8   : > { %v3985_v62 = vsel %vm1769_vm3, inf, %v3601_v7  ;;  %v1745_v7 = vcvt.f32.s32 %v3901_v14 }
 0x4e9   : > { %v1819_v31 = vsel %vm947_vm5, %v3985_v62, inf }
 0x4ea   : > { %1820 = vmin.xlane.f32.xlu1 %v1819_v31  ;;  %v1746_v19 = vshll.u32 %v1745_v7, 16 }
 0x4fa   : > { %v1592_v35 = vpop.xlane.xlu0 %1591 }
 0x4fb   : > { %v1593_v46 = vcvt.f32.s32 %v1592_v35 }
 0x4fd   : > { %v1596_v54 = vadd.s32 %v1595_v11, %v1593_v46 }
 0x4fe   : > { %v1728_v6 = vpop.xlane.xlu0 %1727  ;;  %v1607_v18 = vpop.xlane.xlu1 %1606 }
 0x4ff   : > { %vm1754_vm4 = vcmp.eq.s32.totalorder %v3247_v26, %v1596_v54  ;;  %v1729_v41 = vcvt.f32.s32 %v1728_v6  ;;  %v1608_v0 = vcvt.f32.s32 %v1607_v18 }
 0x500   : > { %v3995_v5 = vsel %vm1754_vm4, -inf, %v3611_v2 }
 0x501   : > { %v1732_v3 = vadd.s32 %v1731_v42, %v1729_v41  ;;  %v1611_v50 = vadd.s32 %v1610_v28, %v1608_v0  ;;  %v1798_v53 = vsel %vm947_vm5, %v3995_v5, -inf }
 0x502   : > { %1799 = vmax.xlane.f32.xlu0 %v1798_v53  ;;  %v1743_v43 = vpop.xlane.xlu1 %1742 }
 0x503   : > { %vm1770_vm6 = vcmp.eq.s32.totalorder %v3247_v26, %v1732_v3  ;;  %vm1755_vm7 = vcmp.eq.s32.totalorder %v3247_v26, %v1611_v50  ;;  %v1744_v14 = vcvt.f32.s32 %v1743_v43 }
 0x504   : > { %v4002_v24 = vsel %vm1770_vm6, inf, %v3618_v44  ;;  %v4005_v9 = vsel %vm1755_vm7, -inf, %v3621_v36  ;;  %vm1034_vm6 = vweird.f32 %v3393_v8  ;;  %vm1450_vm7 = vweird.f32 %v3785_v47 }
 0x505   : > { %v1747_v2 = vadd.s32 %v1746_v19, %v1744_v14  ;;  %v1822_v60 = vsel %vm947_vm5, %v4002_v24, inf  ;;  %v1801_v63 = vsel %vm947_vm5, %v4005_v9, -inf }
 0x506   : > { %1823 = vmin.xlane.f32.xlu0 %v1822_v60  ;;  %1802 = vmax.xlane.f32.xlu1 %v1801_v63 }
 0x507   : > { %vm1771_vm8 = vcmp.eq.s32.totalorder %v3247_v26, %v1747_v2 }
 0x508   : > { %v4013_v22 = vsel %vm1771_vm8, inf, %v3629_v56  ;;  %vm1451_vm8 = vweird.f32 %v3805_v4 }
 0x509   : > { %v1825_v44 = vsel %vm947_vm5, %v4013_v22, inf }
 0x50a   : > { %1826 = vmin.xlane.f32.xlu1 %v1825_v44 }
 0x52b   : > { %v4017_v36 = vpop.xlane.xlu0 %1781 }
 0x52c   : > { %vm1892_vm9 = vcmp.eq.f32.partialorder %v3912_v52, %v4017_v36  ;;  %v4021_v21 = vpop.xlane.xlu1 %1784 }
 0x52d   : > { %4976 = vst [vmem:[#allocation37_spill] sm:$0xff] %v4021_v21  ;;  %v1900_v23 = vsel %vm1892_vm9, %v3247_v26, 64  ;;  %vm1893_vm10 = vcmp.eq.f32.partialorder %v3917_v16, %v4021_v21 }
 0x52e   : > { %v1901_v51 = vsel %vm1893_vm10, %v3247_v26, 64  ;;  %v4028_v56 = vsel %vm947_vm5, %v1900_v23, 2147483647  ;;  %vm1035_vm10 = vweird.f32 %v3422_v15 }
 0x52f   : > { %v1910_v61 = vshra.s32 %v4028_v56, 16  ;;  %v4032_v59 = vsel %vm947_vm5, %v1901_v51, 2147483647 }
 0x530   : > { %v4034_v55 = vpop.xlane.xlu0 %1805  ;;  %v1925_v48 = vshra.s32 %v4032_v59, 16 }
 0x531   : > { %4977 = vst [vmem:[#allocation38_spill] sm:$0xff] %v4034_v55  ;;  %vm2028_vm11 = vcmp.eq.f32.partialorder %v3923_v1, %v4034_v55  ;;  %v4039_v32 = vcvt.s32.f32 %v1910_v61 }
 0x532   : > { %v2036_v58 = vsel %vm2028_vm11, %v3247_v26, 64  ;;  %v4042_v33 = vcvt.s32.f32 %v1925_v48  ;;  %vm2857_vm11 = vmmov 1  }
 0x533   : > { %1913 = vmin.xlane.f32.xlu0 %v4039_v32  ;;  %v4046_v12 = vsel %vm947_vm5, %v2036_v58, 2147483647 }
 0x534   : > { %1928 = vmin.xlane.f32.xlu1 %v4042_v33  ;;  %v4049_v25 = vpop.xlane.xlu1 %1808  ;;  %v2046_v39 = vshra.s32 %v4046_v12, 16 }
 0x535   : > { %4978 = vst [vmem:[#allocation39_spill] sm:$0xff] %v4049_v25  ;;  %vm2029_vm12 = vcmp.eq.f32.partialorder %v3929_v30, %v4049_v25 }
 0x536   : > { %v2037_v38 = vsel %vm2029_vm12, %v3247_v26, 64  ;;  %v4055_v34 = vcvt.s32.f32 %v2046_v39  ;;  %vm4170_vm12 = vmxor %vm1034_vm6, %vm2857_vm11 }
 0x537   : > { %v4058_v31 = vsel %vm947_vm5, %v2037_v38, 2147483647 }
 0x538   : > { %2049 = vmin.xlane.f32.xlu0 %v4055_v34  ;;  %v2061_v10 = vshra.s32 %v4058_v31, 16 }
 0x53a   : > { %v4062_v17 = vcvt.s32.f32 %v2061_v10 }
 0x53c   : > { %2064 = vmin.xlane.f32.xlu1 %v4062_v17 }
 0x54b   : > { %v4065_v57 = vpop.xlane.xlu0 %1787 }
 0x54c   : > { %4979 = vst [vmem:[#allocation40_spill] sm:$0xff] %v4065_v57  ;;  %vm1894_vm13 = vcmp.eq.f32.partialorder %v3939_v45, %v4065_v57 }
 0x54d   : > { %v1902_v35 = vsel %vm1894_vm13, %v3247_v26, 64  ;;  %vm4176_vm13 = vmxor %vm1450_vm7, %vm2857_vm11 }
 0x54e   : > { %v4071_v11 = vsel %vm947_vm5, %v1902_v35, 2147483647 }
 0x54f   : > { %v4073_v46 = vpop.xlane.xlu0 %1811  ;;  %v4075_v54 = vpop.xlane.xlu1 %1790  ;;  %v1940_v42 = vshra.s32 %v4071_v11, 16 }
 0x550   : > { %4980 = vst [vmem:[#allocation41_spill] sm:$0xff] %v4073_v46  ;;  %4981 = vst [vmem:[#allocation42_spill] sm:$0xff] %v4075_v54  ;;  %vm2030_vm14 = vcmp.eq.f32.partialorder %v3946_v40, %v4073_v46  ;;  %vm1895_vm15 = vcmp.eq.f32.partialorder %v3949_v13, %v4075_v54 }
 0x551   : > { %v2038_v28 = vsel %vm2030_vm14, %v3247_v26, 64  ;;  %v1903_v6 = vsel %vm1895_vm15, %v3247_v26, 64  ;;  %v4084_v18 = vcvt.s32.f32 %v1940_v42  ;;  %vm4184_vm14 = vmxor %vm1451_vm8, %vm2857_vm11 }
 0x552   : > { %v4087_v7 = vsel %vm947_vm5, %v2038_v28, 2147483647  ;;  %v4090_v41 = vsel %vm947_vm5, %v1903_v6, 2147483647  ;;  %vm4192_vm15 = vmxor %vm1035_vm10, %vm2857_vm11  ;;  %v1467_v57 = vsel %vm4184_vm14, %v3805_v4, 0.0 }
 0x553   : > { %1943 = vmin.xlane.f32.xlu0 %v4084_v18  ;;  %v4093_v0 = vpop.xlane.xlu1 %1814  ;;  %v2076_v3 = vshra.s32 %v4087_v7, 16  ;;  %v1955_v50 = vshra.s32 %v4090_v41, 16 }
 0x554   : > { %4982 = vst [vmem:[#allocation43_spill] sm:$0xff] %v4093_v0  ;;  %vm2031_vm0 = vcmp.eq.f32.partialorder %v3957_v29, %v4093_v0 }
 0x555   : > { %v2039_v53 = vsel %vm2031_vm0, %v3247_v26, 64  ;;  %v4100_v43 = vcvt.s32.f32 %v2076_v3  ;;  %v4102_v19 = vcvt.s32.f32 %v1955_v50 }
 0x556   : > { %v4105_v14 = vsel %vm947_vm5, %v2039_v53, 2147483647 }
 0x557   : > { %2079 = vmin.xlane.f32.xlu0 %v4100_v43  ;;  %1958 = vmin.xlane.f32.xlu1 %v4102_v19  ;;  %v2091_v2 = vshra.s32 %v4105_v14, 16 }
 0x559   : > { %v4110_v60 = vcvt.s32.f32 %v2091_v2 }
 0x55b   : > { %2094 = vmin.xlane.f32.xlu1 %v4110_v60 }
 0x56b   : > { %v4113_v63 = vpop.xlane.xlu0 %1793 }
 0x56c   : > { %4983 = vst [vmem:[#allocation44_spill] sm:$0xff] %v4113_v63  ;;  %vm1896_vm1 = vcmp.eq.f32.partialorder %v3967_v37, %v4113_v63 }
 0x56d   : > { %v1904_v44 = vsel %vm1896_vm1, %v3247_v26, 64 }
 0x56e   : > { %v4119_v23 = vsel %vm947_vm5, %v1904_v44, 2147483647 }
 0x56f   : > { %v4121_v51 = vpop.xlane.xlu0 %1817  ;;  %v4123_v61 = vpop.xlane.xlu1 %1796  ;;  %v1970_v48 = vshra.s32 %v4119_v23, 16 }
 0x570   : > { %4984 = vst [vmem:[#allocation45_spill] sm:$0xff] %v4121_v51  ;;  %4985 = vst [vmem:[#allocation46_spill] sm:$0xff] %v4123_v61  ;;  %vm2032_vm2 = vcmp.eq.f32.partialorder %v3974_v20, %v4121_v51  ;;  %vm1897_vm3 = vcmp.eq.f32.partialorder %v3977_v49, %v4123_v61 }
 0x571   : > { %v2040_v58 = vsel %vm2032_vm2, %v3247_v26, 64  ;;  %v1905_v39 = vsel %vm1897_vm3, %v3247_v26, 64  ;;  %v4132_v38 = vcvt.s32.f32 %v1970_v48 }
 0x572   : > { %v4135_v10 = vsel %vm947_vm5, %v2040_v58, 2147483647  ;;  %v4138_v35 = vsel %vm947_vm5, %v1905_v39, 2147483647 }
 0x573   : > { %1973 = vmin.xlane.f32.xlu0 %v4132_v38  ;;  %v4141_v42 = vpop.xlane.xlu1 %1820  ;;  %v2106_v28 = vshra.s32 %v4135_v10, 16  ;;  %v1985_v6 = vshra.s32 %v4138_v35, 16 }
 0x574   : > { %4986 = vst [vmem:[#allocation47_spill] sm:$0xff] %v4141_v42  ;;  %vm2033_vm4 = vcmp.eq.f32.partialorder %v3985_v62, %v4141_v42 }
 0x575   : > { %v2041_v3 = vsel %vm2033_vm4, %v3247_v26, 64  ;;  %v4148_v50 = vcvt.s32.f32 %v2106_v28  ;;  %v4150_v53 = vcvt.s32.f32 %v1985_v6  ;;  %v1050_v6 = vsel %vm4170_vm12, %v3393_v8, 0.0 }
 0x576   : > { %v4153_v2 = vsel %vm947_vm5, %v2041_v3, 2147483647 }
 0x577   : > { %2109 = vmin.xlane.f32.xlu0 %v4148_v50  ;;  %1988 = vmin.xlane.f32.xlu1 %v4150_v53  ;;  %v2121_v44 = vshra.s32 %v4153_v2, 16 }
 0x579   : > { %v4158_v48 = vcvt.s32.f32 %v2121_v44 }
 0x57b   : > { %2124 = vmin.xlane.f32.xlu1 %v4158_v48 }
 0x58b   : > { %v4163_v58 = vpop.xlane.xlu0 %1799 }
 0x58c   : > { %4987 = vst [vmem:[#allocation48_spill] sm:$0xff] %v4163_v58  ;;  %vm1898_vm9 = vcmp.eq.f32.partialorder %v3995_v5, %v4163_v58 }
 0x58d   : > { %v1906_v28 = vsel %vm1898_vm9, %v3247_v26, 64 }
 0x58e   : > { %v4181_v3 = vsel %vm947_vm5, %v1906_v28, 2147483647  ;;  %v1466_v28 = vsel %vm4176_vm13, %v3785_v47, 0.0 }
 0x58f   : > { %v1824_v58 = vpop.xlane.xlu0 %1823  ;;  %v4188_v42 = vpop.xlane.xlu1 %1802  ;;  %v2000_v61 = vshra.s32 %v4181_v3, 16  ;;  %v1474_v44 = vadd.f32 %v1466_v28, %v1050_v6  ;;  %v1924_v6 = vand.u32 65535, %v4032_v59 }
 0x590   : > { %4994 = vst [vmem:[#allocation49_spill] sm:$0xff] %v4188_v42  ;;  %vm1866_vm0 = vweird.f32 %v1824_v58  ;;  %vm2034_vm1 = vcmp.eq.f32.partialorder %v4002_v24, %v1824_v58  ;;  %vm1899_vm2 = vcmp.eq.f32.partialorder %v4005_v9, %v4188_v42 }
 0x591   : > { %vm4203_vm3 = vmxor %vm1866_vm0, %vm2857_vm11  ;;  %v2042_v0 = vsel %vm2034_vm1, %v3247_v26, 64  ;;  %v1907_v54 = vsel %vm1899_vm2, %v3247_v26, 64  ;;  %v4209_v46 = vcvt.s32.f32 %v2000_v61 }
 0x592   : > { %v4215_v42 = vsel %vm947_vm5, %v2042_v0, 2147483647  ;;  %v4218_v47 = vsel %vm947_vm5, %v1907_v54, 2147483647  ;;  %v1882_v25 = vsel %vm4203_vm3, %v1824_v58, 0.0  ;;  %v1051_v54 = vsel %vm4192_vm15, %v3422_v15, 0.0 }
 0x593   : > { %2003 = vmin.xlane.f32.xlu0 %v4209_v46  ;;  %v1827_v61 = vpop.xlane.xlu1 %1826  ;;  %v2136_v21 = vshra.s32 %v4215_v42, 16  ;;  %v2015_v4 = vshra.s32 %v4218_v47, 16  ;;  %v1475_v0 = vadd.f32 %v1467_v57, %v1051_v54  ;;  %v4241_v28 = vadd.f32 %v1882_v25, %v1474_v44 }
 0x594   : > { %vm1867_vm4 = vweird.f32 %v1827_v61  ;;  %vm2035_vm6 = vcmp.eq.f32.partialorder %v4013_v22, %v1827_v61  ;;  %v1926_v44 = vcvt.s32.f32 %v1924_v6  ;;  %v2045_v54 = vand.u32 65535, %v4046_v12 }
 0x595   : > { %vm1875_vm7 = vmxor %vm1867_vm4, %vm2857_vm11  ;;  %v2043_v8 = vsel %vm2035_vm6, %v3247_v26, 64  ;;  %v4234_v63 = vcvt.s32.f32 %v2136_v21  ;;  %v4236_v58 = vcvt.s32.f32 %v2015_v4  ;;  %v1909_v21 = vand.u32 65535, %v4028_v56 }
 0x596   : > { %v1883_v39 = vsel %vm1875_vm7, %v1827_v61, 0.0  ;;  %v4239_v55 = vsel %vm947_vm5, %v2043_v8, 2147483647  ;;  %v2047_v59 = vcvt.s32.f32 %v2045_v54 }
 0x597   : > { %2139 = vmin.xlane.f32.xlu0 %v4234_v63  ;;  %2018 = vmin.xlane.f32.xlu1 %v4236_v58  ;;  %v2151_v15 = vshra.s32 %v4239_v55, 16  ;;  %v4246_v57 = vadd.f32 %v1883_v39, %v1475_v0  ;;  %v1911_v25 = vcvt.s32.f32 %v1909_v21  ;;  %v2060_v39 = vand.u32 65535, %v4058_v31 }
 0x598   : > { %v1939_v21 = vand.u32 65535, %v4071_v11  ;;  %v2075_v31 = vand.u32 65535, %v4087_v7  ;;  %v2090_v11 = vand.u32 65535, %v4105_v14  ;;  %v1969_v14 = vand.u32 65535, %v4119_v23 }
 0x599   : > { %v4248_v51 = vcvt.s32.f32 %v2151_v15  ;;  %v2062_v12 = vcvt.s32.f32 %v2060_v39  ;;  %v2120_v23 = vand.u32 65535, %v4153_v2  ;;  %v1999_v2 = vand.u32 65535, %v4181_v3 }
 0x59a   : > { %v2150_v3 = vand.u32 65535, %v4239_v55 }
 0x59b   : > { %2154 = vmin.xlane.f32.xlu1 %v4248_v51 }
 0x5bc   : > { %v4253_v61 = vpop.xlane.xlu0 %1913 }
 0x5bd   : > { %vm1915_vm8 = vcmp.eq.f32.partialorder %v4039_v32, %v4253_v61  ;;  %v4257_v4 = vpop.xlane.xlu1 %1928  ;;  %v1920_v55 = vcvt.f32.s32 %v4253_v61 }
 0x5be   : > { %vm1930_vm9 = vcmp.eq.f32.partialorder %v4042_v33, %v4257_v4  ;;  %v1916_v0 = vsel %vm1915_vm8, %v1911_v25, inf  ;;  %v1941_v25 = vcvt.s32.f32 %v1939_v21 }
 0x5bf   : > { %1917 = vmin.xlane.f32.xlu0 %v1916_v0  ;;  %v1931_v8 = vsel %vm1930_vm9, %v1926_v44, inf  ;;  %v1954_v44 = vand.u32 65535, %v4090_v41 }
 0x5c0   : > { %1932 = vmin.xlane.f32.xlu1 %v1931_v8 }
 0x5c1   : > { %v4262_v56 = vpop.xlane.xlu0 %2049  ;;  %v1956_v8 = vcvt.s32.f32 %v1954_v44  ;;  %v2122_v44 = vcvt.s32.f32 %v2120_v23 }
 0x5c2   : > { %vm2051_vm10 = vcmp.eq.f32.partialorder %v4055_v34, %v4262_v56 }
 0x5c3   : > { %v2052_v32 = vsel %vm2051_vm10, %v2047_v59, inf  ;;  %v2092_v59 = vcvt.s32.f32 %v2090_v11 }
 0x5c4   : > { %2053 = vmin.xlane.f32.xlu0 %v2052_v32 }
 0x5c5   : > { %v4267_v15 = vpop.xlane.xlu1 %2064 }
 0x5c6   : > { %vm2066_vm12 = vcmp.eq.f32.partialorder %v4062_v17, %v4267_v15  ;;  %v2077_v17 = vcvt.s32.f32 %v2075_v31 }
 0x5c7   : > { %v2067_v33 = vsel %vm2066_vm12, %v2062_v12, inf  ;;  %v2105_v12 = vand.u32 65535, %v4135_v10 }
 0x5c8   : > { %2068 = vmin.xlane.f32.xlu1 %v2067_v33 }
 0x5dc   : > { %v4272_v6 = vpop.xlane.xlu0 %1943 }
 0x5dd   : > { %vm1945_vm13 = vcmp.eq.f32.partialorder %v4084_v18, %v4272_v6 }
 0x5de   : > { %v1946_v34 = vsel %vm1945_vm13, %v1941_v25, inf }
 0x5df   : > { %1947 = vmin.xlane.f32.xlu0 %v1946_v34 }
 0x5e0   : > { %v4278_v54 = vpop.xlane.xlu0 %2079  ;;  %v4280_v0 = vpop.xlane.xlu1 %1958 }
 0x5e1   : > { %vm2081_vm14 = vcmp.eq.f32.partialorder %v4100_v43, %v4278_v54  ;;  %vm1960_vm15 = vcmp.eq.f32.partialorder %v4102_v19, %v4280_v0  ;;  %v1971_v43 = vcvt.s32.f32 %v1969_v14  ;;  %v1984_v19 = vand.u32 65535, %v4138_v35 }
 0x5e2   : > { %v2082_v7 = vsel %vm2081_vm14, %v2077_v17, inf  ;;  %v1961_v41 = vsel %vm1960_vm15, %v1956_v8, inf  ;;  %v2135_v8 = vand.u32 65535, %v4215_v42 }
 0x5e3   : > { %2083 = vmin.xlane.f32.xlu0 %v2082_v7  ;;  %1962 = vmin.xlane.f32.xlu1 %v1961_v41  ;;  %v1986_v31 = vcvt.s32.f32 %v1984_v19 }
 0x5e4   : > { %v4287_v18 = vpop.xlane.xlu1 %2094 }
 0x5e5   : > { %vm2096_vm0 = vcmp.eq.f32.partialorder %v4110_v60, %v4287_v18  ;;  %v2107_v60 = vcvt.s32.f32 %v2105_v12  ;;  %v1921_v12 = vshll.u32 %v1920_v55, 16 }
 0x5e6   : > { %v2097_v39 = vsel %vm2096_vm0, %v2092_v59, inf }
 0x5e7   : > { %2098 = vmin.xlane.f32.xlu1 %v2097_v39  ;;  %v2152_v39 = vcvt.s32.f32 %v2150_v3  ;;  %v1950_v3 = vcvt.f32.s32 %v4272_v6 }
 0x5fc   : > { %v4292_v32 = vpop.xlane.xlu0 %1973 }
 0x5fd   : > { %vm1975_vm1 = vcmp.eq.f32.partialorder %v4132_v38, %v4292_v32 }
 0x5fe   : > { %v1976_v33 = vsel %vm1975_vm1, %v1971_v43, inf  ;;  %v1935_v43 = vcvt.f32.s32 %v4257_v4 }
 0x5ff   : > { %1977 = vmin.xlane.f32.xlu0 %v1976_v33 }
 0x600   : > { %v4298_v21 = vpop.xlane.xlu0 %2109  ;;  %v4300_v25 = vpop.xlane.xlu1 %1988 }
 0x601   : > { %vm2111_vm2 = vcmp.eq.f32.partialorder %v4148_v50, %v4298_v21  ;;  %vm1990_vm3 = vcmp.eq.f32.partialorder %v4150_v53, %v4300_v25  ;;  %v2001_v50 = vcvt.s32.f32 %v1999_v2  ;;  %v2014_v53 = vand.u32 65535, %v4218_v47 }
 0x602   : > { %v2112_v10 = vsel %vm2111_vm2, %v2107_v60, inf  ;;  %v1991_v35 = vsel %vm1990_vm3, %v1986_v31, inf  ;;  %v1936_v60 = vshll.u32 %v1935_v43, 16 }
 0x603   : > { %2113 = vmin.xlane.f32.xlu0 %v2112_v10  ;;  %1992 = vmin.xlane.f32.xlu1 %v1991_v35  ;;  %v2016_v59 = vcvt.s32.f32 %v2014_v53 }
 0x604   : > { %v4307_v38 = vpop.xlane.xlu1 %2124 }
 0x605   : > { %vm2126_vm4 = vcmp.eq.f32.partialorder %v4158_v48, %v4307_v38  ;;  %v2137_v48 = vcvt.s32.f32 %v2135_v8 }
 0x606   : > { %v2127_v34 = vsel %vm2126_vm4, %v2122_v44, inf }
 0x607   : > { %2128 = vmin.xlane.f32.xlu1 %v2127_v34 }
 0x61c   : > { %v4312_v17 = vpop.xlane.xlu0 %2003 }
 0x61d   : > { %vm2005_vm6 = vcmp.eq.f32.partialorder %v4209_v46, %v4312_v17 }
 0x61e   : > { %v2006_v11 = vsel %vm2005_vm6, %v2001_v50, inf }
 0x61f   : > { %2007 = vmin.xlane.f32.xlu0 %v2006_v11 }
 0x620   : > { %v4318_v7 = vpop.xlane.xlu0 %2139  ;;  %v4320_v41 = vpop.xlane.xlu1 %2018 }
 0x621   : > { %vm2141_vm7 = vcmp.eq.f32.partialorder %v4234_v63, %v4318_v7  ;;  %vm2020_vm8 = vcmp.eq.f32.partialorder %v4236_v58, %v4320_v41  ;;  %v2056_v58 = vcvt.f32.s32 %v4262_v56 }
 0x622   : > { %v2142_v42 = vsel %vm2141_vm7, %v2137_v48, inf  ;;  %v2021_v47 = vsel %vm2020_vm8, %v2016_v59, inf }
 0x623   : > { %2143 = vmin.xlane.f32.xlu0 %v2142_v42  ;;  %2022 = vmin.xlane.f32.xlu1 %v2021_v47  ;;  %v2057_v35 = vshll.u32 %v2056_v58, 16  ;;  %v2086_v42 = vcvt.f32.s32 %v4278_v54  ;;  %v1965_v47 = vcvt.f32.s32 %v4280_v0 }
 0x624   : > { %v4327_v46 = vpop.xlane.xlu1 %2154 }
 0x625   : > { %vm2156_vm9 = vcmp.eq.f32.partialorder %v4248_v51, %v4327_v46  ;;  %v2071_v51 = vcvt.f32.s32 %v4267_v15  ;;  %v2087_v43 = vshll.u32 %v2086_v42, 16 }
 0x626   : > { %v2157_v14 = vsel %vm2156_vm9, %v2152_v39, inf }
 0x627   : > { %2158 = vmin.xlane.f32.xlu1 %v2157_v14  ;;  %v2072_v53 = vshll.u32 %v2071_v51, 16  ;;  %v1951_v14 = vshll.u32 %v1950_v3, 16 }
 0x648   : > { %v1918_v63 = vpop.xlane.xlu0 %1917 }
 0x649   : > { %v1919_v19 = vcvt.f32.s32 %v1918_v63  ;;  %v1933_v33 = vpop.xlane.xlu1 %1932  ;;  %v1966_v63 = vshll.u32 %v1965_v47, 16 }
 0x64a   : > { %v1934_v31 = vcvt.f32.s32 %v1933_v33 }
 0x64b   : > { %v1922_v23 = vadd.s32 %v1921_v12, %v1919_v19  ;;  %v2101_v19 = vcvt.f32.s32 %v4287_v18 }
 0x64c   : > { %v1937_v10 = vadd.s32 %v1936_v60, %v1934_v31 }
 0x64d   : > { %v2054_v44 = vpop.xlane.xlu0 %2053  ;;  %vm2164_vm10 = vcmp.eq.s32.totalorder %v3247_v26, %v1922_v23  ;;  %v2102_v23 = vshll.u32 %v2101_v19, 16 }
 0x64e   : > { %v2055_v34 = vcvt.f32.s32 %v2054_v44  ;;  %v2172_v61 = vsel %vm2164_vm10, -inf, %v3912_v52  ;;  %vm2165_vm12 = vcmp.eq.s32.totalorder %v3247_v26, %v1937_v10 }
 0x64f   : > { %v2196_v4 = vsel %vm947_vm5, %v2172_v61, -inf  ;;  %v2173_v56 = vsel %vm2165_vm12, -inf, %v3917_v16 }
 0x650   : > { %v2058_v2 = vadd.s32 %v2057_v35, %v2055_v34  ;;  %2197 = vmax.xlane.f32.xlu0 %v2196_v4  ;;  %v2199_v50 = vsel %vm947_vm5, %v2173_v56, -inf  ;;  %v1980_v4 = vcvt.f32.s32 %v4292_v32 }
 0x651   : > { %2200 = vmax.xlane.f32.xlu1 %v2199_v50  ;;  %v2069_v8 = vpop.xlane.xlu1 %2068 }
 0x652   : > { %v2070_v11 = vcvt.f32.s32 %v2069_v8  ;;  %vm2180_vm13 = vcmp.eq.s32.totalorder %v3247_v26, %v2058_v2  ;;  %v1981_v2 = vshll.u32 %v1980_v4, 16  ;;  %v5001_v4 = vld [vmem:[#allocation12_spill] sm:$0xff] }
 0x653   : > { %v2188_v15 = vsel %vm2180_vm13, inf, %v3923_v1  ;;  %vm996_vm13 = vweird.f32 %v3249_v27 }
 0x654   : > { %v2073_v48 = vadd.s32 %v2072_v53, %v2070_v11  ;;  %v2220_v52 = vsel %vm947_vm5, %v2188_v15, inf }
 0x655   : > { %2221 = vmin.xlane.f32.xlu0 %v2220_v52  ;;  %v2131_v52 = vcvt.f32.s32 %v4307_v38 }
 0x656   : > { %vm2181_vm14 = vcmp.eq.s32.totalorder %v3247_v26, %v2073_v48 }
 0x657   : > { %v2189_v16 = vsel %vm2181_vm14, inf, %v3929_v30  ;;  %v2132_v42 = vshll.u32 %v2131_v52, 16 }
 0x658   : > { %v2223_v59 = vsel %vm947_vm5, %v2189_v16, inf }
 0x659   : > { %2224 = vmin.xlane.f32.xlu1 %v2223_v59 }
 0x668   : > { %v1948_v39 = vpop.xlane.xlu0 %1947 }
 0x669   : > { %v1949_v1 = vcvt.f32.s32 %v1948_v39 }
 0x66b   : > { %v1952_v55 = vadd.s32 %v1951_v14, %v1949_v1 }
 0x66c   : > { %v2084_v12 = vpop.xlane.xlu0 %2083  ;;  %v1963_v58 = vpop.xlane.xlu1 %1962 }
 0x66d   : > { %v2085_v30 = vcvt.f32.s32 %v2084_v12  ;;  %v1964_v33 = vcvt.f32.s32 %v1963_v58  ;;  %vm2166_vm15 = vcmp.eq.s32.totalorder %v3247_v26, %v1952_v55 }
 0x66e   : > { %v2174_v6 = vsel %vm2166_vm15, -inf, %v3939_v45 }
 0x66f   : > { %v2088_v60 = vadd.s32 %v2087_v43, %v2085_v30  ;;  %v1967_v54 = vadd.s32 %v1966_v63, %v1964_v33  ;;  %v2202_v0 = vsel %vm947_vm5, %v2174_v6, -inf  ;;  %v2010_v63 = vcvt.f32.s32 %v4312_v17 }
 0x670   : > { %2203 = vmax.xlane.f32.xlu0 %v2202_v0  ;;  %v2099_v31 = vpop.xlane.xlu1 %2098  ;;  %v2161_v0 = vcvt.f32.s32 %v4327_v46 }
 0x671   : > { %v2100_v10 = vcvt.f32.s32 %v2099_v31  ;;  %vm2182_vm0 = vcmp.eq.s32.totalorder %v3247_v26, %v2088_v60  ;;  %vm2167_vm1 = vcmp.eq.s32.totalorder %v3247_v26, %v1967_v54  ;;  %v2011_v58 = vshll.u32 %v2010_v63, 16 }
 0x672   : > { %v2190_v18 = vsel %vm2182_vm0, inf, %v3946_v40  ;;  %v2175_v35 = vsel %vm2167_vm1, -inf, %v3949_v13  ;;  %v2116_v40 = vcvt.f32.s32 %v4298_v21  ;;  %v1995_v13 = vcvt.f32.s32 %v4300_v25 }
 0x673   : > { %v2103_v44 = vadd.s32 %v2102_v23, %v2100_v10  ;;  %v2226_v51 = vsel %vm947_vm5, %v2190_v18, inf  ;;  %v2205_v45 = vsel %vm947_vm5, %v2175_v35, -inf  ;;  %v2162_v18 = vshll.u32 %v2161_v0, 16 }
 0x674   : > { %2227 = vmin.xlane.f32.xlu0 %v2226_v51  ;;  %2206 = vmax.xlane.f32.xlu1 %v2205_v45  ;;  %v2117_v53 = vshll.u32 %v2116_v40, 16  ;;  %v1996_v11 = vshll.u32 %v1995_v13, 16  ;;  %vm1029_vm0 = vweird.f32 %v5001_v4  ;;  %v5002_v40 = vld [vmem:[#allocation23_spill] sm:$0xff]  ;;  %v5088_v13 = vld [vmem:[#allocation32_spill] sm:$0xff] }
 0x675   : > { %vm2183_vm2 = vcmp.eq.s32.totalorder %v3247_v26, %v2103_v44  ;;  %vm1412_vm1 = vweird.f32 %v5002_v40 }
 0x676   : > { %v2191_v34 = vsel %vm2183_vm2, inf, %v3957_v29  ;;  %vm4401_vm2 = vmxor %vm996_vm13, %vm2857_vm11 }
 0x677   : > { %v2229_v61 = vsel %vm947_vm5, %v2191_v34, inf }
 0x678   : > { %2230 = vmin.xlane.f32.xlu1 %v2229_v61 }
 0x688   : > { %v1978_v56 = vpop.xlane.xlu0 %1977 }
 0x689   : > { %v1979_v50 = vcvt.f32.s32 %v1978_v56  ;;  %v5051_v56 = vld [vmem:[#allocation29_spill] sm:$0xff] }
 0x68b   : > { %v1982_v8 = vadd.s32 %v1981_v2, %v1979_v50  ;;  %v5010_v2 = vld [vmem:[#allocation25_spill] sm:$0xff]  ;;  %v5011_v50 = vmov 0 }
 0x68c   : > { %v2114_v15 = vpop.xlane.xlu0 %2113  ;;  %v1993_v48 = vpop.xlane.xlu1 %1992 }
 0x68d   : > { %v2115_v29 = vcvt.f32.s32 %v2114_v15  ;;  %v1994_v16 = vcvt.f32.s32 %v1993_v48  ;;  %vm2168_vm3 = vcmp.eq.s32.totalorder %v3247_v26, %v1982_v8  ;;  %v5020_v48 = vld [vmem:[#allocation26_spill] sm:$0xff]  ;;  %v5056_v8 = vld [vmem:[#allocation40_spill] sm:$0xff] }
 0x68e   : > { %v2176_v32 = vsel %vm2168_vm3, -inf, %v3967_v37  ;;  %v5102_v15 = vld [vmem:[#allocation34_spill] sm:$0xff] }
 0x68f   : > { %v2118_v59 = vadd.s32 %v2117_v53, %v2115_v29  ;;  %v1997_v21 = vadd.s32 %v1996_v11, %v1994_v16  ;;  %v2208_v25 = vsel %vm947_vm5, %v2176_v32, -inf  ;;  %v5017_v11 = vld [vmem:[#allocation38_spill] sm:$0xff]  ;;  %v5023_v16 = vld [vmem:[#allocation37_spill] sm:$0xff] }
 0x690   : > { %2209 = vmax.xlane.f32.xlu0 %v2208_v25  ;;  %v2129_v3 = vpop.xlane.xlu1 %2128  ;;  %v5099_v53 = vld [vmem:[#allocation45_spill] sm:$0xff] }
 0x691   : > { %v2130_v47 = vcvt.f32.s32 %v2129_v3  ;;  %vm2184_vm4 = vcmp.eq.s32.totalorder %v3247_v26, %v2118_v59  ;;  %vm2169_vm6 = vcmp.eq.s32.totalorder %v3247_v26, %v1997_v21  ;;  %v5070_v3 = vld [vmem:[#allocation43_spill] sm:$0xff] }
 0x692   : > { %v2192_v38 = vsel %vm2184_vm4, inf, %v3974_v20  ;;  %v2177_v39 = vsel %vm2169_vm6, -inf, %v3977_v49  ;;  %v2146_v20 = vcvt.f32.s32 %v4318_v7  ;;  %v2025_v49 = vcvt.f32.s32 %v4320_v41 }
 0x693   : > { %v2133_v14 = vadd.s32 %v2132_v42, %v2130_v47  ;;  %v2232_v1 = vsel %vm947_vm5, %v2192_v38, inf  ;;  %v2211_v37 = vsel %vm947_vm5, %v2177_v39, -inf  ;;  %vm1444_vm6 = vweird.f32 %v5010_v2  ;;  %v5029_v42 = vld [vmem:[#allocation39_spill] sm:$0xff] }
 0x694   : > { %2233 = vmin.xlane.f32.xlu0 %v2232_v1  ;;  %2212 = vmax.xlane.f32.xlu1 %v2211_v37  ;;  %v2147_v33 = vshll.u32 %v2146_v20, 16  ;;  %v2026_v6 = vshll.u32 %v2025_v49, 16  ;;  %vm4436_vm13 = vmxor %vm1444_vm6, %vm2857_vm11  ;;  %v1012_v38 = vsel %vm4401_vm2, %v3249_v27, 0.0 }
 0x695   : > { %vm2185_vm7 = vcmp.eq.s32.totalorder %v3247_v26, %v2133_v14  ;;  %v1460_v25 = vsel %vm4436_vm13, %v5010_v2, 0.0 }
 0x696   : > { %v2193_v55 = vsel %vm2185_vm7, inf, %v3985_v62  ;;  %vm4418_vm7 = vmxor %vm1029_vm0, %vm2857_vm11  ;;  %vm1829_vm0 = vweird.f32 %v5023_v16 }
 0x697   : > { %v2235_v43 = vsel %vm947_vm5, %v2193_v55, inf  ;;  %v5012_v50 = vsel %vm4418_vm7, 4294967295, %v5011_v50 }
 0x698   : > { %2236 = vmin.xlane.f32.xlu1 %v2235_v43 }
 0x6a8   : > { %v2008_v12 = vpop.xlane.xlu0 %2007 }
 0x6a9   : > { %v2009_v19 = vcvt.f32.s32 %v2008_v12 }
 0x6ab   : > { %v2012_v30 = vadd.s32 %v2011_v58, %v2009_v19 }
 0x6ac   : > { %v2144_v60 = vpop.xlane.xlu0 %2143  ;;  %v2023_v54 = vpop.xlane.xlu1 %2022 }
 0x6ad   : > { %v2145_v62 = vcvt.f32.s32 %v2144_v60  ;;  %v2024_v31 = vcvt.f32.s32 %v2023_v54  ;;  %vm2170_vm8 = vcmp.eq.s32.totalorder %v3247_v26, %v2012_v30 }
 0x6ae   : > { %v2178_v17 = vsel %vm2170_vm8, -inf, %v3995_v5  ;;  %vm4423_vm8 = vmxor %vm1412_vm1, %vm2857_vm11 }
 0x6af   : > { %v2148_v23 = vadd.s32 %v2147_v33, %v2145_v62  ;;  %v2027_v7 = vadd.s32 %v2026_v6, %v2024_v31  ;;  %v2214_v41 = vsel %vm947_vm5, %v2178_v17, -inf  ;;  %v1428_v21 = vsel %vm4423_vm8, %v5002_v40, 0.0  ;;  %vm4483_vm8 = vmxor %vm1829_vm0, %vm2857_vm11  ;;  %v5045_v40 = vld [vmem:[#allocation27_spill] sm:$0xff] }
 0x6b0   : > { %2215 = vmax.xlane.f32.xlu0 %v2214_v41  ;;  %v2159_v10 = vpop.xlane.xlu1 %2158  ;;  %v1436_v55 = vadd.f32 %v1428_v21, %v1012_v38  ;;  %v1845_v6 = vsel %vm4483_vm8, %v5023_v16, 0.0  ;;  %v5067_v16 = vld [vmem:[#allocation42_spill] sm:$0xff] }
 0x6b1   : > { %v2160_v35 = vcvt.f32.s32 %v2159_v10  ;;  %vm2186_vm9 = vcmp.eq.s32.totalorder %v3247_v26, %v2148_v23  ;;  %vm2171_vm10 = vcmp.eq.s32.totalorder %v3247_v26, %v2027_v7 }
 0x6b2   : > { %v2194_v46 = vsel %vm2186_vm9, inf, %v4002_v24  ;;  %v2179_v44 = vsel %vm2171_vm10, -inf, %v4005_v9  ;;  %v4999_v24 = vld [vmem:[#allocation10_spill] sm:$0xff]  ;;  %v5000_v9 = vld [vmem:[#allocation11_spill] sm:$0xff]  ;;  %vm1828_vm9 = vweird.f32 %v4017_v36 }
 0x6b3   : > { %v2163_v51 = vadd.s32 %v2162_v18, %v2160_v35  ;;  %v2238_v45 = vsel %vm947_vm5, %v2194_v46, inf  ;;  %v2217_v5 = vsel %vm947_vm5, %v2179_v44, -inf  ;;  %vm997_vm14 = vweird.f32 %v4999_v24 }
 0x6b4   : > { %2239 = vmin.xlane.f32.xlu0 %v2238_v45  ;;  %2218 = vmax.xlane.f32.xlu1 %v2217_v5  ;;  %vm1028_vm15 = vweird.f32 %v5000_v9 }
 0x6b5   : > { %vm2187_vm12 = vcmp.eq.s32.totalorder %v3247_v26, %v2163_v51  ;;  %v5005_v26 = vld [vmem:[#allocation24_spill] sm:$0xff]  ;;  %vm4412_vm4 = vmxor %vm1028_vm15, %vm2857_vm11 }
 0x6b6   : > { %v2195_v34 = vsel %vm2187_vm12, inf, %v4013_v22  ;;  %vm1413_vm3 = vweird.f32 %v5005_v26  ;;  %vm1860_vm12 = vweird.f32 %v5017_v11  ;;  %vm4442_vm15 = vmxor %vm1828_vm9, %vm2857_vm11  ;;  %vm1861_vm9 = vweird.f32 %v5029_v42  ;;  %v5091_v22 = vld [vmem:[#allocation33_spill] sm:$0xff] }
 0x6b7   : > { %v2241_v61 = vsel %vm947_vm5, %v2195_v34, inf  ;;  %vm4407_vm5 = vmxor %vm997_vm14, %vm2857_vm11  ;;  %vm1445_vm14 = vweird.f32 %v5020_v48  ;;  %v1044_v39 = vsel %vm4412_vm4, %v5000_v9, 0.0  ;;  %v1844_v14 = vsel %vm4442_vm15, %v4017_v36, 0.0  ;;  %v5039_v34 = vld [vmem:[#allocation13_spill] sm:$0xff]  ;;  %v5084_v9 = vld [vmem:[#allocation20_spill] sm:$0xff] }
 0x6b8   : > { %2242 = vmin.xlane.f32.xlu1 %v2241_v61  ;;  %vm4429_vm10 = vmxor %vm1413_vm3, %vm2857_vm11  ;;  %v1468_v43 = vadd.f32 %v1460_v25, %v1044_v39  ;;  %v1013_v58 = vsel %vm4407_vm5, %v4999_v24, 0.0  ;;  %v1852_v19 = vadd.f32 %v1844_v14, %v1436_v55  ;;  %vm4937_vm15 = vcmask 3072   ;;  %v5040_v61 = vld [vmem:[#allocation14_spill] sm:$0xff]  ;;  %v5041_v24 = vld [vmem:[#allocation15_spill] sm:$0xff] }
 0x6b9   : > { %vm4448_vm1 = vmxor %vm1860_vm12, %vm2857_vm11  ;;  %v1429_v36 = vsel %vm4429_vm10, %v5005_v26, 0.0  ;;  %vm1030_vm0 = vweird.f32 %v5039_v34  ;;  %v5048_v26 = vld [vmem:[#allocation28_spill] sm:$0xff]  ;;  %v5110_v25 = vld [vmem:[#allocation47_spill] sm:$0xff] }
 0x6ba   : > { %vm4463_vm6 = vmxor %vm1445_vm14, %vm2857_vm11  ;;  %v1876_v37 = vsel %vm4448_vm1, %v5017_v11, 0.0  ;;  %vm5038_vm14 = vnez %v5012_v50  ;;  %v1437_v0 = vadd.f32 %v1429_v36, %v1013_v58  ;;  %vm998_vm1 = vweird.f32 %v5040_v61  ;;  %v5059_v11 = vld [vmem:[#allocation41_spill] sm:$0xff]  ;;  %v5096_v50 = vld [vmem:[#allocation44_spill] sm:$0xff] }
 0x6bb   : > { %vm4491_vm2 = vmxor %vm1861_vm9, %vm2857_vm11  ;;  %v1461_v20 = vsel %vm4463_vm6, %v5020_v48, 0.0  ;;  %v1884_v30 = vadd.f32 %v1876_v37, %v1468_v43  ;;  %v1045_v33 = vsel %vm5038_vm14, %v5001_v4, 0.0  ;;  %v5044_v4 = vld [vmem:[#allocation16_spill] sm:$0xff]  ;;  %v5062_v48 = vld [vmem:[#allocation30_spill] sm:$0xff] }
 0x6bc   : > { %v1877_v60 = vsel %vm4491_vm2, %v5029_v42, 0.0  ;;  %v1469_v62 = vadd.f32 %v1461_v20, %v1045_v33  ;;  %v1853_v41 = vadd.f32 %v1845_v6, %v1437_v0  ;;  %vm4539_vm6 = vmxor %vm1030_vm0, %vm2857_vm11  ;;  %vm1031_vm9 = vweird.f32 %v5044_v4 }
 0x6bd   : > { %vm4546_vm8 = vmxor %vm998_vm1, %vm2857_vm11  ;;  %vm1446_vm2 = vweird.f32 %v5048_v26  ;;  %vm1862_vm0 = vweird.f32 %v5059_v11  ;;  %v1046_v47 = vsel %vm4539_vm6, %v5039_v34, 0.0  ;;  %v5080_v34 = vld [vmem:[#allocation18_spill] sm:$0xff] }
 0x6be   : > { %v1885_v10 = vadd.f32 %v1877_v60, %v1469_v62  ;;  %v1014_v38 = vsel %vm4546_vm8, %v5040_v61, 0.0  ;;  %v5081_v61 = vld [vmem:[#allocation19_spill] sm:$0xff] }
 0x6d9   : > { %v2198_v29 = vpop.xlane.xlu0 %2197 }
 0x6da   : > { %vm2244_vm3 = vweird.f32 %v2198_v29  ;;  %v2201_v59 = vpop.xlane.xlu1 %2200 }
 0x6db   : > { %vm4469_vm12 = vmxor %vm2244_vm3, %vm2857_vm11  ;;  %vm2245_vm7 = vweird.f32 %v2201_v59  ;;  %vm999_vm3 = vweird.f32 %v5041_v24 }
 0x6dc   : > { %v2260_v49 = vsel %vm4469_vm12, %v2198_v29, 0.0  ;;  %vm4506_vm4 = vmxor %vm2245_vm7, %vm2857_vm11  ;;  %vm1414_vm12 = vweird.f32 %v5045_v40  ;;  %v5107_v29 = vld [vmem:[#allocation46_spill] sm:$0xff] }
 0x6dd   : > { %v2268_v31 = vadd.f32 %v2260_v49, %v1852_v19  ;;  %v2261_v7 = vsel %vm4506_vm4, %v2201_v59, 0.0  ;;  %vm4552_vm4 = vmxor %vm999_vm3, %vm2857_vm11  ;;  %vm1447_vm3 = vweird.f32 %v5062_v48 }
 0x6de   : > { %v2222_v63 = vpop.xlane.xlu0 %2221  ;;  %v2269_v46 = vadd.f32 %v2261_v7, %v1853_v41  ;;  %vm4563_vm14 = vmxor %vm1414_vm12, %vm2857_vm11  ;;  %v1015_v12 = vsel %vm4552_vm4, %v5041_v24, 0.0  ;;  %v5123_v24 = vld [vmem:[#allocation22_spill] sm:$0xff] }
 0x6df   : > { %vm2276_vm13 = vweird.f32 %v2222_v63  ;;  %vm4586_vm12 = vmxor %vm1862_vm0, %vm2857_vm11  ;;  %v1430_v59 = vsel %vm4563_vm14, %v5045_v40, 0.0 }
 0x6e0   : > { %vm2284_vm10 = vmxor %vm2276_vm13, %vm2857_vm11  ;;  %vm1415_vm13 = vweird.f32 %v5051_v56  ;;  %v1878_v14 = vsel %vm4586_vm12, %v5059_v11, 0.0  ;;  %v1438_v55 = vadd.f32 %v1430_v59, %v1014_v38 }
 0x6e1   : > { %v2292_v54 = vsel %vm2284_vm10, %v2222_v63, 0.0  ;;  %vm4558_vm10 = vmxor %vm1031_vm9, %vm2857_vm11 }
 0x6e2   : > { %v2300_v17 = vadd.f32 %v2292_v54, %v1884_v30  ;;  %v2225_v23 = vpop.xlane.xlu1 %2224  ;;  %vm4575_vm1 = vmxor %vm1415_vm13, %vm2857_vm11  ;;  %v1047_v30 = vsel %vm4558_vm10, %v5044_v4, 0.0  ;;  %v5085_v4 = vld [vmem:[#allocation31_spill] sm:$0xff] }
 0x6e3   : > { %vm2277_vm5 = vweird.f32 %v2225_v23  ;;  %vm4598_vm13 = vmxor %vm1447_vm3, %vm2857_vm11  ;;  %v1431_v37 = vsel %vm4575_vm1, %v5051_v56, 0.0  ;;  %vm5077_vm3 = vcmask 3072  }
 0x6e4   : > { %v2308_v18 = vadd.f32 %v2300_v17, %v2268_v31  ;;  %vm2285_vm7 = vmxor %vm2277_vm5, %vm2857_vm11  ;;  %vm1830_vm5 = vweird.f32 %v5056_v8  ;;  %v1463_v20 = vsel %vm4598_vm13, %v5062_v48, 0.0  ;;  %v1439_v54 = vadd.f32 %v1431_v37, %v1015_v12 }
 0x6e5   : > { %v2293_v35 = vsel %vm2285_vm7, %v2225_v23, 0.0  ;;  %vm4569_vm7 = vmxor %vm1446_vm2, %vm2857_vm11  ;;  %vm1831_vm2 = vweird.f32 %v5067_v16  ;;  %v1471_v0 = vadd.f32 %v1463_v20, %v1047_v30  ;;  %vm1001_vm13 = vweird.f32 %v5081_v61 }
 0x6e6   : > { %v2316_v44 = vmul.f32 0.125, %v2308_v18  ;;  %v2301_v51 = vadd.f32 %v2293_v35, %v1885_v10  ;;  %vm4581_vm9 = vmxor %vm1830_vm5, %vm2857_vm11  ;;  %v1462_v21 = vsel %vm4569_vm7, %v5048_v26, 0.0  ;;  %vm1863_vm5 = vweird.f32 %v5070_v3  ;;  %v5128_v26 = vld [vmem:[#allocation49_spill] sm:$0xff] }
 0x6e7   : > { %v1846_v39 = vsel %vm4581_vm9, %v5056_v8, 0.0  ;;  %vm4621_vm14 = vmxor %vm1831_vm2, %vm2857_vm11  ;;  %v1470_v43 = vadd.f32 %v1462_v21, %v1046_v47  ;;  %vm1000_vm2 = vweird.f32 %v5080_v34 }
 0x6e8   : > { %2325 = vst.msk [vmem:[%s4529_s24] sm:$0xf] %vm4937_vm15, %v2316_v44  ;;  %v2309_v45 = vadd.f32 %v2301_v51, %v2269_v46  ;;  %vm4629_vm6 = vmxor %vm1863_vm5, %vm2857_vm11  ;;  %v1854_v58 = vadd.f32 %v1846_v39, %v1438_v55  ;;  %v1847_v33 = vsel %vm4621_vm14, %v5067_v16, 0.0  ;;  %vm1416_vm14 = vweird.f32 %v5085_v4 }
 0x6e9   : > { %v1886_v19 = vadd.f32 %v1878_v14, %v1470_v43  ;;  %v1879_v6 = vsel %vm4629_vm6, %v5070_v3, 0.0  ;;  %v1855_v7 = vadd.f32 %v1847_v33, %v1439_v54  ;;  %vm5078_vm9 = vmmov %vm5077_vm3 }
 0x6ea   : > { %v2317_v5 = vmul.f32 0.125, %v2309_v45  ;;  %v1887_v41 = vadd.f32 %v1879_v6, %v1471_v0  ;;  %vm4668_vm6 = vmxor %vm1000_vm2, %vm2857_vm11  ;;  %vm1449_vm2 = vweird.f32 %v5102_v15 }
 0x6eb   : > { %v1016_v47 = vsel %vm4668_vm6, %v5080_v34, 0.0  ;;  %v5121_v34 = vld [vmem:[#allocation48_spill] sm:$0xff] }
 0x6ec   : > { %2326 = vst.msk [vmem:[%s4529_s24 + $0x4] sm:$0xf] %vm4937_vm15, %v2317_v5  ;;  %v5079_v5 = vld [vmem:[#allocation17_spill] sm:$0xff] }
 0x6ed   : > { %vm1032_vm12 = vweird.f32 %v5079_v5 }
 0x6ee   : > { %vm4661_vm5 = vmxor %vm1032_vm12, %vm2857_vm11 }
 0x6ef   : > { %v1048_v42 = vsel %vm4661_vm5, %v5079_v5, 0.0  ;;  %v5120_v5 = vld [vmem:[#allocation21_spill] sm:$0xff] }
 0x6f9   : > { %v2204_v32 = vpop.xlane.xlu0 %2203 }
 0x6fa   : > { %vm2246_vm0 = vweird.f32 %v2204_v32 }
 0x6fb   : > { %vm4604_vm15 = vmxor %vm2246_vm0, %vm2857_vm11  ;;  %vm1033_vm0 = vweird.f32 %v5084_v9 }
 0x6fc   : > { %v2262_v49 = vsel %vm4604_vm15, %v2204_v32, 0.0 }
 0x6fd   : > { %v2228_v63 = vpop.xlane.xlu0 %2227  ;;  %v2207_v36 = vpop.xlane.xlu1 %2206  ;;  %v2270_v62 = vadd.f32 %v2262_v49, %v1854_v58 }
 0x6fe   : > { %vm2278_vm8 = vweird.f32 %v2228_v63  ;;  %vm2247_vm7 = vweird.f32 %v2207_v36 }
 0x6ff   : > { %vm2286_vm1 = vmxor %vm2278_vm8, %vm2857_vm11  ;;  %vm1448_vm8 = vweird.f32 %v5088_v13 }
 0x700   : > { %v2294_v60 = vsel %vm2286_vm1, %v2228_v63, 0.0  ;;  %vm2255_vm15 = vmxor %vm2247_vm7, %vm2857_vm11  ;;  %vm1417_vm1 = vweird.f32 %v5091_v22 }
 0x701   : > { %v2302_v31 = vadd.f32 %v2294_v60, %v1886_v19  ;;  %v2231_v17 = vpop.xlane.xlu1 %2230  ;;  %v2263_v23 = vsel %vm2255_vm15, %v2207_v36, 0.0  ;;  %vm4674_vm7 = vmxor %vm1001_vm13, %vm2857_vm11 }
 0x702   : > { %vm2279_vm4 = vweird.f32 %v2231_v17  ;;  %v2271_v46 = vadd.f32 %v2263_v23, %v1855_v7  ;;  %vm4680_vm15 = vmxor %vm1033_vm0, %vm2857_vm11  ;;  %v1017_v49 = vsel %vm4674_vm7, %v5081_v61, 0.0  ;;  %v5122_v61 = vld [vmem:[#allocation36_spill] sm:$0xff] }
 0x703   : > { %v2310_v10 = vadd.f32 %v2302_v31, %v2270_v62  ;;  %vm2287_vm10 = vmxor %vm2279_vm4, %vm2857_vm11  ;;  %v1049_v19 = vsel %vm4680_vm15, %v5084_v9, 0.0 }
 0x704   : > { %v2295_v18 = vsel %vm2287_vm10, %v2231_v17, 0.0  ;;  %vm4685_vm4 = vmxor %vm1416_vm14, %vm2857_vm11  ;;  %vm1832_vm10 = vweird.f32 %v5096_v50  ;;  %vm1833_vm14 = vweird.f32 %v5107_v29 }
 0x705   : > { %v2318_v35 = vmul.f32 0.125, %v2310_v10  ;;  %v2303_v44 = vadd.f32 %v2295_v18, %v1887_v41  ;;  %vm4697_vm12 = vmxor %vm1417_vm1, %vm2857_vm11  ;;  %v1432_v32 = vsel %vm4685_vm4, %v5085_v4, 0.0  ;;  %vm1865_vm1 = vweird.f32 %v5110_v25 }
 0x706   : > { %vm4703_vm13 = vmxor %vm1832_vm10, %vm2857_vm11  ;;  %v1433_v1 = vsel %vm4697_vm12, %v5091_v22, 0.0  ;;  %v1440_v37 = vadd.f32 %v1432_v32, %v1016_v47 }
 0x707   : > { %2327 = vst.msk [vmem:[%s4529_s24 + $0x8] sm:$0xf] %vm5077_vm3, %v2318_v35  ;;  %v2311_v51 = vadd.f32 %v2303_v44, %v2271_v46  ;;  %vm4691_vm3 = vmxor %vm1448_vm8, %vm2857_vm11  ;;  %v1848_v38 = vsel %vm4703_vm13, %v5096_v50, 0.0  ;;  %v1441_v60 = vadd.f32 %v1433_v1, %v1017_v49  ;;  %vm5117_vm13 = vcmask 3072  }
 0x708   : > { %v1464_v59 = vsel %vm4691_vm3, %v5088_v13, 0.0  ;;  %vm4720_vm8 = vmxor %vm1449_vm2, %vm2857_vm11  ;;  %v1856_v12 = vadd.f32 %v1848_v38, %v1440_v37 }
 0x709   : > { %v2319_v45 = vmul.f32 0.125, %v2311_v51  ;;  %vm4743_vm4 = vmxor %vm1833_vm14, %vm2857_vm11  ;;  %v1472_v55 = vadd.f32 %v1464_v59, %v1048_v42  ;;  %v1465_v36 = vsel %vm4720_vm8, %v5102_v15, 0.0  ;;  %vm1002_vm8 = vweird.f32 %v5120_v5 }
 0x70a   : > { %vm4751_vm5 = vmxor %vm1865_vm1, %vm2857_vm11  ;;  %v1849_v30 = vsel %vm4743_vm4, %v5107_v29, 0.0  ;;  %v1473_v54 = vadd.f32 %v1465_v36, %v1049_v19  ;;  %vm1834_vm1 = vweird.f32 %v5121_v34 }
 0x70b   : > { %2328 = vst.msk [vmem:[%s4529_s24 + $0xc] sm:$0xf] %vm5078_vm9, %v2319_v45  ;;  %vm1864_vm9 = vweird.f32 %v5099_v53  ;;  %v1881_v33 = vsel %vm4751_vm5, %v5110_v25, 0.0  ;;  %v1857_v23 = vadd.f32 %v1849_v30, %v1441_v60  ;;  %v5119_v45 = vld [vmem:[#allocation35_spill] sm:$0xff]  ;;  %vm1010_vm4 = vmxor %vm1002_vm8, %vm2857_vm11  ;;  %vm1003_vm5 = vweird.f32 %v5123_v24 }
 0x70c   : > { %vm4708_vm0 = vmxor %vm1864_vm9, %vm2857_vm11  ;;  %v1889_v7 = vadd.f32 %v1881_v33, %v1473_v54  ;;  %vm1418_vm14 = vweird.f32 %v5119_v45  ;;  %v1018_v56 = vsel %vm1010_vm4, %v5120_v5, 0.0  ;;  %vm5135_vm4 = vcmask 3072  }
 0x70d   : > { %v1880_v39 = vsel %vm4708_vm0, %v5099_v53, 0.0  ;;  %vm5118_vm0 = vmmov %vm5117_vm13 }
 0x70e   : > { %v1888_v58 = vadd.f32 %v1880_v39, %v1472_v55 }
 0x719   : > { %v2210_v16 = vpop.xlane.xlu0 %2209 }
 0x71a   : > { %vm2248_vm10 = vweird.f32 %v2210_v16 }
 0x71b   : > { %vm4726_vm9 = vmxor %vm2248_vm10, %vm2857_vm11 }
 0x71c   : > { %v2264_v20 = vsel %vm4726_vm9, %v2210_v16, 0.0  ;;  %vm1426_vm10 = vmxor %vm1418_vm14, %vm2857_vm11  ;;  %vm1419_vm9 = vweird.f32 %v5122_v61 }
 0x71d   : > { %v2234_v27 = vpop.xlane.xlu0 %2233  ;;  %v2213_v63 = vpop.xlane.xlu1 %2212  ;;  %v2272_v0 = vadd.f32 %v2264_v20, %v1856_v12  ;;  %v1434_v40 = vsel %vm1426_vm10, %v5119_v45, 0.0 }
 0x71e   : > { %vm2280_vm6 = vweird.f32 %v2234_v27  ;;  %vm2249_vm3 = vweird.f32 %v2213_v63  ;;  %v1442_v8 = vadd.f32 %v1434_v40, %v1018_v56 }
 0x71f   : > { %vm2288_vm12 = vmxor %vm2280_vm6, %vm2857_vm11 }
 0x720   : > { %v2296_v6 = vsel %vm2288_vm12, %v2234_v27, 0.0  ;;  %vm2257_vm2 = vmxor %vm2249_vm3, %vm2857_vm11  ;;  %vm1835_vm12 = vweird.f32 %v5128_v26 }
 0x721   : > { %v2304_v62 = vadd.f32 %v2296_v6, %v1888_v58  ;;  %v2237_v31 = vpop.xlane.xlu1 %2236  ;;  %v2265_v17 = vsel %vm2257_vm2, %v2213_v63, 0.0  ;;  %vm4787_vm6 = vmxor %vm1834_vm1, %vm2857_vm11 }
 0x722   : > { %vm2281_vm7 = vweird.f32 %v2237_v31  ;;  %v2273_v35 = vadd.f32 %v2265_v17, %v1857_v23  ;;  %vm4793_vm3 = vmxor %vm1419_vm9, %vm2857_vm11  ;;  %v1850_v50 = vsel %vm4787_vm6, %v5121_v34, 0.0 }
 0x723   : > { %v2312_v41 = vadd.f32 %v2304_v62, %v2272_v0  ;;  %vm2289_vm15 = vmxor %vm2281_vm7, %vm2857_vm11  ;;  %v1435_v48 = vsel %vm4793_vm3, %v5122_v61, 0.0  ;;  %v1858_v29 = vadd.f32 %v1850_v50, %v1442_v8 }
 0x724   : > { %v2297_v10 = vsel %vm2289_vm15, %v2237_v31, 0.0  ;;  %vm4805_vm15 = vmxor %vm1003_vm5, %vm2857_vm11 }
 0x725   : > { %v2320_v18 = vmul.f32 0.125, %v2312_v41  ;;  %v2305_v46 = vadd.f32 %v2297_v10, %v1889_v7  ;;  %v1019_v16 = vsel %vm4805_vm15, %v5123_v24, 0.0  ;;  %vm5136_vm5 = vmmov %vm5135_vm4 }
 0x726   : > { %v1443_v21 = vadd.f32 %v1435_v48, %v1019_v16 }
 0x727   : > { %2329 = vst.msk [vmem:[%s4529_s24 + $0x10] sm:$0xf] %vm5117_vm13, %v2320_v18  ;;  %v2313_v44 = vadd.f32 %v2305_v46, %v2273_v35  ;;  %vm4813_vm13 = vmxor %vm1835_vm12, %vm2857_vm11 }
 0x728   : > { %v1851_v32 = vsel %vm4813_vm13, %v5128_v26, 0.0 }
 0x729   : > { %v2321_v51 = vmul.f32 0.125, %v2313_v44  ;;  %v1859_v38 = vadd.f32 %v1851_v32, %v1443_v21 }
 0x72b   : > { %2330 = vst.msk [vmem:[%s4529_s24 + $0x14] sm:$0xf] %vm5118_vm0, %v2321_v51 }
 0x739   : > { %v2216_v4 = vpop.xlane.xlu0 %2215 }
 0x73a   : > { %vm2250_vm2 = vweird.f32 %v2216_v4 }
 0x73b   : > { %vm4799_vm7 = vmxor %vm2250_vm2, %vm2857_vm11 }
 0x73c   : > { %v2266_v52 = vsel %vm4799_vm7, %v2216_v4, 0.0 }
 0x73d   : > { %v2240_v11 = vpop.xlane.xlu0 %2239  ;;  %v2219_v15 = vpop.xlane.xlu1 %2218  ;;  %v2274_v25 = vadd.f32 %v2266_v52, %v1858_v29 }
 0x73e   : > { %vm2282_vm0 = vweird.f32 %v2240_v11  ;;  %vm2251_vm14 = vweird.f32 %v2219_v15 }
 0x73f   : > { %vm2290_vm8 = vmxor %vm2282_vm0, %vm2857_vm11 }
 0x740   : > { %v2298_v59 = vsel %vm2290_vm8, %v2240_v11, 0.0  ;;  %vm2259_vm1 = vmxor %vm2251_vm14, %vm2857_vm11 }
 0x741   : > { %v2306_v3 = vadd.f32 %v2298_v59, %v4241_v28  ;;  %v2243_v42 = vpop.xlane.xlu1 %2242  ;;  %v2267_v47 = vsel %vm2259_vm1, %v2219_v15, 0.0 }
 0x742   : > { %vm2283_vm10 = vweird.f32 %v2243_v42  ;;  %v2275_v37 = vadd.f32 %v2267_v47, %v1859_v38 }
 0x743   : > { %v2314_v39 = vadd.f32 %v2306_v3, %v2274_v25  ;;  %vm2291_vm9 = vmxor %vm2283_vm10, %vm2857_vm11 }
 0x744   : > { %v2299_v14 = vsel %vm2291_vm9, %v2243_v42, 0.0 }
 0x745   : > { %v2322_v1 = vmul.f32 0.125, %v2314_v39  ;;  %v2307_v55 = vadd.f32 %v2299_v14, %v4246_v57 }
 0x747   : > { %2331 = vst.msk [vmem:[%s4529_s24 + $0x18] sm:$0xf] %vm5135_vm4, %v2322_v1  ;;  %v2315_v43 = vadd.f32 %v2307_v55, %v2275_v37 }
 0x749   : > { %v2323_v27 = vmul.f32 0.125, %v2315_v43 }
 0x74b   : > { %2332 = vst.msk [vmem:[%s4529_s24 + $0x1c] sm:$0xf] %vm5136_vm5, %v2323_v27 }
 0x74c PF: > { %p15_p0 = scmp.ge.s32.totalorder %s2904_s19, 4   ;;  %s5137_s15 = smov %s2835_s16 }
 0x74d   : > { %s5138_s16 = smov %s2839_s17  ;;  %s5139_s17 = smov %s2914_s22 }
 0x74e   : > { %s5140_s18 = smov %s2904_s19  ;;  %17 = sbr.rel (!%p15_p0) target bundleno = 4 (0x4), region = 91 }
 0x753   :  { %2355 = vsyncpa [#allocation3], 1 }
 0x754   :  { %2357 = vsyncpa [#allocation3 + $0x1], 1 }
 0x755   :  { %2358 = vsyncpa [#allocation5], 1 }

</bundles_post_ra>
